<compile_context>
chip_gen: v6e
topology: v6e:2x2x1
jax: 0.10.0
libtpu: 0.0.40
codegen_flags: <defaults>
</compile_context>

<pallas_src>
import functools

import numpy as np
import jax
import jax.numpy as jnp
from jax.experimental import pallas as pl
from jax.experimental.pallas import tpu as pltpu

# ------------------------- small GPT-2 config -------------------------
VOCAB = 128           # config.vocab_size
HIDDEN = 32           # config.hidden_size / n_embd
N_HEAD = 4            # config.num_attention_heads
HEAD_DIM = HIDDEN // N_HEAD
N_LAYER = 2           # config.num_hidden_layers
BLOCK_SIZE = 8        # block_size (= sequence length per block)
MAX_POS = 16          # config.max_position_embeddings
INNER = 4 * HIDDEN    # config.n_inner is None -> 4 * hidden
LN_EPS = 1e-5         # config.layer_norm_epsilon
BATCH = 2

# 128-lane-aligned packed-weight column offsets (feedback: tile-aligned slices)
PAD = 128
COL_Q, COL_K, COL_V, COL_O, COL_FC = 0, PAD, 2 * PAD, 3 * PAD, 4 * PAD
W_IN_COLS = 4 * PAD + INNER            # 640 columns per layer

_VMEM_SPEC = pl.BlockSpec(memory_space=pltpu.MemorySpace.VMEM)


# ------------------------- shared math helpers -------------------------
def _layernorm(x, g, b):
    mu = jnp.mean(x, axis=-1, keepdims=True)
    var = jnp.mean((x - mu) * (x - mu), axis=-1, keepdims=True)
    return (x - mu) * jax.lax.rsqrt(var + LN_EPS) * g + b


def _gelu_tanh(x):
    # TODO(synk): nn.GELU() default is exact-erf GELU; tanh approximation used
    # here (single EUP tanh instead of a 10-op VALU erf polynomial). Max abs
    # deviation ~3e-4; the pure-JAX reference below uses the same form.
    c0 = np.float32(0.7978845608028654)   # sqrt(2/pi)
    c1 = np.float32(0.044715)
    return 0.5 * x * (1.0 + jnp.tanh(c0 * (x + c1 * x * x * x)))


# ------------------------- fused forward kernel -------------------------
def _gpt2_forward_kernel(h_ref, ab_ref, ln_ref, w_in_ref, w_pj_ref, b_ref,
                         w_lm_ref, out_ref, *, num_heads, num_layers):
    # h_ref    : (B*S, D)              embedded tokens (residual stream)
    # ab_ref   : (B, S, S, H)          additive causal + key-padding bias
    # ln_ref   : (4*L + 2, D)          [ln1_g, ln1_b, ln2_g, ln2_b]*L + [lnf_g, lnf_b]
    # w_in_ref : (L, D, 640)           lane-aligned [Wq|Wk|Wv|Wo|Wfc] (scale folded in Wq)
    # w_pj_ref : (L, INNER, D)         MLP down-projection
    # b_ref    : (L, 4, 640)           row0: qkv bias (aligned), row1: b_o, row2: b_fc, row3: b_pj
    # w_lm_ref : (D, V)                lm_head.weight.T (no bias)
    # out_ref  : (B, S, V)             logits (lane-dense: V = 128)
    BS, D = h_ref.shape
    B, S, V = out_ref.shape
    hd = D // num_heads

    x = h_ref[...]                       # residual stream, stays on-chip
    attn_bias = ab_ref[...]              # (B, S, S, H), hoisted once for all layers
    ln = ln_ref[...]                     # single load of all LN params (hoisted)

    # Head-selector matrices (built once, hoisted out of the layer loop).
    # sel_dh[d, h] = 1 if lane d belongs to head h; sel_hd is its transpose.
    d_idx = jax.lax.broadcasted_iota(jnp.int32, (D, num_heads), 0)
    h_idx = jax.lax.broadcasted_iota(jnp.int32, (D, num_heads), 1)
    sel_dh = ((d_idx >= h_idx * hd) & (d_idx < (h_idx + 1) * hd)).astype(jnp.float32)
    h_idx2 = jax.lax.broadcasted_iota(jnp.int32, (num_heads, D), 0)
    d_idx2 = jax.lax.broadcasted_iota(jnp.int32, (num_heads, D), 1)
    sel_hd = ((d_idx2 >= h_idx2 * hd) & (d_idx2 < (h_idx2 + 1) * hd)).astype(jnp.float32)

    # TODO(synk): at real GPT-2 scale, cast MXU operands (LN output, weights) to
    # bfloat16 with f32 accumulation on v6e/v7x (keep LN/softmax/GELU elementwise
    # math in f32, esp. on v5e which has no bf16 VPU/EUP).
    for l in range(num_layers):
        g1 = ln[4 * l + 0:4 * l + 1, :]
        b1 = ln[4 * l + 1:4 * l + 2, :]
        g2 = ln[4 * l + 2:4 * l + 3, :]
        b2 = ln[4 * l + 3:4 * l + 4, :]

        # ---------------- attention ----------------
        h = _layernorm(x, g1, b1)                                    # ln_1
        qkv = jnp.dot(h, w_in_ref[l, :, 0:COL_O],                    # fused q/k/v proj
                      preferred_element_type=jnp.float32) + b_ref[l, 0:1, 0:COL_O]
        # lane-tile-aligned slices (starts at 0 / 128 / 256); scale pre-folded in Wq
        q3 = qkv[:, COL_Q:COL_Q + D].reshape(B, S, D)
        k3 = qkv[:, COL_K:COL_K + D].reshape(B, S, D)
        v3 = qkv[:, COL_V:COL_V + D].reshape(B, S, D)

        # scores for all heads at once: VPU broadcast product + per-head lane
        # contraction via one selector matmul  ->  s[b,q,k,h]
        prod = q3[:, :, None, :] * k3[:, None, :, :]                 # (B, q, k, D)
        s = jnp.dot(prod.reshape(B * S * S, D), sel_dh,
                    preferred_element_type=jnp.float32).reshape(B, S, S, num_heads)
        s = s + attn_bias                                            # causal + padding

        # softmax over keys (axis=2, the sublane dim of (q, k, H) tiles)
        m = jnp.max(s, axis=2, keepdims=True)
        e = jnp.exp(s - m)
        p = e * pl.reciprocal(jnp.sum(e, axis=2, keepdims=True), approx=True)

        # PV for all heads: expand head probs back to D lanes, weight V, reduce over keys
        p_exp = jnp.dot(p.reshape(B * S * S, num_heads), sel_hd,
                        preferred_element_type=jnp.float32).reshape(B, S, S, D)
        attn = jnp.sum(p_exp * v3[:, None, :, :], axis=2).reshape(BS, D)   # heads merged

        proj = jnp.dot(attn, w_in_ref[l, :, COL_O:COL_O + D],        # c_proj (attn)
                       preferred_element_type=jnp.float32) + b_ref[l, 1:2, 0:D]
        # TODO(synk): attn/resid/embd dropouts are identity in eval mode; not modeled.
        x = x + proj                                                 # residual 1

        # ---------------- MLP ----------------
        h = _layernorm(x, g2, b2)                                    # ln_2
        f = jnp.dot(h, w_in_ref[l, :, COL_FC:COL_FC + INNER],        # c_fc
                    preferred_element_type=jnp.float32) + b_ref[l, 2:3, 0:INNER]
        f = _gelu_tanh(f)
        f = jnp.dot(f, w_pj_ref[l],                                  # c_proj (MLP)
                    preferred_element_type=jnp.float32) + b_ref[l, 3:4, 0:D]
        x = x + f                                                    # residual 2

    # ---------------- final LN + lm_head ----------------
    gf = ln[4 * num_layers + 0:4 * num_layers + 1, :]
    bf = ln[4 * num_layers + 1:4 * num_layers + 2, :]
    h = _layernorm(x, gf, bf)
    logits = jnp.dot(h, w_lm_ref[...], preferred_element_type=jnp.float32)
    out_ref[...] = logits.reshape(B, S, V)


def _run_fused_forward(h2d, attn_bias4, packed, B, S):
    kernel = functools.partial(_gpt2_forward_kernel,
                               num_heads=N_HEAD, num_layers=N_LAYER)
    return pl.pallas_call(
        kernel,
        out_shape=jax.ShapeDtypeStruct((B, S, VOCAB), jnp.float32),
        in_specs=[_VMEM_SPEC] * 7,
        out_specs=_VMEM_SPEC,
        # TODO(synk): at real GPT-2 scale, add a ("parallel",) 1-D grid over
        # row-tiles of B*S (engages v7x's 2nd TensorCore) and tile lm_head over
        # the vocab dim; size the vocab tile for v7x's 64 MiB VMEM (set
        # pltpu.CompilerParams(vmem_limit_bytes=...) per generation, keep the
        # tile a multiple of 128 lanes). At B*S=16 a grid-less call is best.
    )(h2d, attn_bias4, packed['ln'], packed['w_in'], packed['w_pj'],
      packed['bias'], packed['w_lm'])


# ------------------------- glue: embeddings + mask + kernel call -------------------------
def forward(input_ids, attention_mask, wte, wpe, packed):
    B, S = input_ids.shape                               # input already (-1, block_size)
    pos = jnp.arange(S, dtype=jnp.int32)
    h = wte[input_ids] + wpe[pos][None, :, :]            # embedding gathers stay in JAX
    h2d = h.reshape(B * S, HIDDEN).astype(jnp.float32)
    # embedding dropout: identity in eval mode

    # (1 - mask) * -1e6 key-padding bias  +  large-finite causal bias (no -inf -> no NaN)
    mask_add = (1.0 - attention_mask.astype(jnp.float32)) * -1000000.0      # (B, S) keys
    causal = jnp.tril(jnp.ones((S, S), jnp.float32))
    causal_bias = jnp.where(causal > 0, 0.0, -1e9).astype(jnp.float32)
    attn_bias = causal_bias[None, :, :] + mask_add[:, None, :]              # (B, q, k)
    # hoist the per-head broadcast out of the kernel's layer loop entirely
    attn_bias4 = jnp.broadcast_to(attn_bias[:, :, :, None], (B, S, S, N_HEAD))

    return _run_fused_forward(h2d, attn_bias4, packed, B, S)


# ------------------------- parameter init (module layout) -------------------------
def init_params(key):
    def normal(k, shape, scale=0.02):
        return (scale * jax.random.normal(k, shape, jnp.float32)).astype(jnp.float32)

    keys = jax.random.split(key, 3 + N_LAYER)
    params = {
        'wte': normal(keys[0], (VOCAB, HIDDEN)),
        'wpe': normal(keys[1], (MAX_POS, HIDDEN)),
        'w_lm': normal(keys[2], (HIDDEN, VOCAB)),        # lm_head.weight.T (no bias)
        'lnf_g': jnp.ones((HIDDEN,), jnp.float32),
        'lnf_b': jnp.zeros((HIDDEN,), jnp.float32),
        'blocks': [],
    }
    for l in range(N_LAYER):
        bk = jax.random.split(keys[3 + l], 6)
        params['blocks'].append({
            'ln1_g': jnp.ones((HIDDEN,), jnp.float32), 'ln1_b': jnp.zeros((HIDDEN,), jnp.float32),
            'w_q': normal(bk[0], (HIDDEN, HIDDEN)), 'b_q': jnp.zeros((HIDDEN,), jnp.float32),
            'w_k': normal(bk[1], (HIDDEN, HIDDEN)), 'b_k': jnp.zeros((HIDDEN,), jnp.float32),
            'w_v': normal(bk[2], (HIDDEN, HIDDEN)), 'b_v': jnp.zeros((HIDDEN,), jnp.float32),
            'w_o': normal(bk[3], (HIDDEN, HIDDEN)), 'b_o': jnp.zeros((HIDDEN,), jnp.float32),
            'ln2_g': jnp.ones((HIDDEN,), jnp.float32), 'ln2_b': jnp.zeros((HIDDEN,), jnp.float32),
            'w_fc': normal(bk[4], (HIDDEN, INNER)), 'b_fc': jnp.zeros((INNER,), jnp.float32),
            'w_pj': normal(bk[5], (INNER, HIDDEN)), 'b_pj': jnp.zeros((HIDDEN,), jnp.float32),
        })
    return params


def pack_params(p):
    """Pack module-layout params into the lane-aligned stacked kernel operands."""
    scale = np.float32(1.0 / np.sqrt(HEAD_DIM))          # scale_attn_weights folded into Wq/bq
    ln_rows, w_in, w_pj, biases = [], [], [], []
    for blk in p['blocks']:
        ln_rows += [blk['ln1_g'], blk['ln1_b'], blk['ln2_g'], blk['ln2_b']]
        w = jnp.zeros((HIDDEN, W_IN_COLS), jnp.float32)
        w = w.at[:, COL_Q:COL_Q + HIDDEN].set(blk['w_q'] * scale)
        w = w.at[:, COL_K:COL_K + HIDDEN].set(blk['w_k'])
        w = w.at[:, COL_V:COL_V + HIDDEN].set(blk['w_v'])
        w = w.at[:, COL_O:COL_O + HIDDEN].set(blk['w_o'])
        w = w.at[:, COL_FC:COL_FC + INNER].set(blk['w_fc'])
        w_in.append(w)
        w_pj.append(blk['w_pj'])
        b = jnp.zeros((4, W_IN_COLS), jnp.float32)
        b = b.at[0, COL_Q:COL_Q + HIDDEN].set(blk['b_q'] * scale)
        b = b.at[0, COL_K:COL_K + HIDDEN].set(blk['b_k'])
        b = b.at[0, COL_V:COL_V + HIDDEN].set(blk['b_v'])
        b = b.at[1, 0:HIDDEN].set(blk['b_o'])
        b = b.at[2, 0:INNER].set(blk['b_fc'])
        b = b.at[3, 0:HIDDEN].set(blk['b_pj'])
        biases.append(b)
    ln_rows += [p['lnf_g'], p['lnf_b']]
    return {
        'ln': jnp.stack(ln_rows),      # (4*L + 2, D)
        'w_in': jnp.stack(w_in),       # (L, D, 640)  lane-aligned [Wq|Wk|Wv|Wo|Wfc]
        'w_pj': jnp.stack(w_pj),       # (L, INNER, D)
        'bias': jnp.stack(biases),     # (L, 4, 640)
        'w_lm': p['w_lm'],             # (D, V)
    }


# ------------------------- pure-JAX reference (tolerance gate) -------------------------
def forward_reference(input_ids, attention_mask, params):
    B, S = input_ids.shape
    H, hd = N_HEAD, HEAD_DIM
    hp = jax.lax.Precision.HIGHEST
    h = params['wte'][input_ids] + params['wpe'][jnp.arange(S, dtype=jnp.int32)][None]
    h = h.astype(jnp.float32)
    mask_add = (1.0 - attention_mask.astype(jnp.float32)) * -1000000.0
    causal = jnp.tril(jnp.ones((S, S), jnp.float32))
    bias4 = (jnp.where(causal > 0, 0.0, -1e9).astype(jnp.float32)[None, None]
             + mask_add[:, None, None, :])
    for blk in params['blocks']:
        x = h
        hn = _layernorm(x, blk['ln1_g'], blk['ln1_b'])
        q = jnp.einsum('bsd,de->bse', hn, blk['w_q'], precision=hp) + blk['b_q']
        k = jnp.einsum('bsd,de->bse', hn, blk['w_k'], precision=hp) + blk['b_k']
        v = jnp.einsum('bsd,de->bse', hn, blk['w_v'], precision=hp) + blk['b_v']
        q = q.reshape(B, S, H, hd).transpose(0, 2, 1, 3)
        k = k.reshape(B, S, H, hd).transpose(0, 2, 1, 3)
        v = v.reshape(B, S, H, hd).transpose(0, 2, 1, 3)
        s = jnp.einsum('bhqd,bhkd->bhqk', q, k, precision=hp) / np.sqrt(hd) + bias4
        p_ = jax.nn.softmax(s, axis=-1)
        o = jnp.einsum('bhqk,bhkd->bhqd', p_, v, precision=hp)
        o = o.transpose(0, 2, 1, 3).reshape(B, S, HIDDEN)
        x = x + jnp.einsum('bsd,de->bse', o, blk['w_o'], precision=hp) + blk['b_o']
        hn = _layernorm(x, blk['ln2_g'], blk['ln2_b'])
        f = _gelu_tanh(jnp.einsum('bsd,de->bse', hn, blk['w_fc'], precision=hp) + blk['b_fc'])
        h = x + jnp.einsum('bse,ed->bsd', f, blk['w_pj'], precision=hp) + blk['b_pj']
    h = _layernorm(h, params['lnf_g'], params['lnf_b'])
    return jnp.einsum('bsd,dv->bsv', h, params['w_lm'], precision=hp)


if __name__ == "__main__":
    key = jax.random.PRNGKey(0)
    pkey, ikey = jax.random.split(key)
    params = init_params(pkey)
    packed = pack_params(params)

    input_ids = jax.random.randint(ikey, (BATCH, BLOCK_SIZE), 0, VOCAB, dtype=jnp.int32)
    attention_mask = jnp.ones((BATCH, BLOCK_SIZE), jnp.float32)

    fwd = jax.jit(forward)
    logits = fwd(input_ids, attention_mask, params['wte'], params['wpe'], packed)
    jax.block_until_ready(logits)
    assert logits.shape == (BATCH, BLOCK_SIZE, VOCAB) and logits.dtype == jnp.float32

    ref = forward_reference(input_ids, attention_mask, params)
    err = float(jnp.max(jnp.abs(logits - ref)))
    assert err < 1e-2, f"kernel/reference mismatch: max abs err {err}"
    print("KERNEL_OK")
</pallas_src>

<mosaic_0001>
module attributes {stable_mosaic.version = 11 : i64} {
  func.func @_gpt2_forward_kernel(%arg0: memref<16x32xf32, #tpu.memory_space<vmem>>, %arg1: memref<2x8x8x4xf32, #tpu.memory_space<vmem>>, %arg2: memref<10x32xf32, #tpu.memory_space<vmem>>, %arg3: memref<2x32x640xf32, #tpu.memory_space<vmem>>, %arg4: memref<2x128x32xf32, #tpu.memory_space<vmem>>, %arg5: memref<2x4x640xf32, #tpu.memory_space<vmem>>, %arg6: memref<32x128xf32, #tpu.memory_space<vmem>>, %arg7: memref<2x8x128xf32, #tpu.memory_space<vmem>>) attributes {dimension_semantics = [], scalar_prefetch = 0 : i64, scratch_operands = 0 : i64, tpu.core_type = #tpu.core_type<tc>} {
    %c0 = arith.constant 0 : index
    %c0_0 = arith.constant 0 : index
    %0 = vector.load %arg0[%c0, %c0_0] : memref<16x32xf32, #tpu.memory_space<vmem>>, vector<16x32xf32>
    %c0_1 = arith.constant 0 : index
    %c0_2 = arith.constant 0 : index
    %c0_3 = arith.constant 0 : index
    %c0_4 = arith.constant 0 : index
    %1 = vector.load %arg1[%c0_1, %c0_2, %c0_3, %c0_4] : memref<2x8x8x4xf32, #tpu.memory_space<vmem>>, vector<2x8x8x4xf32>
    %c0_5 = arith.constant 0 : index
    %c0_6 = arith.constant 0 : index
    %2 = vector.load %arg2[%c0_5, %c0_6] : memref<10x32xf32, #tpu.memory_space<vmem>>, vector<10x32xf32>
    %3 = tpu.iota {dimensions = array<i32: 0>} : vector<32x4xi32>
    %4 = tpu.iota {dimensions = array<i32: 1>} : vector<32x4xi32>
    %c8_i32 = arith.constant 8 : i32
    %5 = vector.broadcast %c8_i32 : i32 to vector<32x4xi32>
    %6 = arith.muli %4, %5 : vector<32x4xi32>
    %7 = arith.cmpi sge, %3, %6 : vector<32x4xi32>
    %c1_i32 = arith.constant 1 : i32
    %8 = vector.broadcast %c1_i32 : i32 to vector<32x4xi32>
    %9 = arith.addi %4, %8 : vector<32x4xi32>
    %c8_i32_7 = arith.constant 8 : i32
    %10 = vector.broadcast %c8_i32_7 : i32 to vector<32x4xi32>
    %11 = arith.muli %9, %10 : vector<32x4xi32>
    %12 = arith.cmpi slt, %3, %11 : vector<32x4xi32>
    %13 = arith.andi %7, %12 : vector<32x4xi1>
    %14 = arith.extui %13 : vector<32x4xi1> to vector<32x4xi32>
    %15 = arith.sitofp %14 : vector<32x4xi32> to vector<32x4xf32>
    %16 = tpu.iota {dimensions = array<i32: 0>} : vector<4x32xi32>
    %17 = tpu.iota {dimensions = array<i32: 1>} : vector<4x32xi32>
    %c8_i32_8 = arith.constant 8 : i32
    %18 = vector.broadcast %c8_i32_8 : i32 to vector<4x32xi32>
    %19 = arith.muli %16, %18 : vector<4x32xi32>
    %20 = arith.cmpi sge, %17, %19 : vector<4x32xi32>
    %c1_i32_9 = arith.constant 1 : i32
    %21 = vector.broadcast %c1_i32_9 : i32 to vector<4x32xi32>
    %22 = arith.addi %16, %21 : vector<4x32xi32>
    %c8_i32_10 = arith.constant 8 : i32
    %23 = vector.broadcast %c8_i32_10 : i32 to vector<4x32xi32>
    %24 = arith.muli %22, %23 : vector<4x32xi32>
    %25 = arith.cmpi slt, %17, %24 : vector<4x32xi32>
    %26 = arith.andi %20, %25 : vector<4x32xi1>
    %27 = arith.extui %26 : vector<4x32xi1> to vector<4x32xi32>
    %28 = arith.sitofp %27 : vector<4x32xi32> to vector<4x32xf32>
    %29 = vector.extract_strided_slice %2 {offsets = [0, 0], sizes = [1, 32], strides = [1, 1]} : vector<10x32xf32> to vector<1x32xf32>
    %30 = vector.extract_strided_slice %2 {offsets = [1, 0], sizes = [1, 32], strides = [1, 1]} : vector<10x32xf32> to vector<1x32xf32>
    %31 = vector.extract_strided_slice %2 {offsets = [2, 0], sizes = [1, 32], strides = [1, 1]} : vector<10x32xf32> to vector<1x32xf32>
    %32 = vector.extract_strided_slice %2 {offsets = [3, 0], sizes = [1, 32], strides = [1, 1]} : vector<10x32xf32> to vector<1x32xf32>
    %cst = arith.constant dense<0.000000e+00> : vector<16xf32>
    %33 = vector.multi_reduction <add>, %0, %cst [1] : vector<16x32xf32> to vector<16xf32>
    %34 = vector.shape_cast %33 : vector<16xf32> to vector<16x1xf32>
    %cst_11 = arith.constant 3.200000e+01 : f32
    %35 = vector.broadcast %cst_11 : f32 to vector<16x1xf32>
    %36 = arith.divf %34, %35 : vector<16x1xf32>
    %37 = vector.broadcast %36 : vector<16x1xf32> to vector<16x32xf32>
    %38 = arith.subf %0, %37 : vector<16x32xf32>
    %39 = vector.broadcast %36 : vector<16x1xf32> to vector<16x32xf32>
    %40 = arith.subf %0, %39 : vector<16x32xf32>
    %41 = arith.mulf %38, %40 : vector<16x32xf32>
    %cst_12 = arith.constant dense<0.000000e+00> : vector<16xf32>
    %42 = vector.multi_reduction <add>, %41, %cst_12 [1] : vector<16x32xf32> to vector<16xf32>
    %43 = vector.shape_cast %42 : vector<16xf32> to vector<16x1xf32>
    %cst_13 = arith.constant 3.200000e+01 : f32
    %44 = vector.broadcast %cst_13 : f32 to vector<16x1xf32>
    %45 = arith.divf %43, %44 : vector<16x1xf32>
    %46 = vector.broadcast %36 : vector<16x1xf32> to vector<16x32xf32>
    %47 = arith.subf %0, %46 : vector<16x32xf32>
    %cst_14 = arith.constant 9.99999974E-6 : f32
    %48 = vector.broadcast %cst_14 : f32 to vector<16x1xf32>
    %49 = arith.addf %45, %48 : vector<16x1xf32>
    %50 = math.rsqrt %49 : vector<16x1xf32>
    %51 = vector.broadcast %50 : vector<16x1xf32> to vector<16x32xf32>
    %52 = arith.mulf %47, %51 : vector<16x32xf32>
    %53 = vector.broadcast %29 : vector<1x32xf32> to vector<16x32xf32>
    %54 = arith.mulf %52, %53 : vector<16x32xf32>
    %55 = vector.broadcast %30 : vector<1x32xf32> to vector<16x32xf32>
    %56 = arith.addf %54, %55 : vector<16x32xf32>
    %c0_15 = arith.constant 0 : index
    %c0_16 = arith.constant 0 : index
    %c0_17 = arith.constant 0 : index
    %57 = vector.load %arg3[%c0_15, %c0_16, %c0_17] : memref<2x32x640xf32, #tpu.memory_space<vmem>>, vector<1x32x384xf32>
    %58 = vector.shape_cast %57 : vector<1x32x384xf32> to vector<32x384xf32>
    %cst_18 = arith.constant dense<0.000000e+00> : vector<16x384xf32>
    %59 = tpu.matmul %56, %58, %cst_18 {dimension_numbers = #tpu.dot_dimension_numbers<[1], [0], [0], [1], [0, 0, 1, 1], [], []>} : vector<16x32xf32>, vector<32x384xf32>, vector<16x384xf32> -> vector<16x384xf32>
    %c0_19 = arith.constant 0 : index
    %c0_20 = arith.constant 0 : index
    %c0_21 = arith.constant 0 : index
    %60 = vector.load %arg5[%c0_19, %c0_20, %c0_21] : memref<2x4x640xf32, #tpu.memory_space<vmem>>, vector<1x1x384xf32>
    %61 = vector.shape_cast %60 : vector<1x1x384xf32> to vector<1x384xf32>
    %62 = vector.broadcast %61 : vector<1x384xf32> to vector<16x384xf32>
    %63 = arith.addf %59, %62 : vector<16x384xf32>
    %64 = vector.extract_strided_slice %63 {offsets = [0, 0], sizes = [16, 32], strides = [1, 1]} : vector<16x384xf32> to vector<16x32xf32>
    %65 = vector.shape_cast %64 : vector<16x32xf32> to vector<2x8x32xf32>
    %66 = vector.extract_strided_slice %63 {offsets = [0, 128], sizes = [16, 32], strides = [1, 1]} : vector<16x384xf32> to vector<16x32xf32>
    %67 = vector.shape_cast %66 : vector<16x32xf32> to vector<2x8x32xf32>
    %68 = vector.extract_strided_slice %63 {offsets = [0, 256], sizes = [16, 32], strides = [1, 1]} : vector<16x384xf32> to vector<16x32xf32>
    %69 = vector.shape_cast %68 : vector<16x32xf32> to vector<2x8x32xf32>
    %70 = vector.shape_cast %65 : vector<2x8x32xf32> to vector<2x8x1x32xf32>
    %71 = vector.shape_cast %67 : vector<2x8x32xf32> to vector<2x1x8x32xf32>
    %72 = vector.broadcast %70 : vector<2x8x1x32xf32> to vector<2x8x8x32xf32>
    %73 = vector.broadcast %71 : vector<2x1x8x32xf32> to vector<2x8x8x32xf32>
    %74 = arith.mulf %72, %73 : vector<2x8x8x32xf32>
    %75 = vector.shape_cast %74 : vector<2x8x8x32xf32> to vector<128x32xf32>
    %cst_22 = arith.constant dense<0.000000e+00> : vector<128x4xf32>
    %76 = tpu.matmul %75, %15, %cst_22 {dimension_numbers = #tpu.dot_dimension_numbers<[1], [0], [0], [1], [0, 0, 1, 1], [], []>} : vector<128x32xf32>, vector<32x4xf32>, vector<128x4xf32> -> vector<128x4xf32>
    %77 = vector.shape_cast %76 : vector<128x4xf32> to vector<2x8x8x4xf32>
    %78 = arith.addf %77, %1 : vector<2x8x8x4xf32>
    %cst_23 = arith.constant dense<0xFF800000> : vector<2x8x4xf32>
    %79 = vector.multi_reduction <maximumf>, %78, %cst_23 [2] : vector<2x8x8x4xf32> to vector<2x8x4xf32>
    %80 = vector.shape_cast %79 : vector<2x8x4xf32> to vector<2x8x1x4xf32>
    %81 = vector.broadcast %80 : vector<2x8x1x4xf32> to vector<2x8x8x4xf32>
    %82 = arith.subf %78, %81 : vector<2x8x8x4xf32>
    %83 = math.exp %82 : vector<2x8x8x4xf32>
    %cst_24 = arith.constant dense<0.000000e+00> : vector<2x8x4xf32>
    %84 = vector.multi_reduction <add>, %83, %cst_24 [2] : vector<2x8x8x4xf32> to vector<2x8x4xf32>
    %85 = vector.shape_cast %84 : vector<2x8x4xf32> to vector<2x8x1x4xf32>
    %86 = tpu.reciprocal %85 {approx = true} : vector<2x8x1x4xf32> -> vector<2x8x1x4xf32>
    %87 = vector.broadcast %86 : vector<2x8x1x4xf32> to vector<2x8x8x4xf32>
    %88 = arith.mulf %83, %87 : vector<2x8x8x4xf32>
    %89 = vector.shape_cast %88 : vector<2x8x8x4xf32> to vector<128x4xf32>
    %cst_25 = arith.constant dense<0.000000e+00> : vector<128x32xf32>
    %90 = tpu.matmul %89, %28, %cst_25 {dimension_numbers = #tpu.dot_dimension_numbers<[1], [0], [0], [1], [0, 0, 1, 1], [], []>} : vector<128x4xf32>, vector<4x32xf32>, vector<128x32xf32> -> vector<128x32xf32>
    %91 = vector.shape_cast %90 : vector<128x32xf32> to vector<2x8x8x32xf32>
    %92 = vector.shape_cast %69 : vector<2x8x32xf32> to vector<2x1x8x32xf32>
    %93 = vector.broadcast %92 : vector<2x1x8x32xf32> to vector<2x8x8x32xf32>
    %94 = arith.mulf %91, %93 : vector<2x8x8x32xf32>
    %cst_26 = arith.constant dense<0.000000e+00> : vector<2x8x32xf32>
    %95 = vector.multi_reduction <add>, %94, %cst_26 [2] : vector<2x8x8x32xf32> to vector<2x8x32xf32>
    %96 = vector.shape_cast %95 : vector<2x8x32xf32> to vector<16x32xf32>
    %c0_27 = arith.constant 0 : index
    %c0_28 = arith.constant 0 : index
    %c384 = arith.constant 384 : index
    %97 = vector.load %arg3[%c0_27, %c0_28, %c384] : memref<2x32x640xf32, #tpu.memory_space<vmem>>, vector<1x32x32xf32>
    %98 = vector.shape_cast %97 : vector<1x32x32xf32> to vector<32x32xf32>
    %cst_29 = arith.constant dense<0.000000e+00> : vector<16x32xf32>
    %99 = tpu.matmul %96, %98, %cst_29 {dimension_numbers = #tpu.dot_dimension_numbers<[1], [0], [0], [1], [0, 0, 1, 1], [], []>} : vector<16x32xf32>, vector<32x32xf32>, vector<16x32xf32> -> vector<16x32xf32>
    %c0_30 = arith.constant 0 : index
    %c1 = arith.constant 1 : index
    %c0_31 = arith.constant 0 : index
    %100 = vector.load %arg5[%c0_30, %c1, %c0_31] : memref<2x4x640xf32, #tpu.memory_space<vmem>>, vector<1x1x32xf32>
    %101 = vector.shape_cast %100 : vector<1x1x32xf32> to vector<1x32xf32>
    %102 = vector.broadcast %101 : vector<1x32xf32> to vector<16x32xf32>
    %103 = arith.addf %99, %102 : vector<16x32xf32>
    %104 = arith.addf %0, %103 : vector<16x32xf32>
    %cst_32 = arith.constant dense<0.000000e+00> : vector<16xf32>
    %105 = vector.multi_reduction <add>, %104, %cst_32 [1] : vector<16x32xf32> to vector<16xf32>
    %106 = vector.shape_cast %105 : vector<16xf32> to vector<16x1xf32>
    %cst_33 = arith.constant 3.200000e+01 : f32
    %107 = vector.broadcast %cst_33 : f32 to vector<16x1xf32>
    %108 = arith.divf %106, %107 : vector<16x1xf32>
    %109 = vector.broadcast %108 : vector<16x1xf32> to vector<16x32xf32>
    %110 = arith.subf %104, %109 : vector<16x32xf32>
    %111 = vector.broadcast %108 : vector<16x1xf32> to vector<16x32xf32>
    %112 = arith.subf %104, %111 : vector<16x32xf32>
    %113 = arith.mulf %110, %112 : vector<16x32xf32>
    %cst_34 = arith.constant dense<0.000000e+00> : vector<16xf32>
    %114 = vector.multi_reduction <add>, %113, %cst_34 [1] : vector<16x32xf32> to vector<16xf32>
    %115 = vector.shape_cast %114 : vector<16xf32> to vector<16x1xf32>
    %cst_35 = arith.constant 3.200000e+01 : f32
    %116 = vector.broadcast %cst_35 : f32 to vector<16x1xf32>
    %117 = arith.divf %115, %116 : vector<16x1xf32>
    %118 = vector.broadcast %108 : vector<16x1xf32> to vector<16x32xf32>
    %119 = arith.subf %104, %118 : vector<16x32xf32>
    %cst_36 = arith.constant 9.99999974E-6 : f32
    %120 = vector.broadcast %cst_36 : f32 to vector<16x1xf32>
    %121 = arith.addf %117, %120 : vector<16x1xf32>
    %122 = math.rsqrt %121 : vector<16x1xf32>
    %123 = vector.broadcast %122 : vector<16x1xf32> to vector<16x32xf32>
    %124 = arith.mulf %119, %123 : vector<16x32xf32>
    %125 = vector.broadcast %31 : vector<1x32xf32> to vector<16x32xf32>
    %126 = arith.mulf %124, %125 : vector<16x32xf32>
    %127 = vector.broadcast %32 : vector<1x32xf32> to vector<16x32xf32>
    %128 = arith.addf %126, %127 : vector<16x32xf32>
    %c0_37 = arith.constant 0 : index
    %c0_38 = arith.constant 0 : index
    %c512 = arith.constant 512 : index
    %129 = vector.load %arg3[%c0_37, %c0_38, %c512] : memref<2x32x640xf32, #tpu.memory_space<vmem>>, vector<1x32x128xf32>
    %130 = vector.shape_cast %129 : vector<1x32x128xf32> to vector<32x128xf32>
    %cst_39 = arith.constant dense<0.000000e+00> : vector<16x128xf32>
    %131 = tpu.matmul %128, %130, %cst_39 {dimension_numbers = #tpu.dot_dimension_numbers<[1], [0], [0], [1], [0, 0, 1, 1], [], []>} : vector<16x32xf32>, vector<32x128xf32>, vector<16x128xf32> -> vector<16x128xf32>
    %c0_40 = arith.constant 0 : index
    %c2 = arith.constant 2 : index
    %c0_41 = arith.constant 0 : index
    %132 = vector.load %arg5[%c0_40, %c2, %c0_41] : memref<2x4x640xf32, #tpu.memory_space<vmem>>, vector<1x1x128xf32>
    %133 = vector.shape_cast %132 : vector<1x1x128xf32> to vector<1x128xf32>
    %134 = vector.broadcast %133 : vector<1x128xf32> to vector<16x128xf32>
    %135 = arith.addf %131, %134 : vector<16x128xf32>
    %cst_42 = arith.constant 5.000000e-01 : f32
    %136 = vector.broadcast %cst_42 : f32 to vector<16x128xf32>
    %137 = arith.mulf %136, %135 : vector<16x128xf32>
    %cst_43 = arith.constant 4.471500e-02 : f32
    %138 = vector.broadcast %cst_43 : f32 to vector<16x128xf32>
    %139 = arith.mulf %138, %135 : vector<16x128xf32>
    %140 = arith.mulf %139, %135 : vector<16x128xf32>
    %141 = arith.mulf %140, %135 : vector<16x128xf32>
    %142 = arith.addf %135, %141 : vector<16x128xf32>
    %cst_44 = arith.constant 0.797884583 : f32
    %143 = vector.broadcast %cst_44 : f32 to vector<16x128xf32>
    %144 = arith.mulf %143, %142 : vector<16x128xf32>
    %145 = math.tanh %144 : vector<16x128xf32>
    %cst_45 = arith.constant 1.000000e+00 : f32
    %146 = vector.broadcast %cst_45 : f32 to vector<16x128xf32>
    %147 = arith.addf %146, %145 : vector<16x128xf32>
    %148 = arith.mulf %137, %147 : vector<16x128xf32>
    %c0_46 = arith.constant 0 : index
    %c0_47 = arith.constant 0 : index
    %c0_48 = arith.constant 0 : index
    %149 = vector.load %arg4[%c0_46, %c0_47, %c0_48] : memref<2x128x32xf32, #tpu.memory_space<vmem>>, vector<1x128x32xf32>
    %150 = vector.shape_cast %149 : vector<1x128x32xf32> to vector<128x32xf32>
    %cst_49 = arith.constant dense<0.000000e+00> : vector<16x32xf32>
    %151 = tpu.matmul %148, %150, %cst_49 {dimension_numbers = #tpu.dot_dimension_numbers<[1], [0], [0], [1], [0, 0, 1, 1], [], []>} : vector<16x128xf32>, vector<128x32xf32>, vector<16x32xf32> -> vector<16x32xf32>
    %c0_50 = arith.constant 0 : index
    %c3 = arith.constant 3 : index
    %c0_51 = arith.constant 0 : index
    %152 = vector.load %arg5[%c0_50, %c3, %c0_51] : memref<2x4x640xf32, #tpu.memory_space<vmem>>, vector<1x1x32xf32>
    %153 = vector.shape_cast %152 : vector<1x1x32xf32> to vector<1x32xf32>
    %154 = vector.broadcast %153 : vector<1x32xf32> to vector<16x32xf32>
    %155 = arith.addf %151, %154 : vector<16x32xf32>
    %156 = arith.addf %104, %155 : vector<16x32xf32>
    %157 = vector.extract_strided_slice %2 {offsets = [4, 0], sizes = [1, 32], strides = [1, 1]} : vector<10x32xf32> to vector<1x32xf32>
    %158 = vector.extract_strided_slice %2 {offsets = [5, 0], sizes = [1, 32], strides = [1, 1]} : vector<10x32xf32> to vector<1x32xf32>
    %159 = vector.extract_strided_slice %2 {offsets = [6, 0], sizes = [1, 32], strides = [1, 1]} : vector<10x32xf32> to vector<1x32xf32>
    %160 = vector.extract_strided_slice %2 {offsets = [7, 0], sizes = [1, 32], strides = [1, 1]} : vector<10x32xf32> to vector<1x32xf32>
    %cst_52 = arith.constant dense<0.000000e+00> : vector<16xf32>
    %161 = vector.multi_reduction <add>, %156, %cst_52 [1] : vector<16x32xf32> to vector<16xf32>
    %162 = vector.shape_cast %161 : vector<16xf32> to vector<16x1xf32>
    %cst_53 = arith.constant 3.200000e+01 : f32
    %163 = vector.broadcast %cst_53 : f32 to vector<16x1xf32>
    %164 = arith.divf %162, %163 : vector<16x1xf32>
    %165 = vector.broadcast %164 : vector<16x1xf32> to vector<16x32xf32>
    %166 = arith.subf %156, %165 : vector<16x32xf32>
    %167 = vector.broadcast %164 : vector<16x1xf32> to vector<16x32xf32>
    %168 = arith.subf %156, %167 : vector<16x32xf32>
    %169 = arith.mulf %166, %168 : vector<16x32xf32>
    %cst_54 = arith.constant dense<0.000000e+00> : vector<16xf32>
    %170 = vector.multi_reduction <add>, %169, %cst_54 [1] : vector<16x32xf32> to vector<16xf32>
    %171 = vector.shape_cast %170 : vector<16xf32> to vector<16x1xf32>
    %cst_55 = arith.constant 3.200000e+01 : f32
    %172 = vector.broadcast %cst_55 : f32 to vector<16x1xf32>
    %173 = arith.divf %171, %172 : vector<16x1xf32>
    %174 = vector.broadcast %164 : vector<16x1xf32> to vector<16x32xf32>
    %175 = arith.subf %156, %174 : vector<16x32xf32>
    %cst_56 = arith.constant 9.99999974E-6 : f32
    %176 = vector.broadcast %cst_56 : f32 to vector<16x1xf32>
    %177 = arith.addf %173, %176 : vector<16x1xf32>
    %178 = math.rsqrt %177 : vector<16x1xf32>
    %179 = vector.broadcast %178 : vector<16x1xf32> to vector<16x32xf32>
    %180 = arith.mulf %175, %179 : vector<16x32xf32>
    %181 = vector.broadcast %157 : vector<1x32xf32> to vector<16x32xf32>
    %182 = arith.mulf %180, %181 : vector<16x32xf32>
    %183 = vector.broadcast %158 : vector<1x32xf32> to vector<16x32xf32>
    %184 = arith.addf %182, %183 : vector<16x32xf32>
    %c1_57 = arith.constant 1 : index
    %c0_58 = arith.constant 0 : index
    %c0_59 = arith.constant 0 : index
    %185 = vector.load %arg3[%c1_57, %c0_58, %c0_59] : memref<2x32x640xf32, #tpu.memory_space<vmem>>, vector<1x32x384xf32>
    %186 = vector.shape_cast %185 : vector<1x32x384xf32> to vector<32x384xf32>
    %cst_60 = arith.constant dense<0.000000e+00> : vector<16x384xf32>
    %187 = tpu.matmul %184, %186, %cst_60 {dimension_numbers = #tpu.dot_dimension_numbers<[1], [0], [0], [1], [0, 0, 1, 1], [], []>} : vector<16x32xf32>, vector<32x384xf32>, vector<16x384xf32> -> vector<16x384xf32>
    %c1_61 = arith.constant 1 : index
    %c0_62 = arith.constant 0 : index
    %c0_63 = arith.constant 0 : index
    %188 = vector.load %arg5[%c1_61, %c0_62, %c0_63] : memref<2x4x640xf32, #tpu.memory_space<vmem>>, vector<1x1x384xf32>
    %189 = vector.shape_cast %188 : vector<1x1x384xf32> to vector<1x384xf32>
    %190 = vector.broadcast %189 : vector<1x384xf32> to vector<16x384xf32>
    %191 = arith.addf %187, %190 : vector<16x384xf32>
    %192 = vector.extract_strided_slice %191 {offsets = [0, 0], sizes = [16, 32], strides = [1, 1]} : vector<16x384xf32> to vector<16x32xf32>
    %193 = vector.shape_cast %192 : vector<16x32xf32> to vector<2x8x32xf32>
    %194 = vector.extract_strided_slice %191 {offsets = [0, 128], sizes = [16, 32], strides = [1, 1]} : vector<16x384xf32> to vector<16x32xf32>
    %195 = vector.shape_cast %194 : vector<16x32xf32> to vector<2x8x32xf32>
    %196 = vector.extract_strided_slice %191 {offsets = [0, 256], sizes = [16, 32], strides = [1, 1]} : vector<16x384xf32> to vector<16x32xf32>
    %197 = vector.shape_cast %196 : vector<16x32xf32> to vector<2x8x32xf32>
    %198 = vector.shape_cast %193 : vector<2x8x32xf32> to vector<2x8x1x32xf32>
    %199 = vector.shape_cast %195 : vector<2x8x32xf32> to vector<2x1x8x32xf32>
    %200 = vector.broadcast %198 : vector<2x8x1x32xf32> to vector<2x8x8x32xf32>
    %201 = vector.broadcast %199 : vector<2x1x8x32xf32> to vector<2x8x8x32xf32>
    %202 = arith.mulf %200, %201 : vector<2x8x8x32xf32>
    %203 = vector.shape_cast %202 : vector<2x8x8x32xf32> to vector<128x32xf32>
    %cst_64 = arith.constant dense<0.000000e+00> : vector<128x4xf32>
    %204 = tpu.matmul %203, %15, %cst_64 {dimension_numbers = #tpu.dot_dimension_numbers<[1], [0], [0], [1], [0, 0, 1, 1], [], []>} : vector<128x32xf32>, vector<32x4xf32>, vector<128x4xf32> -> vector<128x4xf32>
    %205 = vector.shape_cast %204 : vector<128x4xf32> to vector<2x8x8x4xf32>
    %206 = arith.addf %205, %1 : vector<2x8x8x4xf32>
    %cst_65 = arith.constant dense<0xFF800000> : vector<2x8x4xf32>
    %207 = vector.multi_reduction <maximumf>, %206, %cst_65 [2] : vector<2x8x8x4xf32> to vector<2x8x4xf32>
    %208 = vector.shape_cast %207 : vector<2x8x4xf32> to vector<2x8x1x4xf32>
    %209 = vector.broadcast %208 : vector<2x8x1x4xf32> to vector<2x8x8x4xf32>
    %210 = arith.subf %206, %209 : vector<2x8x8x4xf32>
    %211 = math.exp %210 : vector<2x8x8x4xf32>
    %cst_66 = arith.constant dense<0.000000e+00> : vector<2x8x4xf32>
    %212 = vector.multi_reduction <add>, %211, %cst_66 [2] : vector<2x8x8x4xf32> to vector<2x8x4xf32>
    %213 = vector.shape_cast %212 : vector<2x8x4xf32> to vector<2x8x1x4xf32>
    %214 = tpu.reciprocal %213 {approx = true} : vector<2x8x1x4xf32> -> vector<2x8x1x4xf32>
    %215 = vector.broadcast %214 : vector<2x8x1x4xf32> to vector<2x8x8x4xf32>
    %216 = arith.mulf %211, %215 : vector<2x8x8x4xf32>
    %217 = vector.shape_cast %216 : vector<2x8x8x4xf32> to vector<128x4xf32>
    %cst_67 = arith.constant dense<0.000000e+00> : vector<128x32xf32>
    %218 = tpu.matmul %217, %28, %cst_67 {dimension_numbers = #tpu.dot_dimension_numbers<[1], [0], [0], [1], [0, 0, 1, 1], [], []>} : vector<128x4xf32>, vector<4x32xf32>, vector<128x32xf32> -> vector<128x32xf32>
    %219 = vector.shape_cast %218 : vector<128x32xf32> to vector<2x8x8x32xf32>
    %220 = vector.shape_cast %197 : vector<2x8x32xf32> to vector<2x1x8x32xf32>
    %221 = vector.broadcast %220 : vector<2x1x8x32xf32> to vector<2x8x8x32xf32>
    %222 = arith.mulf %219, %221 : vector<2x8x8x32xf32>
    %cst_68 = arith.constant dense<0.000000e+00> : vector<2x8x32xf32>
    %223 = vector.multi_reduction <add>, %222, %cst_68 [2] : vector<2x8x8x32xf32> to vector<2x8x32xf32>
    %224 = vector.shape_cast %223 : vector<2x8x32xf32> to vector<16x32xf32>
    %c1_69 = arith.constant 1 : index
    %c0_70 = arith.constant 0 : index
    %c384_71 = arith.constant 384 : index
    %225 = vector.load %arg3[%c1_69, %c0_70, %c384_71] : memref<2x32x640xf32, #tpu.memory_space<vmem>>, vector<1x32x32xf32>
    %226 = vector.shape_cast %225 : vector<1x32x32xf32> to vector<32x32xf32>
    %cst_72 = arith.constant dense<0.000000e+00> : vector<16x32xf32>
    %227 = tpu.matmul %224, %226, %cst_72 {dimension_numbers = #tpu.dot_dimension_numbers<[1], [0], [0], [1], [0, 0, 1, 1], [], []>} : vector<16x32xf32>, vector<32x32xf32>, vector<16x32xf32> -> vector<16x32xf32>
    %c1_73 = arith.constant 1 : index
    %c1_74 = arith.constant 1 : index
    %c0_75 = arith.constant 0 : index
    %228 = vector.load %arg5[%c1_73, %c1_74, %c0_75] : memref<2x4x640xf32, #tpu.memory_space<vmem>>, vector<1x1x32xf32>
    %229 = vector.shape_cast %228 : vector<1x1x32xf32> to vector<1x32xf32>
    %230 = vector.broadcast %229 : vector<1x32xf32> to vector<16x32xf32>
    %231 = arith.addf %227, %230 : vector<16x32xf32>
    %232 = arith.addf %156, %231 : vector<16x32xf32>
    %cst_76 = arith.constant dense<0.000000e+00> : vector<16xf32>
    %233 = vector.multi_reduction <add>, %232, %cst_76 [1] : vector<16x32xf32> to vector<16xf32>
    %234 = vector.shape_cast %233 : vector<16xf32> to vector<16x1xf32>
    %cst_77 = arith.constant 3.200000e+01 : f32
    %235 = vector.broadcast %cst_77 : f32 to vector<16x1xf32>
    %236 = arith.divf %234, %235 : vector<16x1xf32>
    %237 = vector.broadcast %236 : vector<16x1xf32> to vector<16x32xf32>
    %238 = arith.subf %232, %237 : vector<16x32xf32>
    %239 = vector.broadcast %236 : vector<16x1xf32> to vector<16x32xf32>
    %240 = arith.subf %232, %239 : vector<16x32xf32>
    %241 = arith.mulf %238, %240 : vector<16x32xf32>
    %cst_78 = arith.constant dense<0.000000e+00> : vector<16xf32>
    %242 = vector.multi_reduction <add>, %241, %cst_78 [1] : vector<16x32xf32> to vector<16xf32>
    %243 = vector.shape_cast %242 : vector<16xf32> to vector<16x1xf32>
    %cst_79 = arith.constant 3.200000e+01 : f32
    %244 = vector.broadcast %cst_79 : f32 to vector<16x1xf32>
    %245 = arith.divf %243, %244 : vector<16x1xf32>
    %246 = vector.broadcast %236 : vector<16x1xf32> to vector<16x32xf32>
    %247 = arith.subf %232, %246 : vector<16x32xf32>
    %cst_80 = arith.constant 9.99999974E-6 : f32
    %248 = vector.broadcast %cst_80 : f32 to vector<16x1xf32>
    %249 = arith.addf %245, %248 : vector<16x1xf32>
    %250 = math.rsqrt %249 : vector<16x1xf32>
    %251 = vector.broadcast %250 : vector<16x1xf32> to vector<16x32xf32>
    %252 = arith.mulf %247, %251 : vector<16x32xf32>
    %253 = vector.broadcast %159 : vector<1x32xf32> to vector<16x32xf32>
    %254 = arith.mulf %252, %253 : vector<16x32xf32>
    %255 = vector.broadcast %160 : vector<1x32xf32> to vector<16x32xf32>
    %256 = arith.addf %254, %255 : vector<16x32xf32>
    %c1_81 = arith.constant 1 : index
    %c0_82 = arith.constant 0 : index
    %c512_83 = arith.constant 512 : index
    %257 = vector.load %arg3[%c1_81, %c0_82, %c512_83] : memref<2x32x640xf32, #tpu.memory_space<vmem>>, vector<1x32x128xf32>
    %258 = vector.shape_cast %257 : vector<1x32x128xf32> to vector<32x128xf32>
    %cst_84 = arith.constant dense<0.000000e+00> : vector<16x128xf32>
    %259 = tpu.matmul %256, %258, %cst_84 {dimension_numbers = #tpu.dot_dimension_numbers<[1], [0], [0], [1], [0, 0, 1, 1], [], []>} : vector<16x32xf32>, vector<32x128xf32>, vector<16x128xf32> -> vector<16x128xf32>
    %c1_85 = arith.constant 1 : index
    %c2_86 = arith.constant 2 : index
    %c0_87 = arith.constant 0 : index
    %260 = vector.load %arg5[%c1_85, %c2_86, %c0_87] : memref<2x4x640xf32, #tpu.memory_space<vmem>>, vector<1x1x128xf32>
    %261 = vector.shape_cast %260 : vector<1x1x128xf32> to vector<1x128xf32>
    %262 = vector.broadcast %261 : vector<1x128xf32> to vector<16x128xf32>
    %263 = arith.addf %259, %262 : vector<16x128xf32>
    %cst_88 = arith.constant 5.000000e-01 : f32
    %264 = vector.broadcast %cst_88 : f32 to vector<16x128xf32>
    %265 = arith.mulf %264, %263 : vector<16x128xf32>
    %cst_89 = arith.constant 4.471500e-02 : f32
    %266 = vector.broadcast %cst_89 : f32 to vector<16x128xf32>
    %267 = arith.mulf %266, %263 : vector<16x128xf32>
    %268 = arith.mulf %267, %263 : vector<16x128xf32>
    %269 = arith.mulf %268, %263 : vector<16x128xf32>
    %270 = arith.addf %263, %269 : vector<16x128xf32>
    %cst_90 = arith.constant 0.797884583 : f32
    %271 = vector.broadcast %cst_90 : f32 to vector<16x128xf32>
    %272 = arith.mulf %271, %270 : vector<16x128xf32>
    %273 = math.tanh %272 : vector<16x128xf32>
    %cst_91 = arith.constant 1.000000e+00 : f32
    %274 = vector.broadcast %cst_91 : f32 to vector<16x128xf32>
    %275 = arith.addf %274, %273 : vector<16x128xf32>
    %276 = arith.mulf %265, %275 : vector<16x128xf32>
    %c1_92 = arith.constant 1 : index
    %c0_93 = arith.constant 0 : index
    %c0_94 = arith.constant 0 : index
    %277 = vector.load %arg4[%c1_92, %c0_93, %c0_94] : memref<2x128x32xf32, #tpu.memory_space<vmem>>, vector<1x128x32xf32>
    %278 = vector.shape_cast %277 : vector<1x128x32xf32> to vector<128x32xf32>
    %cst_95 = arith.constant dense<0.000000e+00> : vector<16x32xf32>
    %279 = tpu.matmul %276, %278, %cst_95 {dimension_numbers = #tpu.dot_dimension_numbers<[1], [0], [0], [1], [0, 0, 1, 1], [], []>} : vector<16x128xf32>, vector<128x32xf32>, vector<16x32xf32> -> vector<16x32xf32>
    %c1_96 = arith.constant 1 : index
    %c3_97 = arith.constant 3 : index
    %c0_98 = arith.constant 0 : index
    %280 = vector.load %arg5[%c1_96, %c3_97, %c0_98] : memref<2x4x640xf32, #tpu.memory_space<vmem>>, vector<1x1x32xf32>
    %281 = vector.shape_cast %280 : vector<1x1x32xf32> to vector<1x32xf32>
    %282 = vector.broadcast %281 : vector<1x32xf32> to vector<16x32xf32>
    %283 = arith.addf %279, %282 : vector<16x32xf32>
    %284 = arith.addf %232, %283 : vector<16x32xf32>
    %285 = vector.extract_strided_slice %2 {offsets = [8, 0], sizes = [1, 32], strides = [1, 1]} : vector<10x32xf32> to vector<1x32xf32>
    %286 = vector.extract_strided_slice %2 {offsets = [9, 0], sizes = [1, 32], strides = [1, 1]} : vector<10x32xf32> to vector<1x32xf32>
    %cst_99 = arith.constant dense<0.000000e+00> : vector<16xf32>
    %287 = vector.multi_reduction <add>, %284, %cst_99 [1] : vector<16x32xf32> to vector<16xf32>
    %288 = vector.shape_cast %287 : vector<16xf32> to vector<16x1xf32>
    %cst_100 = arith.constant 3.200000e+01 : f32
    %289 = vector.broadcast %cst_100 : f32 to vector<16x1xf32>
    %290 = arith.divf %288, %289 : vector<16x1xf32>
    %291 = vector.broadcast %290 : vector<16x1xf32> to vector<16x32xf32>
    %292 = arith.subf %284, %291 : vector<16x32xf32>
    %293 = vector.broadcast %290 : vector<16x1xf32> to vector<16x32xf32>
    %294 = arith.subf %284, %293 : vector<16x32xf32>
    %295 = arith.mulf %292, %294 : vector<16x32xf32>
    %cst_101 = arith.constant dense<0.000000e+00> : vector<16xf32>
    %296 = vector.multi_reduction <add>, %295, %cst_101 [1] : vector<16x32xf32> to vector<16xf32>
    %297 = vector.shape_cast %296 : vector<16xf32> to vector<16x1xf32>
    %cst_102 = arith.constant 3.200000e+01 : f32
    %298 = vector.broadcast %cst_102 : f32 to vector<16x1xf32>
    %299 = arith.divf %297, %298 : vector<16x1xf32>
    %300 = vector.broadcast %290 : vector<16x1xf32> to vector<16x32xf32>
    %301 = arith.subf %284, %300 : vector<16x32xf32>
    %cst_103 = arith.constant 9.99999974E-6 : f32
    %302 = vector.broadcast %cst_103 : f32 to vector<16x1xf32>
    %303 = arith.addf %299, %302 : vector<16x1xf32>
    %304 = math.rsqrt %303 : vector<16x1xf32>
    %305 = vector.broadcast %304 : vector<16x1xf32> to vector<16x32xf32>
    %306 = arith.mulf %301, %305 : vector<16x32xf32>
    %307 = vector.broadcast %285 : vector<1x32xf32> to vector<16x32xf32>
    %308 = arith.mulf %306, %307 : vector<16x32xf32>
    %309 = vector.broadcast %286 : vector<1x32xf32> to vector<16x32xf32>
    %310 = arith.addf %308, %309 : vector<16x32xf32>
    %c0_104 = arith.constant 0 : index
    %c0_105 = arith.constant 0 : index
    %311 = vector.load %arg6[%c0_104, %c0_105] : memref<32x128xf32, #tpu.memory_space<vmem>>, vector<32x128xf32>
    %cst_106 = arith.constant dense<0.000000e+00> : vector<16x128xf32>
    %312 = tpu.matmul %310, %311, %cst_106 {dimension_numbers = #tpu.dot_dimension_numbers<[1], [0], [0], [1], [0, 0, 1, 1], [], []>} : vector<16x32xf32>, vector<32x128xf32>, vector<16x128xf32> -> vector<16x128xf32>
    %313 = vector.shape_cast %312 : vector<16x128xf32> to vector<2x8x128xf32>
    %c0_107 = arith.constant 0 : index
    %c0_108 = arith.constant 0 : index
    %c0_109 = arith.constant 0 : index
    %314 = vector.load %arg7[%c0_107, %c0_108, %c0_109] : memref<2x8x128xf32, #tpu.memory_space<vmem>>, vector<2x8x128xf32>
    tpu.vector_store %arg7[%c0_107, %c0_108, %c0_109], %313 {strides = array<i32>} : memref<2x8x128xf32, #tpu.memory_space<vmem>>, vector<2x8x128xf32>,
    return
  }
}

</mosaic_0001>

<bundles_post_ra>
// kernel: forward.1
= control target key start
LH: loop header
LB: loop body
LE: loop exit
PB: predicated region body
PF: predicated region fallthrough
CT: control target
= control target key end

     0   :  { %vm85_vm0 = vcmask 261120   ;;  %s5407_s0 = inlined_call_operand.vmem [shape: f32[16,32], index: 0, kind: input, shape index: {}]   ;;  %s5408_s1 = inlined_call_operand.vmem [shape: f32[2,8,8,4], index: 1, kind: input, shape index: {}]   ;;  %s5409_s2 = inlined_call_operand.vmem [shape: f32[10,32], index: 2, kind: input, shape index: {}]   ;;  %s5410_s3 = inlined_call_operand.vmem [shape: f32[2,32,640], index: 3, kind: input, shape index: {}]   ;;  %s5411_s4 = inlined_call_operand.vmem [shape: f32[2,128,32], index: 4, kind: input, shape index: {}]   ;;  %s5412_s5 = inlined_call_operand.vmem [shape: f32[2,4,640], index: 5, kind: input, shape index: {}]   ;;  %s5413_s6 = inlined_call_operand.vmem [shape: f32[32,128], index: 6, kind: input, shape index: {}]   ;;  %s5414_s7 = inlined_call_operand.hbm [shape: f32[2,8,128], index: 7, kind: output, shape index: {}]  }
   0x1   :  { %v27_v0 = vld [vmem:[%s5407_s0] sm:$0xff]  ;;  %v28_v1 = vld [vmem:[%s5407_s0 + $0x8] sm:$0xff] }
   0x2   :  { %12 = vsyncpa [#allocation3], 0  ;;  %v86_v2 = vsel %vm85_vm0, %v27_v0, 0.0  ;;  %v89_v3 = vsel %vm85_vm0, %v28_v1, 0.0  ;;  %v135_v14 = vld [vmem:[%s5410_s3 + $0x80] sm:$0xff]  ;;  %v134_v15 = vld [vmem:[%s5410_s3 + $0x78] sm:$0xff]  ;;  %v47_v32 = vlaneseq }
   0x3   :  { %87 = vadd.xlane.f32.xlu0 %v86_v2  ;;  %v132_v16 = vld [vmem:[%s5410_s3 + $0x58] sm:$0xff]  ;;  %184 = vmatprep.subr.mxu0 %v135_v14  ;;  %v131_v17 = vld [vmem:[%s5410_s3 + $0x50] sm:$0xff]  ;;  %v136_v18 = vld [vmem:[%s5410_s3 + $0x88] sm:$0xff]  ;;  %v4244_v19 = vmov 0.0   ;;  %v5415_v54 = vmov 1.0  }
   0x4   :  { %224 = vmatprep.mubr.f32.mxu0 %v4244_v19  ;;  %185 = vmatpush1.msra.mxu0 %v134_v15  ;;  %v129_v20 = vld [vmem:[%s5410_s3 + $0x30] sm:$0xff]  ;;  %v133_v21 = vld [vmem:[%s5410_s3 + $0x60] sm:$0xff]  ;;  %v128_v22 = vld [vmem:[%s5410_s3 + $0x28] sm:$0xff]  ;;  %v4337_v34 = vshrl.u32 %v47_v32, 7  ;;  %v4355_v48 = vand.u32 127, %v47_v32 }
   0x5   :  { %3776 = vmatprep.subr.mxu1 %v136_v18  ;;  %186 = vmatprep.subr.mxu0 %v132_v16  ;;  %v126_v23 = vld [vmem:[%s5410_s3 + $0x8] sm:$0xff]  ;;  %v125_v24 = vld [vmem:[%s5410_s3] sm:$0xff]  ;;  %v130_v25 = vld [vmem:[%s5410_s3 + $0x38] sm:$0xff]  ;;  %v4246_v60 = vmov 1966171168  }
   0x6   :  { %3777 = vmatpush3.msra.mxu1 %v136_v18  ;;  %187 = vmatpush1.msra.mxu0 %v131_v17  ;;  %v127_v26 = vld [vmem:[%s5410_s3 + $0x10] sm:$0xff]  ;;  %v4340_v35 = vsub.s32 0, %v4337_v34  ;;  %v45_v36 = vld [vmem:[%s5409_s2] sm:$0xff]  ;;  %v4346_v37 = vsub.s32 1, %v4337_v34  ;;  %v59_v49 = vadd.s32 1, %v4355_v48  ;;  %v51_v50 = vadd.s32 24, %v4337_v34 }
   0x7   :  { %90 = vadd.xlane.f32.xlu0 %v89_v3  ;;  %3778 = vmatprep.subr.mxu1 %v133_v21  ;;  %v54_v51 = vmul.u32 8, %v4355_v48  ;;  %v50_v55 = vadd.s32 16, %v4337_v34  ;;  %v49_v56 = vadd.s32 8, %v4337_v34  ;;  %v316_v61 = vunpack.c.l.s4 %v4246_v60  ;;  %v137_v62 = vld [vmem:[%s5412_s5] ss:$4 sm:$0x7] }
   0x8   :  { %188 = vmatprep.subr.mxu0 %v129_v20  ;;  %3779 = vmatpush3.msra.mxu1 %v133_v21  ;;  %v116_v38 = vrot.slane %v45_v36, %v4340_v35  ;;  %v122_v41 = vrot.slane %v45_v36, %v4346_v37  ;;  %v60_v52 = vmul.u32 8, %v59_v49  ;;  %v4947_v53 = vld [vmem:[%s5412_s5 + $0x14] ss:$4 sm:$0x7] }
   0x9   :  { %189 = vmatpush1.msra.mxu0 %v128_v22  ;;  %3780 = vmatprep.subr.mxu1 %v130_v25  ;;  %vm58_vm1 = vcmp.ge.s32.totalorder %v51_v50, %v54_v51  ;;  %vm57_vm4 = vcmp.ge.s32.totalorder %v50_v55, %v54_v51  ;;  %vm56_vm7 = vcmp.ge.s32.totalorder %v49_v56, %v54_v51  ;;  %v317_v63 = vunpack.c.0.s8 %v316_v61 }
   0xa   :  { %190 = vmatprep.subr.mxu0 %v126_v23  ;;  %3781 = vmatpush3.msra.mxu1 %v130_v25  ;;  %vm64_vm2 = vcmp.lt.s32.totalorder %v51_v50, %v60_v52  ;;  %vm63_vm5 = vcmp.lt.s32.totalorder %v50_v55, %v60_v52  ;;  %vm62_vm8 = vcmp.lt.s32.totalorder %v49_v56, %v60_v52 }
   0xb   :  { %191 = vmatpush1.msra.mxu0 %v125_v24  ;;  %3782 = vmatprep.subr.mxu1 %v127_v26  ;;  %vm4360_vm3 = vmand %vm58_vm1, %vm64_vm2  ;;  %vm55_vm10 = vcmp.ge.s32.totalorder %v4337_v34, %v54_v51  ;;  %vm61_vm11 = vcmp.lt.s32.totalorder %v4337_v34, %v60_v52  ;;  %vm1070_vm1 = vcmask 1043456   ;;  %vm717_vm2 = vcmask 31744  }
   0xc   :  { %3783 = vmatpush3.msra.mxu1 %v127_v26  ;;  %3787 = vmatprep.subr.msk.mxu0 %vm4360_vm3, %v5415_v54  ;;  %vm4372_vm6 = vmand %vm57_vm4, %vm63_vm5  ;;  %vm1372_vm4 = vcmask 1041409   ;;  %vm1374_vm5 = vcmask 1042434   ;;  %v1775_v57 = vrot.slane %v4947_v53, %v4340_v35 }
   0xd   :  { %vm4382_vm9 = vmand %vm56_vm7, %vm62_vm8  ;;  %vm1376_vm7 = vcmask 1043459   ;;  %vm1378_vm8 = vcmask 1044484  }
   0xe   :  { %vm4394_vm12 = vmand %vm55_vm10, %vm61_vm11  ;;  %vm1380_vm10 = vcmask 1045509   ;;  %vm1382_vm11 = vcmask 1046534  }
  0x8c   :  { %v88_v4 = vpop.xlane.xlu0 %87 }
  0x8d   :  { %v93_v5 = vmul.f32 0.03125, %v88_v4 }
  0x8f   :  { %v95_v6 = vsub.f32 %v27_v0, %v93_v5  ;;  %v142_v0 = vrot.slane %v137_v62, %v4340_v35 }
  0x90   :  { %v91_v7 = vpop.xlane.xlu0 %90 }
  0x91   :  { %v94_v8 = vmul.f32 0.03125, %v91_v7  ;;  %v97_v9 = vmul.f32 %v95_v6, %v95_v6 }
  0x93   :  { %v96_v10 = vsub.f32 %v28_v1, %v94_v8  ;;  %v99_v11 = vsel %vm85_vm0, %v97_v9, 0.0  ;;  %v4409_v1 = vsub.s32 %v317_v63, %v4337_v34 }
  0x94   :  { %100 = vadd.xlane.f32.xlu1 %v99_v11 }
  0x95   :  { %v98_v12 = vmul.f32 %v96_v10, %v96_v10 }
  0x97   :  { %v102_v13 = vsel %vm85_vm0, %v98_v12, 0.0 }
  0x98   :  { %103 = vadd.xlane.f32.xlu1 %v102_v13 }
 0x11d   :  { %v101_v27 = vpop.xlane.xlu1 %100 }
 0x11e   :  { %v105_v28 = vmul.f32 0.03125, %v101_v27 }
 0x120   :  { %v107_v29 = vadd.f32 1e-05, %v105_v28 }
 0x121   :  { %v104_v30 = vpop.xlane.xlu1 %103 }
 0x122   :  { %4045 = vrsqrt.f32 %v107_v29  ;;  %v106_v31 = vmul.f32 0.03125, %v104_v30 }
 0x124   :  { %v108_v33 = vadd.f32 1e-05, %v106_v31 }
 0x126   :  { %4047 = vrsqrt.f32 %v108_v33 }
 0x12f   :  { %v4046_v39 = vpop.eup %4045 }
 0x130   :  { %v111_v40 = vmul.f32 %v4046_v39, %v95_v6 }
 0x132   :  { %v117_v42 = vmul.f32 %v116_v38, %v111_v40 }
 0x133   :  { %v4048_v43 = vpop.eup %4047 }
 0x134   :  { %v123_v44 = vadd.f32 %v122_v41, %v117_v42  ;;  %v112_v45 = vmul.f32 %v4048_v43, %v96_v10  ;;  %v146_v10 = vrot.slane %v137_v62, %v4346_v37 }
 0x136   :  { %3486 = vmatmul.mubr.msk.f32.vlgmr.msra.gmra.mxu0 %vm85_vm0, %v123_v44  ;;  %3784 = vmatprep.mubr.msk.f32.mxu1 %vm85_vm0, %v123_v44  ;;  %v118_v46 = vmul.f32 %v116_v38, %v112_v45 }
 0x137   :  { %230 = vmatprep.mubr.f32.mxu0 %v4244_v19  ;;  %3788 = vmatpush3.msk.msra.mxu0 %vm4360_vm3, %v5415_v54 }
 0x138   :  { %v124_v47 = vadd.f32 %v122_v41, %v118_v46  ;;  %3789 = vmatprep.subr.msk.mxu0 %vm4372_vm6, %v5415_v54 }
 0x139   :  { %3790 = vmatpush3.msk.msra.mxu0 %vm4372_vm6, %v5415_v54 }
 0x13a   :  { %3487 = vmatmul.mubr.msk.f32.gmra.mxu0 %vm85_vm0, %v124_v47  ;;  %3785 = vmatmul.mubr.msk.f32.vlgmr.msra.gmra.mxu1 %vm85_vm0, %v124_v47 }
 0x13b   :  { %3791 = vmatprep.subr.msk.mxu0 %vm4382_vm9, %v5415_v54 }
 0x13c   :  { %3792 = vmatpush3.msk.msra.mxu0 %vm4382_vm9, %v5415_v54 }
 0x13d   :  { %3793 = vmatprep.subr.msk.mxu0 %vm4394_vm12, %v5415_v54 }
 0x13e   :  { %3794 = vmatpush3.msk.msra.mxu0 %vm4394_vm12, %v5415_v54 }
 0x1f6   :  { %v226_v2 = vpop.f32.mrf.mxu0 }
 0x1f7   :  { %v227_v3 = vadd.f32 %v226_v2, %v142_v0 }
 0x1f8   :  { %v228_v4 = vpop.f32.mrf.mxu0 }
 0x1f9   :  { %v314_v5 = vcombine.high %v227_v3, %v227_v3  ;;  %v321_v6 = vrot.slane %v227_v3, %v4409_v1  ;;  %v229_v21 = vadd.f32 %v228_v4, %v146_v10 }
 0x1fa   :  { %v232_v11 = vpop.f32.mrf.mxu0 }
 0x1fb   :  { %v328_v7 = vrot.slane %v314_v5, %v4409_v1  ;;  %v329_v8 = vcombine.high %v321_v6, %v321_v6  ;;  %v337_v9 = vrot.slane %v321_v6, %v4409_v1  ;;  %v233_v16 = vadd.f32 %v232_v11, %v142_v0 }
 0x1fc   :  { %v234_v44 = vpop.f32.mrf.mxu0 }
 0x1fd   :  { %v351_v12 = vrot.slane %v329_v8, %v4409_v1  ;;  %v359_v13 = vcombine.high %v337_v9, %v337_v9  ;;  %v330_v14 = vcombine.high %v328_v7, %v328_v7  ;;  %v415_v15 = vrot.slane %v337_v9, %v4340_v35 }
 0x1fe   :  { %v344_v17 = vrot.slane %v328_v7, %v4409_v1  ;;  %v370_v25 = vrot.slane %v233_v16, %v4409_v1  ;;  %v363_v31 = vcombine.high %v233_v16, %v233_v16  ;;  %v235_v51 = vadd.f32 %v234_v44, %v146_v10 }
 0x1ff   :  { %v361_v18 = vcombine.high %v351_v12, %v351_v12  ;;  %v419_v20 = vrot.slane %v351_v12, %v4340_v35  ;;  %v423_v22 = vrot.slane %v359_v13, %v4340_v35  ;;  %v492_v23 = vmul.f32 %v415_v15, %v229_v21 }
 0x200   :  { %v358_v24 = vrot.slane %v330_v14, %v4409_v1  ;;  %v360_v27 = vcombine.high %v344_v17, %v344_v17  ;;  %v431_v28 = vrot.slane %v344_v17, %v4340_v35  ;;  %v378_v33 = vcombine.high %v370_v25, %v370_v25 }
 0x201   :  { %v493_v26 = vmul.f32 %v419_v20, %v229_v21  ;;  %3795 = vmatprep.mubr.msk.f32.mxu0 %vm85_vm0, %v492_v23  ;;  %v494_v29 = vmul.f32 %v423_v22, %v229_v21  ;;  %v427_v30 = vrot.slane %v361_v18, %v4340_v35  ;;  %v386_v39 = vrot.slane %v370_v25, %v4409_v1  ;;  %v32_v25 = vld [vmem:[%s5408_s1 + $0x18] sm:$0xff] }
 0x202   :  { %v362_v32 = vcombine.high %v358_v24, %v358_v24  ;;  %v435_v38 = vrot.slane %v358_v24, %v4340_v35  ;;  %v496_v40 = vmul.f32 %v431_v28, %v229_v21  ;;  %v439_v41 = vrot.slane %v360_v27, %v4340_v35 }
 0x203   :  { %3796 = vmatmul.mubr.msk.f32.vlgmr.msra.gmra.mxu0 %vm85_vm0, %v493_v26  ;;  %v495_v36 = vmul.f32 %v427_v30, %v229_v21  ;;  %v377_v42 = vrot.slane %v363_v31, %v4409_v1  ;;  %v400_v43 = vrot.slane %v378_v33, %v4409_v1  ;;  %v408_v47 = vcombine.high %v386_v39, %v386_v39  ;;  %v31_v30 = vld [vmem:[%s5408_s1 + $0x10] sm:$0xff] }
 0x204   :  { %3798 = vmatprep.mubr.msk.f32.mxu0 %vm85_vm0, %v494_v29  ;;  %v497_v45 = vmul.f32 %v435_v38, %v229_v21  ;;  %v443_v46 = vrot.slane %v362_v32, %v4340_v35  ;;  %v447_v49 = vrot.slane %v386_v39, %v4340_v35  ;;  %v498_v50 = vmul.f32 %v439_v41, %v229_v21  ;;  %v34_v39 = vld [vmem:[%s5408_s1 + $0x28] sm:$0xff] }
 0x205   :  { %v379_v52 = vcombine.high %v377_v42, %v377_v42  ;;  %v410_v55 = vcombine.high %v400_v43, %v400_v43  ;;  %v451_v56 = vrot.slane %v400_v43, %v4340_v35  ;;  %v393_v61 = vrot.slane %v377_v42, %v4409_v1 }
 0x206   :  { %v499_v60 = vmul.f32 %v443_v46, %v229_v21  ;;  %v455_v62 = vrot.slane %v408_v47, %v4340_v35  ;;  %v500_v63 = vmul.f32 %v447_v49, %v235_v51  ;;  %v79_v16 = vadd.s32 1, %v4337_v34  ;;  %v30_v21 = vld [vmem:[%s5408_s1 + $0x8] sm:$0xff]  ;;  %v33_v46 = vld [vmem:[%s5408_s1 + $0x20] sm:$0xff] }
 0x207   :  { %3799 = vmatmul.mubr.msk.f32.gmra.mxu0 %vm85_vm0, %v495_v36  ;;  %v407_v0 = vrot.slane %v379_v52, %v4409_v1  ;;  %v501_v2 = vmul.f32 %v451_v56, %v235_v51  ;;  %v459_v3 = vrot.slane %v410_v55, %v4340_v35  ;;  %v409_v4 = vcombine.high %v393_v61, %v393_v61 }
 0x208   :  { %3801 = vmatprep.mubr.msk.f32.mxu0 %vm85_vm0, %v496_v40  ;;  %v463_v5 = vrot.slane %v393_v61, %v4340_v35  ;;  %v502_v6 = vmul.f32 %v455_v62, %v235_v51  ;;  %v77_v17 = vmul.u32 8, %v4337_v34  ;;  %v80_v18 = vmul.u32 8, %v79_v16 }
 0x209   :  { %v411_v7 = vcombine.high %v407_v0, %v407_v0  ;;  %v503_v8 = vmul.f32 %v459_v3, %v235_v51  ;;  %v467_v9 = vrot.slane %v407_v0, %v4340_v35  ;;  %v471_v11 = vrot.slane %v409_v4, %v4340_v35 }
 0x20a   :  { %v504_v10 = vmul.f32 %v463_v5, %v235_v51  ;;  %vm78_vm13 = vcmp.ge.s32.totalorder %v4355_v48, %v77_v17  ;;  %vm81_vm14 = vcmp.lt.s32.totalorder %v4355_v48, %v80_v18  ;;  %v29_v48 = vld [vmem:[%s5408_s1] sm:$0xff]  ;;  %v35_v5 = vld [vmem:[%s5408_s1 + $0x30] sm:$0xff] }
 0x20b   :  { %3802 = vmatmul.mubr.msk.f32.gmra.mxu0 %vm85_vm0, %v497_v45  ;;  %v505_v12 = vmul.f32 %v467_v9, %v235_v51  ;;  %v475_v13 = vrot.slane %v411_v7, %v4340_v35  ;;  %v506_v14 = vmul.f32 %v471_v11, %v235_v51  ;;  %vm82_vm15 = vmand %vm78_vm13, %vm81_vm14  ;;  %vm1384_vm13 = vcmask 1047559  }
 0x20c   :  { %3804 = vmatprep.mubr.msk.f32.mxu0 %vm85_vm0, %v498_v50  ;;  %v4461_v20 = vsel %vm82_vm15, 1.0, %v4244_v19 }
 0x20d   :  { %v507_v15 = vmul.f32 %v475_v13, %v235_v51  ;;  %3819 = vmatprep.subr.msk.mxu1 %vm1070_vm1, %v4461_v20 }
 0x20e   :  { %3820 = vmatpush3.msk.msra.mxu1 %vm1070_vm1, %v4461_v20 }
 0x20f   :  { %3805 = vmatmul.mubr.msk.f32.gmra.mxu0 %vm85_vm0, %v499_v60  ;;  %v36_v60 = vld [vmem:[%s5408_s1 + $0x38] sm:$0xff] }
 0x210   :  { %3807 = vmatprep.mubr.msk.f32.mxu0 %vm85_vm0, %v500_v63 }
 0x213   :  { %3808 = vmatmul.mubr.msk.f32.gmra.mxu0 %vm85_vm0, %v501_v2 }
 0x214   :  { %3810 = vmatprep.mubr.msk.f32.mxu0 %vm85_vm0, %v502_v6 }
 0x217   :  { %3811 = vmatmul.mubr.msk.f32.gmra.mxu0 %vm85_vm0, %v503_v8 }
 0x218   :  { %3813 = vmatprep.mubr.msk.f32.mxu0 %vm85_vm0, %v504_v10 }
 0x21b   :  { %3814 = vmatmul.mubr.msk.f32.gmra.mxu0 %vm85_vm0, %v505_v12 }
 0x21c   :  { %3816 = vmatprep.mubr.msk.f32.mxu0 %vm85_vm0, %v506_v14 }
 0x21f   :  { %3817 = vmatmul.mubr.msk.f32.gmra.mxu0 %vm85_vm0, %v507_v15 }
 0x2c3   :  { %v3797_v22 = vpop.f32.mrf.mxu0 }
 0x2c4   :  { %v702_v23 = vadd.f32 %v3797_v22, %v30_v21 }
 0x2c5   :  { %v622_v24 = vpop.f32.mrf.mxu0 }
 0x2c6   :  { %v725_v26 = vsel %vm717_vm2, %v702_v23, -inf  ;;  %v4477_v27 = vadd.f32 %v622_v24, %v29_v48 }
 0x2c7   :  { %v726_v28 = vrot.slane %v725_v26, 4  ;;  %v3800_v29 = vpop.f32.mrf.mxu0 }
 0x2c8   :  { %v718_v31 = vsel %vm717_vm2, %v4477_v27, -inf  ;;  %v4484_v32 = vadd.f32 %v3800_v29, %v32_v25 }
 0x2c9   :  { %v727_v33 = vmax.f32 %v725_v26, %v726_v28  ;;  %v719_v36 = vrot.slane %v718_v31, 4  ;;  %v632_v38 = vpop.f32.mrf.mxu0 }
 0x2ca   :  { %v739_v40 = vsel %vm717_vm2, %v4484_v32, -inf  ;;  %v4491_v41 = vadd.f32 %v632_v38, %v31_v30 }
 0x2cb   :  { %v728_v42 = vrot.slane %v727_v33, 2  ;;  %v720_v43 = vmax.f32 %v718_v31, %v719_v36  ;;  %v740_v44 = vrot.slane %v739_v40, 4  ;;  %v3803_v45 = vpop.f32.mrf.mxu0 }
 0x2cc   :  { %v732_v47 = vsel %vm717_vm2, %v4491_v41, -inf  ;;  %v4498_v49 = vadd.f32 %v3803_v45, %v34_v39 }
 0x2cd   :  { %v729_v50 = vmax.f32 %v727_v33, %v728_v42  ;;  %v721_v51 = vrot.slane %v720_v43, 2  ;;  %v741_v52 = vmax.f32 %v739_v40, %v740_v44  ;;  %v733_v55 = vrot.slane %v732_v47, 4  ;;  %v642_v56 = vpop.f32.mrf.mxu0 }
 0x2ce   :  { %v753_v61 = vsel %vm717_vm2, %v4498_v49, -inf  ;;  %v4505_v62 = vadd.f32 %v642_v56, %v33_v46 }
 0x2cf   :  { %v730_v63 = vrot.slane %v729_v50, 1  ;;  %v722_v0 = vmax.f32 %v720_v43, %v721_v51  ;;  %v742_v2 = vrot.slane %v741_v52, 2  ;;  %v734_v3 = vmax.f32 %v732_v47, %v733_v55  ;;  %v3806_v4 = vpop.f32.mrf.mxu0  ;;  %v38_v43 = vld [vmem:[%s5408_s1 + $0x48] sm:$0xff] }
 0x2d0   :  { %v754_v6 = vrot.slane %v753_v61, 4  ;;  %v746_v7 = vsel %vm717_vm2, %v4505_v62, -inf  ;;  %v4512_v8 = vadd.f32 %v3806_v4, %v36_v60 }
 0x2d1   :  { %v731_v9 = vmax.f32 %v729_v50, %v730_v63  ;;  %v723_v10 = vrot.slane %v722_v0, 1  ;;  %v743_v11 = vmax.f32 %v741_v52, %v742_v2  ;;  %v735_v12 = vrot.slane %v734_v3, 2  ;;  %v652_v13 = vpop.f32.mrf.mxu0  ;;  %v37_v52 = vld [vmem:[%s5408_s1 + $0x40] sm:$0xff] }
 0x2d2   :  { %v755_v14 = vmax.f32 %v753_v61, %v754_v6  ;;  %v747_v15 = vrot.slane %v746_v7, 4  ;;  %v767_v16 = vsel %vm717_vm2, %v4512_v8, -inf  ;;  %v4516_v17 = vadd.f32 %v652_v13, %v35_v5 }
 0x2d3   :  { %v831_v18 = vsub.f32 %v702_v23, %v731_v9  ;;  %v724_v21 = vmax.f32 %v722_v0, %v723_v10  ;;  %v744_v22 = vrot.slane %v743_v11, 1  ;;  %v736_v48 = vmax.f32 %v734_v3, %v735_v12  ;;  %v3809_v24 = vpop.f32.mrf.mxu0  ;;  %v40_v3 = vld [vmem:[%s5408_s1 + $0x58] sm:$0xff] }
 0x2d4   :  { %v756_v25 = vrot.slane %v755_v14, 2  ;;  %v748_v26 = vmax.f32 %v746_v7, %v747_v15  ;;  %v768_v28 = vrot.slane %v767_v16, 4  ;;  %v760_v29 = vsel %vm717_vm2, %v4516_v17, -inf }
 0x2d5   :  { %v848_v30 = vmul.f32 1.442695, %v831_v18  ;;  %v830_v31 = vsub.f32 %v4477_v27, %v724_v21  ;;  %v745_v33 = vmax.f32 %v743_v11, %v744_v22  ;;  %v737_v36 = vrot.slane %v736_v48, 1  ;;  %v662_v38 = vpop.f32.mrf.mxu0  ;;  %v39_v11 = vld [vmem:[%s5408_s1 + $0x50] sm:$0xff] }
 0x2d6   :  { %v757_v39 = vmax.f32 %v755_v14, %v756_v25  ;;  %v749_v40 = vrot.slane %v748_v26, 2  ;;  %v769_v42 = vmax.f32 %v767_v16, %v768_v28  ;;  %v761_v23 = vrot.slane %v760_v29, 4 }
 0x2d7   :  { %4049 = vpow2.f32 %v848_v30  ;;  %v846_v44 = vmul.f32 1.442695, %v830_v31  ;;  %v833_v45 = vsub.f32 %v4484_v32, %v745_v33  ;;  %v738_v46 = vmax.f32 %v736_v48, %v737_v36  ;;  %v3812_v55 = vpop.f32.mrf.mxu0  ;;  %v42_v36 = vld [vmem:[%s5408_s1 + $0x68] sm:$0xff] }
 0x2d8   :  { %v758_v47 = vrot.slane %v757_v39, 1  ;;  %v750_v50 = vmax.f32 %v748_v26, %v749_v40  ;;  %v770_v51 = vrot.slane %v769_v42, 2  ;;  %v762_v27 = vmax.f32 %v760_v29, %v761_v23 }
 0x2d9   :  { %4051 = vpow2.f32 %v846_v44  ;;  %v852_v56 = vmul.f32 1.442695, %v833_v45  ;;  %v832_v60 = vsub.f32 %v4491_v41, %v738_v46  ;;  %v4529_v61 = vadd.f32 %v3809_v24, %v38_v43  ;;  %v672_v12 = vpop.f32.mrf.mxu0 }
 0x2da   :  { %v759_v63 = vmax.f32 %v757_v39, %v758_v47  ;;  %v751_v0 = vrot.slane %v750_v50, 1  ;;  %v771_v2 = vmax.f32 %v769_v42, %v770_v51  ;;  %v763_v32 = vrot.slane %v762_v27, 2 }
 0x2db   :  { %4053 = vpow2.f32 %v852_v56  ;;  %v850_v4 = vmul.f32 1.442695, %v832_v60  ;;  %v781_v5 = vsel %vm717_vm2, %v4529_v61, -inf  ;;  %v4536_v6 = vadd.f32 %v662_v38, %v37_v52  ;;  %v3815_v38 = vpop.f32.mrf.mxu0 }
 0x2dc   :  { %v835_v7 = vsub.f32 %v4498_v49, %v759_v63  ;;  %v752_v41 = vmax.f32 %v750_v50, %v751_v0  ;;  %v772_v9 = vrot.slane %v771_v2, 1  ;;  %v764_v10 = vmax.f32 %v762_v27, %v763_v32 }
 0x2dd   :  { %4055 = vpow2.f32 %v850_v4  ;;  %v782_v13 = vrot.slane %v781_v5, 4  ;;  %v774_v14 = vsel %vm717_vm2, %v4536_v6, -inf  ;;  %v4544_v15 = vadd.f32 %v3812_v55, %v40_v3 }
 0x2de   :  { %v856_v16 = vmul.f32 1.442695, %v835_v7  ;;  %v834_v18 = vsub.f32 %v4505_v62, %v752_v41  ;;  %v773_v21 = vmax.f32 %v771_v2, %v772_v9  ;;  %v765_v49 = vrot.slane %v764_v10, 1 }
 0x2df   :  { %v783_v22 = vmax.f32 %v781_v5, %v782_v13  ;;  %v775_v48 = vrot.slane %v774_v14, 4  ;;  %v795_v24 = vsel %vm717_vm2, %v4544_v15, -inf  ;;  %v4549_v25 = vadd.f32 %v672_v12, %v39_v11 }
 0x2e0   :  { %4057 = vpow2.f32 %v856_v16  ;;  %v854_v26 = vmul.f32 1.442695, %v834_v18  ;;  %v837_v28 = vsub.f32 %v4512_v8, %v773_v21  ;;  %v766_v29 = vmax.f32 %v764_v10, %v765_v49 }
 0x2e1   :  { %v784_v30 = vrot.slane %v783_v22, 2  ;;  %v776_v31 = vmax.f32 %v774_v14, %v775_v48  ;;  %v796_v33 = vrot.slane %v795_v24, 4  ;;  %v788_v62 = vsel %vm717_vm2, %v4549_v25, -inf }
 0x2e2   :  { %4059 = vpow2.f32 %v854_v26  ;;  %v860_v39 = vmul.f32 1.442695, %v837_v28  ;;  %v836_v40 = vsub.f32 %v4516_v17, %v766_v29  ;;  %v789_v42 = vrot.slane %v788_v62, 4 }
 0x2e3   :  { %v785_v23 = vmax.f32 %v783_v22, %v784_v30  ;;  %v777_v43 = vrot.slane %v776_v31, 2  ;;  %v797_v8 = vmax.f32 %v795_v24, %v796_v33  ;;  %v4560_v47 = vadd.f32 %v3815_v38, %v42_v36  ;;  %v41_v36 = vld [vmem:[%s5408_s1 + $0x60] sm:$0xff] }
 0x2e4   :  { %v4558_v44 = vpop.eup %4049  ;;  %4061 = vpow2.f32 %v860_v39  ;;  %v858_v45 = vmul.f32 1.442695, %v836_v40  ;;  %v790_v46 = vmax.f32 %v788_v62, %v789_v42 }
 0x2e5   :  { %v885_v50 = vsel %vm717_vm2, %v4558_v44, 0.0  ;;  %v786_v51 = vrot.slane %v785_v23, 1  ;;  %v778_v27 = vmax.f32 %v776_v31, %v777_v43  ;;  %v798_v52 = vrot.slane %v797_v8, 2 }
 0x2e6   :  { %v4564_v55 = vpop.eup %4051  ;;  %v886_v17 = vrot.slane %v885_v50, 4  ;;  %4063 = vpow2.f32 %v858_v45  ;;  %v791_v56 = vrot.slane %v790_v46, 2  ;;  %v809_v7 = vsel %vm717_vm2, %v4560_v47, -inf }
 0x2e7   :  { %v878_v60 = vsel %vm717_vm2, %v4564_v55, 0.0  ;;  %v787_v63 = vmax.f32 %v785_v23, %v786_v51  ;;  %v779_v0 = vrot.slane %v778_v27, 1  ;;  %v799_v2 = vmax.f32 %v797_v8, %v798_v52 }
 0x2e8   :  { %v4568_v32 = vpop.eup %4053  ;;  %v887_v3 = vadd.f32 %v886_v17, %v885_v50  ;;  %v879_v4 = vrot.slane %v878_v60, 4  ;;  %v792_v5 = vmax.f32 %v790_v46, %v791_v56  ;;  %v810_v29 = vrot.slane %v809_v7, 4 }
 0x2e9   :  { %v899_v41 = vsel %vm717_vm2, %v4568_v32, 0.0  ;;  %v839_v9 = vsub.f32 %v4529_v61, %v787_v63  ;;  %v780_v10 = vmax.f32 %v778_v27, %v779_v0  ;;  %v800_v11 = vrot.slane %v799_v2, 1  ;;  %v682_v61 = vpop.f32.mrf.mxu0 }
 0x2ea   :  { %v4575_v12 = vpop.eup %4055  ;;  %v888_v13 = vrot.slane %v887_v3, 2  ;;  %v880_v14 = vadd.f32 %v879_v4, %v878_v60  ;;  %v900_v16 = vrot.slane %v899_v41, 4  ;;  %v793_v18 = vrot.slane %v792_v5, 1  ;;  %v44_v4 = vld [vmem:[%s5408_s1 + $0x78] sm:$0xff] }
 0x2eb   :  { %v892_v21 = vsel %vm717_vm2, %v4575_v12, 0.0  ;;  %v864_v49 = vmul.f32 1.442695, %v839_v9  ;;  %v838_v22 = vsub.f32 %v4536_v6, %v780_v10  ;;  %v801_v48 = vmax.f32 %v799_v2, %v800_v11  ;;  %v3818_v46 = vpop.f32.mrf.mxu0  ;;  %v43_v11 = vld [vmem:[%s5408_s1 + $0x70] sm:$0xff] }
 0x2ec   :  { %v889_v24 = vadd.f32 %v888_v13, %v887_v3  ;;  %v901_v26 = vadd.f32 %v900_v16, %v899_v41  ;;  %v893_v28 = vrot.slane %v892_v21, 4  ;;  %v794_v62 = vmax.f32 %v792_v5, %v793_v18 }
 0x2ed   :  { %v4580_v30 = vpop.eup %4057  ;;  %4065 = vpow2.f32 %v864_v49  ;;  %v862_v31 = vmul.f32 1.442695, %v838_v22  ;;  %v841_v33 = vsub.f32 %v4544_v15, %v801_v48  ;;  %v881_v39 = vrot.slane %v880_v14, 2  ;;  %v692_v13 = vpop.f32.mrf.mxu0 }
 0x2ee   :  { %v890_v38 = vrot.slane %v889_v24, 1  ;;  %v902_v6 = vrot.slane %v901_v26, 2  ;;  %v894_v40 = vadd.f32 %v893_v28, %v892_v21  ;;  %v913_v23 = vsel %vm717_vm2, %v4580_v30, 0.0 }
 0x2ef   :  { %v4586_v42 = vpop.eup %4059  ;;  %4067 = vpow2.f32 %v862_v31  ;;  %v868_v43 = vmul.f32 1.442695, %v841_v33  ;;  %v840_v8 = vsub.f32 %v4549_v25, %v794_v62  ;;  %v4591_v15 = vadd.f32 %v682_v61, %v41_v36 }
 0x2f0   :  { %v895_v45 = vrot.slane %v894_v40, 2  ;;  %v914_v51 = vrot.slane %v913_v23, 4  ;;  %v906_v27 = vsel %vm717_vm2, %v4586_v42, 0.0  ;;  %v891_v17 = vadd.f32 %v890_v38, %v889_v24 }
 0x2f1   :  { %v4593_v50 = vpop.eup %4061  ;;  %4069 = vpow2.f32 %v868_v43  ;;  %v866_v52 = vmul.f32 1.442695, %v840_v8  ;;  %v882_v56 = vadd.f32 %v881_v39, %v880_v14  ;;  %v4597_v60 = vadd.f32 %v902_v6, %v901_v26 }
 0x2f2   :  { %v907_v63 = vrot.slane %v906_v27, 4  ;;  %v915_v25 = vadd.f32 %v914_v51, %v913_v23  ;;  %v927_v2 = vsel %vm717_vm2, %v4593_v50, 0.0  ;;  %v811_v3 = vmax.f32 %v809_v7, %v810_v29 }
 0x2f3   :  { %v4599_v0 = vpop.eup %4063  ;;  %4071 = vpow2.f32 %v866_v52  ;;  %v4606_v5 = vadd.f32 %v895_v45, %v894_v40  ;;  %v928_v9 = vrot.slane %v927_v2, 4  ;;  %v802_v7 = vsel %vm717_vm2, %v4591_v15, -inf }
 0x2f4   :  { %v908_v41 = vadd.f32 %v907_v63, %v906_v27  ;;  %v920_v10 = vsel %vm717_vm2, %v4599_v0, 0.0  ;;  %v916_v14 = vrot.slane %v915_v25, 2  ;;  %v812_v18 = vrot.slane %v811_v3, 2 }
 0x2f5   :  { %v921_v16 = vrot.slane %v920_v10, 4  ;;  %v929_v49 = vadd.f32 %v928_v9, %v927_v2  ;;  %v803_v22 = vrot.slane %v802_v7, 4  ;;  %v4615_v48 = vadd.f32 %v3818_v46, %v44_v4 }
 0x2f6   :  { %v909_v21 = vrot.slane %v908_v41, 2  ;;  %v883_v24 = vrot.slane %v882_v56, 1  ;;  %v4617_v26 = vadd.f32 %v916_v14, %v915_v25  ;;  %v813_v28 = vmax.f32 %v811_v3, %v812_v18 }
 0x2f7   :  { %v4619_v29 = vadd.f32 %v692_v13, %v43_v11  ;;  %4073 = vrcp.f32 %v891_v17  ;;  %v922_v61 = vadd.f32 %v921_v16, %v920_v10  ;;  %v804_v31 = vmax.f32 %v802_v7, %v803_v22 }
 0x2f8   :  { %v823_v33 = vsel %vm717_vm2, %v4615_v48, -inf  ;;  %v904_v62 = vrot.slane %v4597_v60, 1  ;;  %v930_v36 = vrot.slane %v929_v49, 2  ;;  %v814_v38 = vrot.slane %v813_v28, 1 }
 0x2f9   :  { %v824_v39 = vrot.slane %v823_v33, 4  ;;  %v897_v40 = vrot.slane %v4606_v5, 1  ;;  %v910_v23 = vadd.f32 %v909_v21, %v908_v41  ;;  %v805_v43 = vrot.slane %v804_v31, 2 }
 0x2fa   :  { %v4624_v6 = vpop.eup %4065  ;;  %v816_v8 = vsel %vm717_vm2, %v4619_v29, -inf  ;;  %v918_v45 = vrot.slane %v4617_v26, 1  ;;  %v815_v51 = vmax.f32 %v813_v28, %v814_v38  ;;  %v923_v17 = vrot.slane %v922_v61, 2 }
 0x2fb   :  { %v941_v46 = vsel %vm717_vm2, %v4624_v6, 0.0  ;;  %v825_v27 = vmax.f32 %v823_v33, %v824_v39  ;;  %v806_v25 = vmax.f32 %v804_v31, %v805_v43  ;;  %v817_v2 = vrot.slane %v816_v8, 4 }
 0x2fc   :  { %v4632_v52 = vpop.eup %4067  ;;  %v942_v63 = vrot.slane %v941_v46, 4  ;;  %v931_v3 = vadd.f32 %v930_v36, %v929_v49  ;;  %v843_v41 = vsub.f32 %v4560_v47, %v815_v51  ;;  %v884_v22 = vadd.f32 %v883_v24, %v882_v56 }
 0x2fd   :  { %v934_v4 = vsel %vm717_vm2, %v4632_v52, 0.0  ;;  %v826_v9 = vrot.slane %v825_v27, 2  ;;  %v807_v14 = vrot.slane %v806_v25, 1  ;;  %v818_v16 = vmax.f32 %v816_v8, %v817_v2 }
 0x2fe   :  { %v4637_v10 = vpop.eup %4069  ;;  %v943_v11 = vadd.f32 %v942_v63, %v941_v46  ;;  %v935_v13 = vrot.slane %v934_v4, 4  ;;  %v872_v7 = vmul.f32 1.442695, %v843_v41  ;;  %v924_v49 = vadd.f32 %v923_v17, %v922_v61 }
 0x2ff   :  { %v955_v18 = vsel %vm717_vm2, %v4637_v10, 0.0  ;;  %v827_v21 = vmax.f32 %v825_v27, %v826_v9  ;;  %v808_v36 = vmax.f32 %v806_v25, %v807_v14  ;;  %v819_v39 = vrot.slane %v818_v16, 2 }
 0x300   :  { %v4641_v28 = vpop.eup %4071  ;;  %v936_v31 = vadd.f32 %v935_v13, %v934_v4  ;;  %v956_v33 = vrot.slane %v955_v18, 4  ;;  %4075 = vpow2.f32 %v872_v7  ;;  %v944_v43 = vrot.slane %v943_v11, 2 }
 0x301   :  { %v948_v47 = vsel %vm717_vm2, %v4641_v28, 0.0  ;;  %v828_v38 = vrot.slane %v827_v21, 1  ;;  %v842_v63 = vsub.f32 %v4591_v15, %v808_v36  ;;  %v820_v56 = vmax.f32 %v818_v16, %v819_v39 }
 0x302   :  { %v937_v8 = vrot.slane %v936_v31, 2  ;;  %v957_v46 = vadd.f32 %v956_v33, %v955_v18  ;;  %v949_v51 = vrot.slane %v948_v47, 4  ;;  %4077 = vrcp.f32 %v884_v22 }
 0x303   :  { %v829_v27 = vmax.f32 %v827_v21, %v828_v38  ;;  %v911_v24 = vrot.slane %v910_v23, 1  ;;  %v932_v61 = vrot.slane %v931_v3, 1  ;;  %v925_v4 = vrot.slane %v924_v49, 1 }
 0x304   :  { %v938_v17 = vadd.f32 %v937_v8, %v936_v31  ;;  %v950_v2 = vadd.f32 %v949_v51, %v948_v47  ;;  %v4074_v25 = vpop.eup %4073  ;;  %v870_v41 = vmul.f32 1.442695, %v842_v63  ;;  %v821_v13 = vrot.slane %v820_v56, 1 }
 0x305   :  { %v845_v9 = vsub.f32 %v4615_v48, %v829_v27  ;;  %v945_v14 = vadd.f32 %v944_v43, %v943_v11  ;;  %v958_v7 = vrot.slane %v957_v46, 2  ;;  %v898_v18 = vadd.f32 %v897_v40, %v4606_v5 }
 0x306   :  { %v951_v54 = vrot.slane %v950_v2, 2  ;;  %4079 = vpow2.f32 %v870_v41  ;;  %v822_v21 = vmax.f32 %v820_v56, %v821_v13  ;;  %v905_v16 = vadd.f32 %v904_v62, %v4597_v60 }
 0x307   :  { %v876_v15 = vmul.f32 1.442695, %v845_v9  ;;  %v939_v22 = vrot.slane %v938_v17, 1  ;;  %4081 = vrcp.f32 %v898_v18  ;;  %v912_v33 = vadd.f32 %v911_v24, %v910_v23 }
 0x308   :  { %v952_v31 = vadd.f32 %v951_v54, %v950_v2  ;;  %v844_v48 = vsub.f32 %v4619_v29, %v822_v21  ;;  %v919_v11 = vadd.f32 %v918_v45, %v4617_v26  ;;  %v926_v36 = vadd.f32 %v925_v4, %v924_v49 }
 0x309   :  { %4083 = vpow2.f32 %v876_v15  ;;  %v933_v40 = vadd.f32 %v932_v61, %v931_v3  ;;  %v946_v38 = vrot.slane %v945_v14, 1  ;;  %v959_v39 = vadd.f32 %v958_v7, %v957_v46 }
 0x30a   :  { %4085 = vrcp.f32 %v905_v16  ;;  %v953_v47 = vrot.slane %v952_v31, 1  ;;  %v874_v5 = vmul.f32 1.442695, %v844_v48  ;;  %v940_v43 = vadd.f32 %v939_v22, %v938_v17 }
 0x30b   :  { %4087 = vrcp.f32 %v912_v33  ;;  %v960_v62 = vrot.slane %v959_v39, 1  ;;  %v947_v45 = vadd.f32 %v946_v38, %v945_v14  ;;  %v1007_v8 = vmul.f32 %v4074_v25, %v4558_v44 }
 0x30c   :  { %4089 = vrcp.f32 %v919_v11  ;;  %v954_v29 = vadd.f32 %v953_v47, %v952_v31 }
 0x30d   :  { %4091 = vpow2.f32 %v874_v5  ;;  %v4653_v60 = vpop.eup %4075  ;;  %v961_v63 = vadd.f32 %v960_v62, %v959_v39 }
 0x30e   :  { %4093 = vrcp.f32 %v926_v36  ;;  %v969_v54 = vsel %vm717_vm2, %v4653_v60, 0.0 }
 0x30f   :  { %4095 = vrcp.f32 %v933_v40  ;;  %v4078_v26 = vpop.eup %4077  ;;  %v970_v23 = vrot.slane %v969_v54, 4 }
 0x310   :  { %4097 = vrcp.f32 %v940_v43  ;;  %v1006_v3 = vmul.f32 %v4078_v26, %v4564_v55 }
 0x311   :  { %v971_v49 = vadd.f32 %v970_v23, %v969_v54  ;;  %4099 = vrcp.f32 %v954_v29 }
 0x312   :  { %3821 = vmatprep.mubr.msk.f32.mxu1 %vm717_vm2, %v1006_v3  ;;  %4101 = vrcp.f32 %v947_v45 }
 0x313   :  { %v4660_v46 = vpop.eup %4079  ;;  %v972_v51 = vrot.slane %v971_v49, 2  ;;  %3822 = vmatmul.mubr.msk.f32.vlgmr.msra.gmra.mxu1 %vm717_vm2, %v1007_v8  ;;  %4103 = vrcp.f32 %v961_v63 }
 0x314   :  { %v4082_v27 = vpop.eup %4081  ;;  %v962_v56 = vsel %vm717_vm2, %v4660_v46, 0.0 }
 0x315   :  { %v973_v55 = vadd.f32 %v972_v51, %v971_v49  ;;  %v963_v61 = vrot.slane %v962_v56, 4  ;;  %v1008_v44 = vmul.f32 %v4082_v27, %v4575_v12 }
 0x316   :  { %v4665_v24 = vpop.eup %4083 }
 0x317   :  { %v4086_v17 = vpop.eup %4085  ;;  %v983_v2 = vsel %vm717_vm2, %v4665_v24, 0.0  ;;  %v964_v4 = vadd.f32 %v963_v61, %v962_v56  ;;  %3824 = vmatprep.mubr.msk.f32.mxu1 %vm717_vm2, %v1008_v44  ;;  %v974_v14 = vrot.slane %v973_v55, 1  ;;  %v3786_v61 = vpop.f32.mrf.mxu1  ;;  %v4710_v44 = vsub.s32 2, %v4337_v34 }
 0x318   :  { %v4088_v25 = vpop.eup %4087  ;;  %v984_v41 = vrot.slane %v983_v2, 4  ;;  %v1009_v9 = vmul.f32 %v4086_v17, %v4568_v32 }
 0x319   :  { %v4090_v13 = vpop.eup %4089  ;;  %v1010_v7 = vmul.f32 %v4088_v25, %v4586_v42  ;;  %v965_v15 = vrot.slane %v964_v4, 2  ;;  %v975_v42 = vadd.f32 %v974_v14, %v973_v55  ;;  %v303_v17 = vpop.f32.mrf.mxu1 }
 0x31a   :  { %v4092_v18 = vpop.eup %4091  ;;  %v985_v21 = vadd.f32 %v984_v41, %v983_v2  ;;  %3825 = vmatmul.mubr.msk.f32.gmra.mxu1 %vm717_vm2, %v1009_v9  ;;  %v1011_v22 = vmul.f32 %v4090_v13, %v4580_v30  ;;  %v4201_v2 = vld [vmem:[%s5412_s5] ss:$4 sm:$0x7] }
 0x31b   :  { %v4094_v12 = vpop.eup %4093  ;;  %v976_v16 = vsel %vm717_vm2, %v4092_v18, 0.0  ;;  %3827 = vmatprep.mubr.msk.f32.mxu1 %vm717_vm2, %v1010_v7  ;;  %v966_v33 = vadd.f32 %v965_v15, %v964_v4  ;;  %4105 = vrcp.f32 %v975_v42  ;;  %v150_v25 = vrot.slane %v4201_v2, %v4710_v44 }
 0x31c   :  { %v4096_v31 = vpop.eup %4095  ;;  %v986_v32 = vrot.slane %v985_v21, 2  ;;  %v977_v48 = vrot.slane %v976_v16, 4  ;;  %v1012_v11 = vmul.f32 %v4094_v12, %v4599_v0 }
 0x31d   :  { %v4098_v36 = vpop.eup %4097  ;;  %v967_v47 = vrot.slane %v966_v33, 1  ;;  %v1013_v54 = vmul.f32 %v4096_v31, %v4593_v50  ;;  %v304_v4 = vadd.f32 %v303_v17, %v150_v25 }
 0x31e   :  { %v987_v5 = vadd.f32 %v986_v32, %v985_v21  ;;  %v978_v40 = vadd.f32 %v977_v48, %v976_v16  ;;  %3828 = vmatmul.mubr.msk.f32.gmra.mxu1 %vm717_vm2, %v1011_v22  ;;  %v1014_v38 = vmul.f32 %v4098_v36, %v4632_v52  ;;  %v4100_v39 = vpop.eup %4099 }
 0x31f   :  { %3830 = vmatprep.mubr.msk.f32.mxu1 %vm717_vm2, %v1012_v11  ;;  %v968_v29 = vadd.f32 %v967_v47, %v966_v33  ;;  %v4102_v26 = vpop.eup %4101  ;;  %v1016_v62 = vmul.f32 %v4100_v39, %v4641_v28 }
 0x320   :  { %v988_v43 = vrot.slane %v987_v5, 1  ;;  %v979_v30 = vrot.slane %v978_v40, 2  ;;  %v1015_v52 = vmul.f32 %v4102_v26, %v4624_v6  ;;  %v4104_v3 = vpop.eup %4103 }
 0x321   :  { %4107 = vrcp.f32 %v968_v29  ;;  %v1017_v50 = vmul.f32 %v4104_v3, %v4637_v10  ;;  %v1350_v10 = vld [vmem:[%s5410_s3 + $0x90] sm:$0xff] }
 0x322   :  { %v980_v0 = vadd.f32 %v979_v30, %v978_v40  ;;  %3831 = vmatmul.mubr.msk.f32.gmra.mxu1 %vm717_vm2, %v1013_v54  ;;  %v989_v23 = vadd.f32 %v988_v43, %v987_v5  ;;  %3845 = vmatprep.subr.mxu1 %v1350_v10 }
 0x323   :  { %3833 = vmatprep.mubr.msk.f32.mxu1 %vm717_vm2, %v1014_v38  ;;  %3846 = vmatpush3.msra.mxu1 %v1350_v10 }
 0x324   :  { %v981_v45 = vrot.slane %v980_v0, 1  ;;  %4109 = vrcp.f32 %v989_v23 }
 0x326   :  { %3834 = vmatmul.mubr.msk.f32.gmra.mxu1 %vm717_vm2, %v1015_v52  ;;  %v982_v49 = vadd.f32 %v981_v45, %v980_v0  ;;  %v4721_v0 = vadd.f32 %v3786_v61, %v150_v25 }
 0x327   :  { %3836 = vmatprep.mubr.msk.f32.mxu1 %vm717_vm2, %v1016_v62 }
 0x328   :  { %4111 = vrcp.f32 %v982_v49  ;;  %v4106_v8 = vpop.eup %4105 }
 0x329   :  { %v1019_v63 = vmul.f32 %v4106_v8, %v4653_v60  ;;  %v1349_v60 = vld [vmem:[%s5410_s3 + $0x68] sm:$0xff] }
 0x32a   :  { %3837 = vmatmul.mubr.msk.f32.gmra.mxu1 %vm717_vm2, %v1017_v50  ;;  %3847 = vmatprep.subr.mxu1 %v1349_v60 }
 0x32b   :  { %3848 = vmatpush3.msra.mxu1 %v1349_v60 }
 0x32e   :  { %v4108_v51 = vpop.eup %4107 }
 0x32f   :  { %v1018_v28 = vmul.f32 %v4108_v51, %v4660_v46  ;;  %v1348_v46 = vld [vmem:[%s5410_s3 + $0x40] sm:$0xff] }
 0x330   :  { %3849 = vmatprep.subr.mxu1 %v1348_v46 }
 0x331   :  { %3839 = vmatprep.mubr.msk.f32.mxu1 %vm717_vm2, %v1018_v28  ;;  %v4110_v6 = vpop.eup %4109  ;;  %3850 = vmatpush3.msra.mxu1 %v1348_v46 }
 0x332   :  { %3840 = vmatmul.mubr.msk.f32.gmra.mxu1 %vm717_vm2, %v1019_v63  ;;  %v1021_v55 = vmul.f32 %v4110_v6, %v4665_v24  ;;  %v1347_v24 = vld [vmem:[%s5410_s3 + $0x18] sm:$0xff] }
 0x333   :  { %3851 = vmatprep.subr.mxu1 %v1347_v24 }
 0x334   :  { %3852 = vmatpush3.msra.mxu1 %v1347_v24 }
 0x335   :  { %v4112_v27 = vpop.eup %4111 }
 0x336   :  { %v1020_v56 = vmul.f32 %v4112_v27, %v4092_v18 }
 0x338   :  { %3842 = vmatprep.mubr.msk.f32.mxu1 %vm717_vm2, %v1020_v56 }
 0x339   :  { %3843 = vmatmul.mubr.msk.f32.gmra.mxu1 %vm717_vm2, %v1021_v55 }
 0x3d3   :  { %v3823_v41 = vpop.f32.mrf.mxu1 }
 0x3d4   :  { %v1220_v9 = vmul.f32 %v3823_v41, %v304_v4 }
 0x3d5   :  { %v1140_v13 = vpop.f32.mrf.mxu1 }
 0x3d6   :  { %v1242_v14 = vsel %vm85_vm0, %v1220_v9, 0.0  ;;  %v1219_v7 = vmul.f32 %v1140_v13, %v304_v4 }
 0x3d7   :  { %v1243_v18 = vrot.slane %v1242_v14, 4 }
 0x3d8   :  { %v1235_v15 = vsel %vm85_vm0, %v1219_v7, 0.0 }
 0x3d9   :  { %v1244_v21 = vadd.f32 %v1243_v18, %v1242_v14  ;;  %v1236_v12 = vrot.slane %v1235_v15, 4 }
 0x3da   :  { %v3826_v16 = vpop.f32.mrf.mxu1 }
 0x3db   :  { %v1222_v22 = vmul.f32 %v3826_v16, %v304_v4  ;;  %v1245_v31 = vrot.slane %v1244_v21, 2  ;;  %v1237_v33 = vadd.f32 %v1236_v12, %v1235_v15 }
 0x3dc   :  { %v1150_v32 = vpop.f32.mrf.mxu1 }
 0x3dd   :  { %v1256_v48 = vsel %vm85_vm0, %v1222_v22, 0.0  ;;  %v1221_v11 = vmul.f32 %v1150_v32, %v304_v4  ;;  %v1246_v36 = vadd.f32 %v1245_v31, %v1244_v21  ;;  %v1238_v42 = vrot.slane %v1237_v33, 2 }
 0x3de   :  { %v1257_v47 = vrot.slane %v1256_v48, 4  ;;  %v3829_v5 = vpop.f32.mrf.mxu1 }
 0x3df   :  { %v1249_v40 = vsel %vm85_vm0, %v1221_v11, 0.0  ;;  %v1224_v38 = vmul.f32 %v3829_v5, %v304_v4  ;;  %v1239_v39 = vadd.f32 %v1238_v42, %v1237_v33  ;;  %v1247_v62 = vrot.slane %v1246_v36, 1 }
 0x3e0   :  { %v1258_v43 = vadd.f32 %v1257_v47, %v1256_v48  ;;  %v1250_v30 = vrot.slane %v1249_v40, 4  ;;  %v1160_v54 = vpop.f32.mrf.mxu1 }
 0x3e1   :  { %v1270_v29 = vsel %vm85_vm0, %v1224_v38, 0.0  ;;  %v1223_v26 = vmul.f32 %v1160_v54, %v304_v4  ;;  %v1240_v8 = vrot.slane %v1239_v39, 1  ;;  %v1248_v10 = vadd.f32 %v1247_v62, %v1246_v36 }
 0x3e2   :  { %v1259_v23 = vrot.slane %v1258_v43, 2  ;;  %v1251_v45 = vadd.f32 %v1250_v30, %v1249_v40  ;;  %v3832_v52 = vpop.f32.mrf.mxu1  ;;  %v1271_v3 = vrot.slane %v1270_v29, 4 }
 0x3e3   :  { %v1263_v49 = vsel %vm85_vm0, %v1223_v26, 0.0  ;;  %v1226_v50 = vmul.f32 %v3832_v52, %v304_v4  ;;  %v1241_v41 = vadd.f32 %v1240_v8, %v1239_v39 }
 0x3e4   :  { %v1252_v51 = vrot.slane %v1251_v45, 2  ;;  %v1264_v28 = vrot.slane %v1263_v49, 4  ;;  %v1170_v63 = vpop.f32.mrf.mxu1  ;;  %v1260_v6 = vadd.f32 %v1259_v23, %v1258_v43  ;;  %v1272_v27 = vadd.f32 %v1271_v3, %v1270_v29 }
 0x3e5   :  { %v1284_v56 = vsel %vm85_vm0, %v1226_v50, 0.0  ;;  %v1225_v55 = vmul.f32 %v1170_v63, %v304_v4  ;;  %v1373_v36 = vsel %vm1372_vm4, %v1248_v10, %v1241_v41 }
 0x3e6   :  { %v1253_v60 = vadd.f32 %v1252_v51, %v1251_v45  ;;  %v1265_v46 = vadd.f32 %v1264_v28, %v1263_v49  ;;  %v3835_v24 = vpop.f32.mrf.mxu1  ;;  %v1273_v61 = vrot.slane %v1272_v27, 2  ;;  %v1285_v17 = vrot.slane %v1284_v56, 4 }
 0x3e7   :  { %v1277_v2 = vsel %vm85_vm0, %v1225_v55, 0.0  ;;  %v1228_v25 = vmul.f32 %v3835_v24, %v4721_v0  ;;  %v1261_v18 = vrot.slane %v1260_v6, 1 }
 0x3e8   :  { %v1254_v9 = vrot.slane %v1253_v60, 1  ;;  %v1266_v13 = vrot.slane %v1265_v46, 2  ;;  %v1278_v14 = vrot.slane %v1277_v2, 4  ;;  %v1180_v7 = vpop.f32.mrf.mxu1  ;;  %v1286_v15 = vadd.f32 %v1285_v17, %v1284_v56 }
 0x3e9   :  { %v1298_v4 = vsel %vm85_vm0, %v1228_v25, 0.0  ;;  %v1227_v21 = vmul.f32 %v1180_v7, %v4721_v0  ;;  %v1274_v16 = vadd.f32 %v1273_v61, %v1272_v27  ;;  %v1262_v38 = vadd.f32 %v1261_v18, %v1260_v6 }
 0x3ea   :  { %v1255_v12 = vadd.f32 %v1254_v9, %v1253_v60  ;;  %v1267_v22 = vadd.f32 %v1266_v13, %v1265_v46  ;;  %v1279_v31 = vadd.f32 %v1278_v14, %v1277_v2  ;;  %v3838_v33 = vpop.f32.mrf.mxu1  ;;  %v1287_v32 = vrot.slane %v1286_v15, 2 }
 0x3eb   :  { %v1291_v48 = vsel %vm85_vm0, %v1227_v21, 0.0  ;;  %v1230_v11 = vmul.f32 %v3838_v33, %v4721_v0  ;;  %v1299_v5 = vrot.slane %v1298_v4, 4  ;;  %v1275_v54 = vrot.slane %v1274_v16, 1 }
 0x3ec   :  { %v1268_v42 = vrot.slane %v1267_v22, 1  ;;  %v1280_v47 = vrot.slane %v1279_v31, 2  ;;  %v1190_v40 = vpop.f32.mrf.mxu1  ;;  %v1375_v39 = vsel %vm1374_vm5, %v1255_v12, %v1373_v36  ;;  %v1288_v43 = vadd.f32 %v1287_v32, %v1286_v15 }
 0x3ed   :  { %v1292_v30 = vrot.slane %v1291_v48, 4  ;;  %v1312_v62 = vsel %vm85_vm0, %v1230_v11, 0.0  ;;  %v1229_v45 = vmul.f32 %v1190_v40, %v4721_v0  ;;  %v1300_v3 = vadd.f32 %v1299_v5, %v1298_v4 }
 0x3ee   :  { %v1269_v29 = vadd.f32 %v1268_v42, %v1267_v22  ;;  %v1281_v26 = vadd.f32 %v1280_v47, %v1279_v31  ;;  %v1377_v49 = vsel %vm1376_vm7, %v1262_v38, %v1375_v39  ;;  %v1289_v50 = vrot.slane %v1288_v43, 1 }
 0x3ef   :  { %v1293_v23 = vadd.f32 %v1292_v30, %v1291_v48  ;;  %v1313_v8 = vrot.slane %v1312_v62, 4  ;;  %v1305_v51 = vsel %vm85_vm0, %v1229_v45, 0.0  ;;  %v1276_v63 = vadd.f32 %v1275_v54, %v1274_v16 }
 0x3f0   :  { %v1282_v52 = vrot.slane %v1281_v26, 1  ;;  %v1379_v28 = vsel %vm1378_vm8, %v1269_v29, %v1377_v49  ;;  %v1306_v27 = vrot.slane %v1305_v51, 4  ;;  %v1301_v10 = vrot.slane %v1300_v3, 2 }
 0x3f1   :  { %v1294_v56 = vrot.slane %v1293_v23, 2  ;;  %v1381_v24 = vsel %vm1380_vm10, %v1276_v63, %v1379_v28  ;;  %v1290_v61 = vadd.f32 %v1289_v50, %v1288_v43  ;;  %v1314_v17 = vadd.f32 %v1313_v8, %v1312_v62 }
 0x3f2   :  { %v1283_v6 = vadd.f32 %v1282_v52, %v1281_v26  ;;  %v3841_v55 = vpop.f32.mrf.mxu1  ;;  %v1307_v60 = vadd.f32 %v1306_v27, %v1305_v51  ;;  %v1302_v15 = vadd.f32 %v1301_v10, %v1300_v3 }
 0x3f3   :  { %v1232_v46 = vmul.f32 %v3841_v55, %v4721_v0  ;;  %v1295_v14 = vadd.f32 %v1294_v56, %v1293_v23  ;;  %v1315_v12 = vrot.slane %v1314_v17, 2 }
 0x3f4   :  { %v1200_v2 = vpop.f32.mrf.mxu1  ;;  %v1383_v25 = vsel %vm1382_vm11, %v1283_v6, %v1381_v24  ;;  %v1308_v41 = vrot.slane %v1307_v60, 2  ;;  %v1303_v36 = vrot.slane %v1302_v15, 1 }
 0x3f5   :  { %v1326_v9 = vsel %vm85_vm0, %v1232_v46, 0.0  ;;  %v1231_v13 = vmul.f32 %v1200_v2, %v4721_v0  ;;  %v1385_v18 = vsel %vm1384_vm13, %v1290_v61, %v1383_v25  ;;  %v1296_v32 = vrot.slane %v1295_v14, 1 }
 0x3f6   :  { %v1327_v7 = vrot.slane %v1326_v9, 4  ;;  %v1309_v4 = vadd.f32 %v1308_v41, %v1307_v60  ;;  %3853 = vmatprep.mubr.msk.f32.mxu1 %vm85_vm0, %v1385_v18  ;;  %v1316_v40 = vadd.f32 %v1315_v12, %v1314_v17  ;;  %v1304_v62 = vadd.f32 %v1303_v36, %v1302_v15  ;;  %v4202_v15 = vld [vmem:[%s5407_s0 + $0x8] sm:$0xff]  ;;  %v4203_v12 = vld [vmem:[%s5407_s0] sm:$0xff] }
 0x3f7   :  { %v1319_v21 = vsel %vm85_vm0, %v1231_v13, 0.0  ;;  %v1297_v54 = vadd.f32 %v1296_v32, %v1295_v14  ;;  %v3527_v13 = vld [vmem:[%s5412_s5 + $0x1] ss:$0 sm:$0xff] }
 0x3f8   :  { %v1328_v16 = vadd.f32 %v1327_v7, %v1326_v9  ;;  %v1320_v22 = vrot.slane %v1319_v21, 4  ;;  %v1310_v42 = vrot.slane %v1309_v4, 1  ;;  %v1317_v52 = vrot.slane %v1316_v40, 1 }
 0x3f9   :  { %v3844_v31 = vpop.f32.mrf.mxu1  ;;  %v1386_v51 = vsel %vm1372_vm4, %v1304_v62, %v1297_v54  ;;  %v1512_v54 = vld [vmem:[%s5410_s3 + $0x20] sm:$0xff] }
 0x3fa   :  { %v1234_v33 = vmul.f32 %v3844_v31, %v4721_v0  ;;  %v1321_v48 = vadd.f32 %v1320_v22, %v1319_v21  ;;  %v1329_v38 = vrot.slane %v1328_v16, 2  ;;  %v1311_v23 = vadd.f32 %v1310_v42, %v1309_v4 }
 0x3fb   :  { %v1210_v11 = vpop.f32.mrf.mxu1  ;;  %v1318_v27 = vadd.f32 %v1317_v52, %v1316_v40 }
 0x3fc   :  { %v1340_v47 = vsel %vm85_vm0, %v1234_v33, 0.0  ;;  %v1233_v5 = vmul.f32 %v1210_v11, %v4721_v0  ;;  %v1322_v39 = vrot.slane %v1321_v48, 2  ;;  %v1330_v3 = vadd.f32 %v1329_v38, %v1328_v16  ;;  %v1515_v33 = vld [vmem:[%s5410_s3 + $0x98] sm:$0xff] }
 0x3fd   :  { %v1341_v43 = vrot.slane %v1340_v47, 4  ;;  %v1387_v28 = vsel %vm1374_vm5, %v1311_v23, %v1386_v51  ;;  %3856 = vmatprep.subr.mxu0 %v1515_v33 }
 0x3fe   :  { %v1333_v30 = vsel %vm85_vm0, %v1233_v5, 0.0  ;;  %v1323_v29 = vadd.f32 %v1322_v39, %v1321_v48  ;;  %v1331_v56 = vrot.slane %v1330_v3, 1  ;;  %v1388_v10 = vsel %vm1376_vm7, %v1318_v27, %v1387_v28  ;;  %3857 = vmatpush3.msra.mxu0 %v1515_v33 }
 0x3ff   :  { %v1342_v26 = vadd.f32 %v1341_v43, %v1340_v47  ;;  %v1334_v45 = vrot.slane %v1333_v30, 4  ;;  %v1514_v43 = vld [vmem:[%s5410_s3 + $0x70] sm:$0xff] }
 0x400   :  { %v1324_v49 = vrot.slane %v1323_v29, 1  ;;  %v1332_v61 = vadd.f32 %v1331_v56, %v1330_v3  ;;  %3858 = vmatprep.subr.mxu0 %v1514_v43 }
 0x401   :  { %v1343_v50 = vrot.slane %v1342_v26, 2  ;;  %v1335_v8 = vadd.f32 %v1334_v45, %v1333_v30  ;;  %v1513_v30 = vld [vmem:[%s5410_s3 + $0x48] sm:$0xff]  ;;  %3859 = vmatpush3.msra.mxu0 %v1514_v43 }
 0x402   :  { %v1325_v63 = vadd.f32 %v1324_v49, %v1323_v29  ;;  %3860 = vmatprep.subr.mxu0 %v1513_v30  ;;  %v4794_v49 = vld [vmem:[%s5409_s2] sm:$0xff] }
 0x403   :  { %v1344_v0 = vadd.f32 %v1343_v50, %v1342_v26  ;;  %v1336_v6 = vrot.slane %v1335_v8, 2  ;;  %3861 = vmatpush3.msra.mxu0 %v1513_v30  ;;  %v1503_v50 = vrot.slane %v4794_v49, %v4710_v44 }
 0x404   :  { %v1389_v46 = vsel %vm1378_vm8, %v1325_v63, %v1388_v10  ;;  %3862 = vmatprep.subr.mxu0 %v1512_v54  ;;  %v1635_v10 = vld [vmem:[%s5411_s4 + $0x78] sm:$0xff] }
 0x405   :  { %v1337_v55 = vadd.f32 %v1336_v6, %v1335_v8  ;;  %v1345_v60 = vrot.slane %v1344_v0, 1  ;;  %v1390_v25 = vsel %vm1380_vm10, %v1332_v61, %v1389_v46  ;;  %3863 = vmatpush3.msra.mxu0 %v1512_v54  ;;  %v1508_v8 = vsub.s32 3, %v4337_v34  ;;  %3867 = vmatprep.subr.mxu1 %v1635_v10  ;;  %v1633_v46 = vld [vmem:[%s5411_s4 + $0x68] sm:$0xff]  ;;  %v1631_v61 = vld [vmem:[%s5411_s4 + $0x58] sm:$0xff] }
 0x407   :  { %v1338_v24 = vrot.slane %v1337_v55, 1  ;;  %v1346_v2 = vadd.f32 %v1345_v60, %v1344_v0  ;;  %v1509_v6 = vrot.slane %v4794_v49, %v1508_v8  ;;  %v1634_v60 = vld [vmem:[%s5411_s4 + $0x70] sm:$0xff] }
 0x409   :  { %v1339_v17 = vadd.f32 %v1338_v24, %v1337_v55  ;;  %v1632_v24 = vld [vmem:[%s5411_s4 + $0x60] sm:$0xff] }
 0x40b   :  { %v1391_v41 = vsel %vm1382_vm11, %v1339_v17, %v1390_v25  ;;  %v1630_v17 = vld [vmem:[%s5411_s4 + $0x50] sm:$0xff]  ;;  %v1628_v25 = vld [vmem:[%s5411_s4 + $0x40] sm:$0xff] }
 0x40c   :  { %v1392_v9 = vsel %vm1384_vm13, %v1346_v2, %v1391_v41  ;;  %v1629_v2 = vld [vmem:[%s5411_s4 + $0x48] sm:$0xff]  ;;  %v1627_v41 = vld [vmem:[%s5411_s4 + $0x38] sm:$0xff] }
 0x40d   :  { %3854 = vmatmul.mubr.msk.f32.vlgmr.msra.gmra.mxu1 %vm85_vm0, %v1392_v9  ;;  %v1626_v9 = vld [vmem:[%s5411_s4 + $0x30] sm:$0xff] }
 0x40e   :  { %3868 = vmatpush3.msra.mxu1 %v1635_v10 }
 0x40f   :  { %3869 = vmatprep.subr.mxu1 %v1634_v60 }
 0x410   :  { %3870 = vmatpush3.msra.mxu1 %v1634_v60 }
 0x411   :  { %3871 = vmatprep.subr.mxu1 %v1633_v46 }
 0x412   :  { %3872 = vmatpush3.msra.mxu1 %v1633_v46 }
 0x413   :  { %3873 = vmatprep.subr.mxu1 %v1632_v24 }
 0x414   :  { %3874 = vmatpush3.msra.mxu1 %v1632_v24 }
 0x415   :  { %3875 = vmatprep.subr.mxu1 %v1631_v61 }
 0x416   :  { %3876 = vmatpush3.msra.mxu1 %v1631_v61 }
 0x417   :  { %3877 = vmatprep.subr.mxu1 %v1630_v17 }
 0x418   :  { %3878 = vmatpush3.msra.mxu1 %v1630_v17  ;;  %v3544_v17 = vld [vmem:[%s5410_s3 + $0x120] sm:$0xff] }
 0x419   :  { %3879 = vmatprep.subr.mxu1 %v1629_v2  ;;  %1817 = vmatprep.subr.mxu0 %v3544_v17 }
 0x41a   :  { %3880 = vmatpush3.msra.mxu1 %v1629_v2  ;;  %v3543_v2 = vld [vmem:[%s5410_s3 + $0x118] sm:$0xff] }
 0x41b   :  { %3881 = vmatprep.subr.mxu1 %v1628_v25 }
 0x41c   :  { %3882 = vmatpush3.msra.mxu1 %v1628_v25  ;;  %v3541_v25 = vld [vmem:[%s5410_s3 + $0xf8] sm:$0xff] }
 0x41d   :  { %3883 = vmatprep.subr.mxu1 %v1627_v41 }
 0x41e   :  { %3884 = vmatpush3.msra.mxu1 %v1627_v41  ;;  %v3540_v41 = vld [vmem:[%s5410_s3 + $0xf0] sm:$0xff] }
 0x41f   :  { %3885 = vmatprep.subr.mxu1 %v1626_v9 }
 0x420   :  { %3886 = vmatpush3.msra.mxu1 %v1626_v9  ;;  %v3538_v9 = vld [vmem:[%s5410_s3 + $0xd0] sm:$0xff] }
 0x4cd   :  { %v3855_v14 = vpop.f32.mrf.mxu1 }
 0x4ce   :  { %v1469_v7 = vadd.f32 %v3855_v14, %v3527_v13  ;;  %v1624_v14 = vld [vmem:[%s5411_s4 + $0x20] sm:$0xff] }
 0x4cf   :  { %v1463_v18 = vpop.f32.mrf.mxu1 }
 0x4d0   :  { %v4764_v4 = vadd.f32 %v4202_v15, %v1469_v7  ;;  %v1464_v21 = vadd.f32 %v3527_v13, %v1463_v18  ;;  %v1625_v13 = vld [vmem:[%s5411_s4 + $0x28] sm:$0xff]  ;;  %v1623_v7 = vld [vmem:[%s5411_s4 + $0x18] sm:$0xff]  ;;  %v1622_v18 = vld [vmem:[%s5411_s4 + $0x10] sm:$0xff] }
 0x4d1   :  { %3887 = vmatprep.subr.mxu1 %v1625_v13  ;;  %v1621_v15 = vld [vmem:[%s5411_s4 + $0x8] sm:$0xff] }
 0x4d2   :  { %v4769_v16 = vadd.f32 %v4203_v12, %v1464_v21  ;;  %v1477_v22 = vsel %vm85_vm0, %v4764_v4, 0.0  ;;  %3888 = vmatpush3.msra.mxu1 %v1625_v13  ;;  %v1620_v21 = vld [vmem:[%s5411_s4] sm:$0xff]  ;;  %v3537_v13 = vld [vmem:[%s5410_s3 + $0xc8] sm:$0xff] }
 0x4d3   :  { %1478 = vadd.xlane.f32.xlu1 %v1477_v22  ;;  %3889 = vmatprep.subr.mxu1 %v1624_v14  ;;  %v3530_v12 = vld [vmem:[%s5412_s5 + $0x2] ss:$0 sm:$0xff] }
 0x4d4   :  { %v1474_v31 = vsel %vm85_vm0, %v4769_v16, 0.0  ;;  %3890 = vmatpush3.msra.mxu1 %v1624_v14  ;;  %v3535_v14 = vld [vmem:[%s5410_s3 + $0xa8] sm:$0xff] }
 0x4d5   :  { %1475 = vadd.xlane.f32.xlu0 %v1474_v31  ;;  %3891 = vmatprep.subr.mxu1 %v1623_v7 }
 0x4d6   :  { %3892 = vmatpush3.msra.mxu1 %v1623_v7  ;;  %v3534_v7 = vld [vmem:[%s5410_s3 + $0xa0] sm:$0xff] }
 0x4d7   :  { %3893 = vmatprep.subr.mxu1 %v1622_v18 }
 0x4d8   :  { %3894 = vmatpush3.msra.mxu1 %v1622_v18  ;;  %v3545_v18 = vld [vmem:[%s5410_s3 + $0x128] sm:$0xff] }
 0x4d9   :  { %3895 = vmatprep.subr.mxu1 %v1621_v15 }
 0x4da   :  { %3896 = vmatpush3.msra.mxu1 %v1621_v15 }
 0x4db   :  { %3897 = vmatprep.subr.mxu1 %v1620_v21 }
 0x4dc   :  { %3898 = vmatpush3.msra.mxu1 %v1620_v21 }
 0x4dd   :  { %3945 = vmatprep.subr.msk.mxu1 %vm1070_vm1, %v4461_v20 }
 0x55c   :  { %v1479_v32 = vpop.xlane.xlu1 %1478 }
 0x55d   :  { %v1481_v48 = vmul.f32 0.03125, %v1479_v32 }
 0x55e   :  { %v1476_v11 = vpop.xlane.xlu0 %1475 }
 0x55f   :  { %v1483_v36 = vsub.f32 %v4764_v4, %v1481_v48  ;;  %v1480_v42 = vmul.f32 0.03125, %v1476_v11 }
 0x561   :  { %v1482_v47 = vsub.f32 %v4769_v16, %v1480_v42  ;;  %v1485_v5 = vmul.f32 %v1483_v36, %v1483_v36 }
 0x563   :  { %v1489_v40 = vsel %vm85_vm0, %v1485_v5, 0.0  ;;  %v1484_v38 = vmul.f32 %v1482_v47, %v1482_v47 }
 0x564   :  { %1490 = vadd.xlane.f32.xlu1 %v1489_v40 }
 0x565   :  { %v1486_v39 = vsel %vm85_vm0, %v1484_v38, 0.0 }
 0x566   :  { %1487 = vadd.xlane.f32.xlu0 %v1486_v39 }
 0x5ed   :  { %v1491_v29 = vpop.xlane.xlu1 %1490 }
 0x5ee   :  { %v1493_v26 = vmul.f32 0.03125, %v1491_v29 }
 0x5ef   :  { %v1488_v62 = vpop.xlane.xlu0 %1487 }
 0x5f0   :  { %v1495_v23 = vadd.f32 1e-05, %v1493_v26  ;;  %v1492_v45 = vmul.f32 0.03125, %v1488_v62 }
 0x5f2   :  { %4113 = vrsqrt.f32 %v1495_v23  ;;  %v1494_v52 = vadd.f32 1e-05, %v1492_v45 }
 0x5f4   :  { %4115 = vrsqrt.f32 %v1494_v52 }
 0x5ff   :  { %v4114_v3 = vpop.eup %4113 }
 0x600   :  { %v1499_v51 = vmul.f32 %v4114_v3, %v1483_v36  ;;  %v3533_v3 = vld [vmem:[%s5412_s5 + $0x3] ss:$0 sm:$0xff] }
 0x601   :  { %v4116_v0 = vpop.eup %4115 }
 0x602   :  { %v1498_v28 = vmul.f32 %v4116_v0, %v1482_v47  ;;  %v1505_v63 = vmul.f32 %v1503_v50, %v1499_v51 }
 0x604   :  { %v1504_v27 = vmul.f32 %v1503_v50, %v1498_v28  ;;  %v1511_v55 = vadd.f32 %v1509_v6, %v1505_v63 }
 0x606   :  { %v1510_v56 = vadd.f32 %v1509_v6, %v1504_v27 }
 0x608   :  { %3864 = vmatprep.mubr.msk.f32.mxu0 %vm85_vm0, %v1510_v56 }
 0x609   :  { %3865 = vmatmul.mubr.msk.f32.vlgmr.msra.gmra.mxu0 %vm85_vm0, %v1511_v55 }
 0x60a   :  { %1857 = vmatprep.mubr.f32.mxu0 %v4244_v19  ;;  %1818 = vmatpush1.msra.mxu0 %v3543_v2 }
 0x60b   :  { %1819 = vmatprep.subr.mxu0 %v3541_v25 }
 0x60c   :  { %1820 = vmatpush1.msra.mxu0 %v3540_v41 }
 0x60d   :  { %1821 = vmatprep.subr.mxu0 %v3538_v9 }
 0x60e   :  { %1822 = vmatpush1.msra.mxu0 %v3537_v13 }
 0x60f   :  { %1823 = vmatprep.subr.mxu0 %v3535_v14 }
 0x610   :  { %1824 = vmatpush1.msra.mxu0 %v3534_v7 }
 0x611   :  { %3902 = vmatprep.subr.mxu0 %v3545_v18 }
 0x6c9   :  { %v3866_v22 = vpop.f32.mrf.mxu0 }
 0x6ca   :  { %v1599_v31 = vadd.f32 %v3866_v22, %v3530_v12 }
 0x6cb   :  { %v1593_v33 = vpop.f32.mrf.mxu0 }
 0x6cc   :  { %v1605_v32 = vmul.f32 0.044715, %v1599_v31  ;;  %v1594_v48 = vadd.f32 %v3530_v12, %v1593_v33  ;;  %v1603_v23 = vmul.f32 0.5, %v1599_v31 }
 0x6ce   :  { %v1607_v11 = vmul.f32 %v1605_v32, %v1599_v31  ;;  %v1604_v36 = vmul.f32 0.044715, %v1594_v48  ;;  %v1602_v26 = vmul.f32 0.5, %v1594_v48  ;;  %v1746_v32 = vsub.s32 4, %v4337_v34 }
 0x6d0   :  { %v1609_v42 = vmul.f32 %v1607_v11, %v1599_v31  ;;  %v1606_v47 = vmul.f32 %v1604_v36, %v1594_v48  ;;  %v1752_v11 = vsub.s32 5, %v4337_v34 }
 0x6d2   :  { %v1611_v5 = vadd.f32 %v1609_v42, %v1599_v31  ;;  %v1608_v40 = vmul.f32 %v1606_v47, %v1594_v48  ;;  %v1747_v47 = vrot.slane %v4794_v49, %v1746_v32 }
 0x6d4   :  { %v1610_v38 = vadd.f32 %v1608_v40, %v1594_v48  ;;  %v1613_v39 = vmul.f32 0.7978846, %v1611_v5 }
 0x6d6   :  { %v1612_v43 = vmul.f32 0.7978846, %v1610_v38  ;;  %4117 = vtanh.f32 %v1613_v39  ;;  %v1753_v38 = vrot.slane %v4794_v49, %v1752_v11  ;;  %v3536_v49 = vld [vmem:[%s5410_s3 + $0xb0] sm:$0xff] }
 0x6d8   :  { %4119 = vtanh.f32 %v1612_v43 }
 0x6e3   :  { %v4118_v30 = vpop.eup %4117 }
 0x6e4   :  { %v1617_v29 = vadd.f32 1.0, %v4118_v30  ;;  %v3542_v30 = vld [vmem:[%s5410_s3 + $0x100] sm:$0xff] }
 0x6e5   :  { %v4120_v54 = vpop.eup %4119 }
 0x6e6   :  { %v1616_v62 = vadd.f32 1.0, %v4120_v54  ;;  %v1619_v52 = vmul.f32 %v1617_v29, %v1603_v23  ;;  %v3539_v54 = vld [vmem:[%s5410_s3 + $0xd8] sm:$0xff] }
 0x6e8   :  { %v1618_v45 = vmul.f32 %v1616_v62, %v1602_v26 }
 0x6ea   :  { %3899 = vmatprep.mubr.f32.mxu1 %v1618_v45 }
 0x6eb   :  { %3900 = vmatmul.mubr.f32.vlgmr.msra.gmra.mxu1 %v1619_v52 }
 0x6ec   :  { %3946 = vmatpush3.msk.msra.mxu1 %vm1070_vm1, %v4461_v20 }
 0x7ab   :  { %v3901_v50 = vpop.f32.mrf.mxu1 }
 0x7ac   :  { %v1713_v8 = vadd.f32 %v3901_v50, %v3533_v3  ;;  %v1779_v50 = vrot.slane %v4947_v53, %v4346_v37 }
 0x7ad   :  { %v1707_v51 = vpop.f32.mrf.mxu1 }
 0x7ae   :  { %v4862_v0 = vadd.f32 %v1713_v8, %v4764_v4  ;;  %v1708_v28 = vadd.f32 %v3533_v3, %v1707_v51 }
 0x7b0   :  { %v4865_v63 = vadd.f32 %v1708_v28, %v4769_v16  ;;  %v1721_v6 = vsel %vm85_vm0, %v4862_v0, 0.0 }
 0x7b1   :  { %1722 = vadd.xlane.f32.xlu1 %v1721_v6 }
 0x7b2   :  { %v1718_v20 = vsel %vm85_vm0, %v4865_v63, 0.0 }
 0x7b3   :  { %1719 = vadd.xlane.f32.xlu0 %v1718_v20 }
 0x83a   :  { %v1723_v27 = vpop.xlane.xlu1 %1722 }
 0x83b   :  { %v1725_v56 = vmul.f32 0.03125, %v1723_v27 }
 0x83c   :  { %v1720_v55 = vpop.xlane.xlu0 %1719 }
 0x83d   :  { %v1727_v10 = vsub.f32 %v4862_v0, %v1725_v56  ;;  %v1724_v60 = vmul.f32 0.03125, %v1720_v55 }
 0x83f   :  { %v1726_v4 = vsub.f32 %v4865_v63, %v1724_v60  ;;  %v1729_v46 = vmul.f32 %v1727_v10, %v1727_v10 }
 0x841   :  { %v1733_v16 = vsel %vm85_vm0, %v1729_v46, 0.0  ;;  %v1728_v24 = vmul.f32 %v1726_v4, %v1726_v4 }
 0x842   :  { %1734 = vadd.xlane.f32.xlu1 %v1733_v16 }
 0x843   :  { %v1730_v61 = vsel %vm85_vm0, %v1728_v24, 0.0 }
 0x844   :  { %1731 = vadd.xlane.f32.xlu0 %v1730_v61 }
 0x8cb   :  { %v1735_v15 = vpop.xlane.xlu1 %1734 }
 0x8cc   :  { %v1737_v21 = vmul.f32 0.03125, %v1735_v15 }
 0x8cd   :  { %v1732_v12 = vpop.xlane.xlu0 %1731 }
 0x8ce   :  { %v1739_v22 = vadd.f32 1e-05, %v1737_v21  ;;  %v1736_v31 = vmul.f32 0.03125, %v1732_v12 }
 0x8d0   :  { %4121 = vrsqrt.f32 %v1739_v22  ;;  %v1738_v33 = vadd.f32 1e-05, %v1736_v31 }
 0x8d2   :  { %4123 = vrsqrt.f32 %v1738_v33 }
 0x8dd   :  { %v4122_v48 = vpop.eup %4121 }
 0x8de   :  { %v1743_v5 = vmul.f32 %v4122_v48, %v1727_v10 }
 0x8df   :  { %v4124_v36 = vpop.eup %4123 }
 0x8e0   :  { %v1742_v42 = vmul.f32 %v4124_v36, %v1726_v4  ;;  %v1749_v43 = vmul.f32 %v1747_v47, %v1743_v5 }
 0x8e2   :  { %v1748_v40 = vmul.f32 %v1747_v47, %v1742_v42  ;;  %v1755_v29 = vadd.f32 %v1753_v38, %v1749_v43 }
 0x8e4   :  { %v1754_v39 = vadd.f32 %v1753_v38, %v1748_v40 }
 0x8e6   :  { %3547 = vmatmul.mubr.msk.f32.vlgmr.msra.gmra.mxu0 %vm85_vm0, %v1754_v39 }
 0x8e7   :  { %3903 = vmatpush3.msra.mxu0 %v3545_v18  ;;  %1863 = vmatprep.mubr.f32.mxu0 %v4244_v19  ;;  %v5425_v19 = vmov 1.0  }
 0x8e8   :  { %3904 = vmatprep.subr.mxu0 %v3542_v30 }
 0x8e9   :  { %3905 = vmatpush3.msra.mxu0 %v3542_v30 }
 0x8ea   :  { %3548 = vmatmul.mubr.msk.f32.gmra.mxu0 %vm85_vm0, %v1755_v29  ;;  %3906 = vmatprep.subr.mxu0 %v3539_v54 }
 0x8eb   :  { %3907 = vmatpush3.msra.mxu0 %v3539_v54  ;;  %3910 = vmatprep.mubr.msk.f32.mxu0 %vm85_vm0, %v1754_v39 }
 0x8ec   :  { %3908 = vmatprep.subr.mxu0 %v3536_v49 }
 0x8ed   :  { %3909 = vmatpush3.msra.mxu0 %v3536_v49 }
 0x8ee   :  { %3911 = vmatmul.mubr.msk.f32.vlgmr.msra.gmra.mxu0 %vm85_vm0, %v1755_v29  ;;  %3913 = vmatprep.subr.msk.mxu0 %vm4360_vm3, %v5425_v19 }
 0x8ef   :  { %3914 = vmatpush3.msk.msra.mxu0 %vm4360_vm3, %v5425_v19 }
 0x8f0   :  { %3915 = vmatprep.subr.msk.mxu0 %vm4372_vm6, %v5425_v19 }
 0x8f1   :  { %3916 = vmatpush3.msk.msra.mxu0 %vm4372_vm6, %v5425_v19 }
 0x8f2   :  { %3917 = vmatprep.subr.msk.mxu0 %vm4382_vm9, %v5425_v19 }
 0x8f3   :  { %3918 = vmatpush3.msk.msra.mxu0 %vm4382_vm9, %v5425_v19 }
 0x8f4   :  { %3919 = vmatprep.subr.msk.mxu0 %vm4394_vm12, %v5425_v19 }
 0x8f5   :  { %3920 = vmatpush3.msk.msra.mxu0 %vm4394_vm12, %v5425_v19 }
 0x9a6   :  { %v1859_v26 = vpop.f32.mrf.mxu0 }
 0x9a7   :  { %v1860_v62 = vadd.f32 %v1859_v26, %v1775_v57 }
 0x9a8   :  { %v1861_v58 = vpop.f32.mrf.mxu0 }
 0x9a9   :  { %v1947_v23 = vcombine.high %v1860_v62, %v1860_v62  ;;  %v1954_v45 = vrot.slane %v1860_v62, %v4409_v1  ;;  %v1862_v60 = vadd.f32 %v1861_v58, %v1779_v50 }
 0x9aa   :  { %v1865_v8 = vpop.f32.mrf.mxu0 }
 0x9ab   :  { %v1961_v52 = vrot.slane %v1947_v23, %v4409_v1  ;;  %v1962_v3 = vcombine.high %v1954_v45, %v1954_v45  ;;  %v1970_v59 = vrot.slane %v1954_v45, %v4409_v1  ;;  %v1866_v56 = vadd.f32 %v1865_v8, %v1775_v57 }
 0x9ac   :  { %v1867_v33 = vpop.f32.mrf.mxu0 }
 0x9ad   :  { %v1984_v51 = vrot.slane %v1962_v3, %v4409_v1  ;;  %v1992_v28 = vcombine.high %v1970_v59, %v1970_v59  ;;  %v2048_v6 = vrot.slane %v1970_v59, %v4340_v35  ;;  %v1963_v20 = vcombine.high %v1961_v52, %v1961_v52 }
 0x9ae   :  { %v1977_v55 = vrot.slane %v1961_v52, %v4409_v1  ;;  %v2003_v24 = vrot.slane %v1866_v56, %v4409_v1  ;;  %v1996_v9 = vcombine.high %v1866_v56, %v1866_v56  ;;  %v1868_v47 = vadd.f32 %v1867_v33, %v1779_v50 }
 0x9af   :  { %v2052_v27 = vrot.slane %v1984_v51, %v4340_v35  ;;  %v2056_v10 = vrot.slane %v1992_v28, %v4340_v35  ;;  %v1994_v4 = vcombine.high %v1984_v51, %v1984_v51  ;;  %v2125_v46 = vmul.f32 %v2048_v6, %v1862_v60  ;;  %v4997_v51 = vpop.f32.mrf.mxu0 }
 0x9b0   :  { %v1991_v16 = vrot.slane %v1963_v20, %v4409_v1  ;;  %v1993_v2 = vcombine.high %v1977_v55, %v1977_v55  ;;  %v2064_v25 = vrot.slane %v1977_v55, %v4340_v35  ;;  %v2011_v14 = vcombine.high %v2003_v24, %v2003_v24  ;;  %v4205_v20 = vld [vmem:[%s5408_s1 + $0x8] sm:$0xff] }
 0x9b1   :  { %v2126_v61 = vmul.f32 %v2052_v27, %v1862_v60  ;;  %v2127_v17 = vmul.f32 %v2056_v10, %v1862_v60  ;;  %3921 = vmatprep.mubr.msk.f32.mxu0 %vm85_vm0, %v2125_v46  ;;  %v2060_v41 = vrot.slane %v1994_v4, %v4340_v35  ;;  %v2019_v15 = vrot.slane %v2003_v24, %v4409_v1  ;;  %v4999_v28 = vpop.f32.mrf.mxu0  ;;  %v4206_v10 = vld [vmem:[%s5408_s1] sm:$0xff]  ;;  %v4207_v24 = vld [vmem:[%s5408_s1 + $0x18] sm:$0xff] }
 0x9b2   :  { %v1995_v13 = vcombine.high %v1991_v16, %v1991_v16  ;;  %v2068_v18 = vrot.slane %v1991_v16, %v4340_v35  ;;  %v2129_v21 = vmul.f32 %v2064_v25, %v1862_v60  ;;  %v2072_v12 = vrot.slane %v1993_v2, %v4340_v35 }
 0x9b3   :  { %3922 = vmatmul.mubr.msk.f32.vlgmr.msra.gmra.mxu0 %vm85_vm0, %v2126_v61  ;;  %v2128_v7 = vmul.f32 %v2060_v41, %v1862_v60  ;;  %v2010_v22 = vrot.slane %v1996_v9, %v4409_v1  ;;  %v2033_v31 = vrot.slane %v2011_v14, %v4409_v1  ;;  %v2041_v11 = vcombine.high %v2019_v15, %v2019_v15  ;;  %v4208_v9 = vld [vmem:[%s5408_s1 + $0x10] sm:$0xff] }
 0x9b4   :  { %3924 = vmatprep.mubr.msk.f32.mxu0 %vm85_vm0, %v2127_v17  ;;  %v2130_v32 = vmul.f32 %v2068_v18, %v1862_v60  ;;  %v2076_v48 = vrot.slane %v1995_v13, %v4340_v35  ;;  %v2080_v36 = vrot.slane %v2019_v15, %v4340_v35  ;;  %v2131_v42 = vmul.f32 %v2072_v12, %v1862_v60  ;;  %v4209_v12 = vld [vmem:[%s5408_s1 + $0x28] sm:$0xff] }
 0x9b5   :  { %v2012_v5 = vcombine.high %v2010_v22, %v2010_v22  ;;  %v2043_v40 = vcombine.high %v2033_v31, %v2033_v31  ;;  %v2084_v38 = vrot.slane %v2033_v31, %v4340_v35  ;;  %v2026_v43 = vrot.slane %v2010_v22, %v4409_v1 }
 0x9b6   :  { %v2132_v39 = vmul.f32 %v2076_v48, %v1862_v60  ;;  %v2088_v30 = vrot.slane %v2041_v11, %v4340_v35  ;;  %v2133_v54 = vmul.f32 %v2080_v36, %v1868_v47 }
 0x9b7   :  { %3925 = vmatmul.mubr.msk.f32.gmra.mxu0 %vm85_vm0, %v2128_v7  ;;  %v2040_v29 = vrot.slane %v2012_v5, %v4409_v1  ;;  %v2134_v49 = vmul.f32 %v2084_v38, %v1868_v47  ;;  %v2092_v19 = vrot.slane %v2043_v40, %v4340_v35  ;;  %v2042_v57 = vcombine.high %v2026_v43, %v2026_v43 }
 0x9b8   :  { %3927 = vmatprep.mubr.msk.f32.mxu0 %vm85_vm0, %v2129_v21  ;;  %v2096_v26 = vrot.slane %v2026_v43, %v4340_v35  ;;  %v2135_v62 = vmul.f32 %v2088_v30, %v1868_v47 }
 0x9b9   :  { %v2044_v58 = vcombine.high %v2040_v29, %v2040_v29  ;;  %v2136_v23 = vmul.f32 %v2092_v19, %v1868_v47  ;;  %v2100_v45 = vrot.slane %v2040_v29, %v4340_v35  ;;  %v2104_v3 = vrot.slane %v2042_v57, %v4340_v35  ;;  %v4211_v29 = vld [vmem:[%s5408_s1 + $0x38] sm:$0xff] }
 0x9ba   :  { %v2137_v52 = vmul.f32 %v2096_v26, %v1868_v47 }
 0x9bb   :  { %3928 = vmatmul.mubr.msk.f32.gmra.mxu0 %vm85_vm0, %v2130_v32  ;;  %v2138_v1 = vmul.f32 %v2100_v45, %v1868_v47  ;;  %v2108_v59 = vrot.slane %v2044_v58, %v4340_v35  ;;  %v2139_v50 = vmul.f32 %v2104_v3, %v1868_v47  ;;  %v4212_v3 = vld [vmem:[%s5408_s1 + $0x30] sm:$0xff] }
 0x9bc   :  { %3930 = vmatprep.mubr.msk.f32.mxu0 %vm85_vm0, %v2131_v42  ;;  %v4210_v42 = vld [vmem:[%s5408_s1 + $0x20] sm:$0xff] }
 0x9bd   :  { %v2140_v8 = vmul.f32 %v2108_v59, %v1868_v47 }
 0x9bf   :  { %3931 = vmatmul.mubr.msk.f32.gmra.mxu0 %vm85_vm0, %v2132_v39 }
 0x9c0   :  { %3933 = vmatprep.mubr.msk.f32.mxu0 %vm85_vm0, %v2133_v54 }
 0x9c3   :  { %3934 = vmatmul.mubr.msk.f32.gmra.mxu0 %vm85_vm0, %v2134_v49 }
 0x9c4   :  { %3936 = vmatprep.mubr.msk.f32.mxu0 %vm85_vm0, %v2135_v62 }
 0x9c7   :  { %3937 = vmatmul.mubr.msk.f32.gmra.mxu0 %vm85_vm0, %v2136_v23 }
 0x9c8   :  { %3939 = vmatprep.mubr.msk.f32.mxu0 %vm85_vm0, %v2137_v52 }
 0x9cb   :  { %3940 = vmatmul.mubr.msk.f32.gmra.mxu0 %vm85_vm0, %v2138_v1 }
 0x9cc   :  { %3942 = vmatprep.mubr.msk.f32.mxu0 %vm85_vm0, %v2139_v50 }
 0x9cf   :  { %3943 = vmatmul.mubr.msk.f32.gmra.mxu0 %vm85_vm0, %v2140_v8 }
 0xa73   :  { %v3923_v6 = vpop.f32.mrf.mxu0 }
 0xa74   :  { %v2335_v27 = vadd.f32 %v4205_v20, %v3923_v6 }
 0xa75   :  { %v2255_v56 = vpop.f32.mrf.mxu0 }
 0xa76   :  { %v2357_v55 = vsel %vm717_vm2, %v2335_v27, -inf  ;;  %v5008_v60 = vadd.f32 %v4206_v10, %v2255_v56 }
 0xa77   :  { %v2358_v4 = vrot.slane %v2357_v55, 4  ;;  %v3926_v46 = vpop.f32.mrf.mxu0 }
 0xa78   :  { %v2350_v16 = vsel %vm717_vm2, %v5008_v60, -inf  ;;  %v5015_v61 = vadd.f32 %v4207_v24, %v3926_v46 }
 0xa79   :  { %v2359_v17 = vmax.f32 %v2357_v55, %v2358_v4  ;;  %v2351_v2 = vrot.slane %v2350_v16, 4  ;;  %v2265_v25 = vpop.f32.mrf.mxu0 }
 0xa7a   :  { %v2371_v41 = vsel %vm717_vm2, %v5015_v61, -inf  ;;  %v5022_v13 = vadd.f32 %v4208_v9, %v2265_v25 }
 0xa7b   :  { %v2360_v14 = vrot.slane %v2359_v17, 2  ;;  %v2352_v7 = vmax.f32 %v2350_v16, %v2351_v2  ;;  %v2372_v18 = vrot.slane %v2371_v41, 4  ;;  %v3929_v15 = vpop.f32.mrf.mxu0 }
 0xa7c   :  { %v2364_v21 = vsel %vm717_vm2, %v5022_v13, -inf  ;;  %v5029_v22 = vadd.f32 %v4209_v12, %v3929_v15 }
 0xa7d   :  { %v2361_v31 = vmax.f32 %v2359_v17, %v2360_v14  ;;  %v2353_v33 = vrot.slane %v2352_v7, 2  ;;  %v2373_v32 = vmax.f32 %v2371_v41, %v2372_v18  ;;  %v2365_v48 = vrot.slane %v2364_v21, 4  ;;  %v2275_v11 = vpop.f32.mrf.mxu0 }
 0xa7e   :  { %v2385_v36 = vsel %vm717_vm2, %v5029_v22, -inf  ;;  %v5036_v47 = vadd.f32 %v4210_v42, %v2275_v11 }
 0xa7f   :  { %v2362_v5 = vrot.slane %v2361_v31, 1  ;;  %v2354_v40 = vmax.f32 %v2352_v7, %v2353_v33  ;;  %v2374_v38 = vrot.slane %v2373_v32, 2  ;;  %v2366_v39 = vmax.f32 %v2364_v21, %v2365_v48  ;;  %v3932_v43 = vpop.f32.mrf.mxu0  ;;  %v4213_v48 = vld [vmem:[%s5408_s1 + $0x48] sm:$0xff] }
 0xa80   :  { %v2386_v30 = vrot.slane %v2385_v36, 4  ;;  %v2378_v54 = vsel %vm717_vm2, %v5036_v47, -inf  ;;  %v5043_v49 = vadd.f32 %v4211_v29, %v3932_v43 }
 0xa81   :  { %v2363_v19 = vmax.f32 %v2361_v31, %v2362_v5  ;;  %v2355_v57 = vrot.slane %v2354_v40, 1  ;;  %v2375_v26 = vmax.f32 %v2373_v32, %v2374_v38  ;;  %v2367_v62 = vrot.slane %v2366_v39, 2  ;;  %v2285_v58 = vpop.f32.mrf.mxu0 }
 0xa82   :  { %v2387_v23 = vmax.f32 %v2385_v36, %v2386_v30  ;;  %v2379_v45 = vrot.slane %v2378_v54, 4  ;;  %v2399_v52 = vsel %vm717_vm2, %v5043_v49, -inf  ;;  %v5050_v1 = vadd.f32 %v4212_v3, %v2285_v58 }
 0xa83   :  { %v2463_v59 = vsub.f32 %v2335_v27, %v2363_v19  ;;  %v2356_v50 = vmax.f32 %v2354_v40, %v2355_v57  ;;  %v2376_v8 = vrot.slane %v2375_v26, 1  ;;  %v2368_v6 = vmax.f32 %v2366_v39, %v2367_v62  ;;  %v3935_v20 = vpop.f32.mrf.mxu0  ;;  %v4214_v39 = vld [vmem:[%s5408_s1 + $0x40] sm:$0xff]  ;;  %v4215_v62 = vld [vmem:[%s5408_s1 + $0x58] sm:$0xff] }
 0xa84   :  { %v2388_v56 = vrot.slane %v2387_v23, 2  ;;  %v2380_v55 = vmax.f32 %v2378_v54, %v2379_v45  ;;  %v2400_v10 = vrot.slane %v2399_v52, 4  ;;  %v2392_v4 = vsel %vm717_vm2, %v5050_v1, -inf }
 0xa85   :  { %v2480_v46 = vmul.f32 1.442695, %v2463_v59  ;;  %v2462_v16 = vsub.f32 %v5008_v60, %v2356_v50  ;;  %v2377_v24 = vmax.f32 %v2375_v26, %v2376_v8  ;;  %v2369_v17 = vrot.slane %v2368_v6, 1  ;;  %v2295_v2 = vpop.f32.mrf.mxu0  ;;  %v4216_v8 = vld [vmem:[%s5408_s1 + $0x50] sm:$0xff] }
 0xa86   :  { %v2389_v25 = vmax.f32 %v2387_v23, %v2388_v56  ;;  %v2381_v41 = vrot.slane %v2380_v55, 2  ;;  %v2401_v9 = vmax.f32 %v2399_v52, %v2400_v10  ;;  %v2393_v27 = vrot.slane %v2392_v4, 4 }
 0xa87   :  { %4125 = vpow2.f32 %v2480_v46  ;;  %v2478_v14 = vmul.f32 1.442695, %v2462_v16  ;;  %v2465_v7 = vsub.f32 %v5015_v61, %v2377_v24  ;;  %v2370_v18 = vmax.f32 %v2368_v6, %v2369_v17  ;;  %v3938_v33 = vpop.f32.mrf.mxu0 }
 0xa88   :  { %v2390_v15 = vrot.slane %v2389_v25, 1  ;;  %v2382_v21 = vmax.f32 %v2380_v55, %v2381_v41  ;;  %v2402_v12 = vrot.slane %v2401_v9, 2  ;;  %v2394_v31 = vmax.f32 %v2392_v4, %v2393_v27 }
 0xa89   :  { %4127 = vpow2.f32 %v2478_v14  ;;  %v2484_v32 = vmul.f32 1.442695, %v2465_v7  ;;  %v2464_v60 = vsub.f32 %v5022_v13, %v2370_v18  ;;  %v5060_v11 = vadd.f32 %v4213_v48, %v3935_v20  ;;  %v2305_v19 = vpop.f32.mrf.mxu0  ;;  %v4217_v7 = vld [vmem:[%s5408_s1 + $0x68] sm:$0xff] }
 0xa8a   :  { %v2391_v36 = vmax.f32 %v2389_v25, %v2390_v15  ;;  %v2383_v42 = vrot.slane %v2382_v21, 1  ;;  %v2403_v5 = vmax.f32 %v2401_v9, %v2402_v12  ;;  %v2395_v61 = vrot.slane %v2394_v31, 2 }
 0xa8b   :  { %4129 = vpow2.f32 %v2484_v32  ;;  %v2482_v40 = vmul.f32 1.442695, %v2464_v60  ;;  %v2413_v38 = vsel %vm717_vm2, %v5060_v11, -inf  ;;  %v5067_v13 = vadd.f32 %v4214_v39, %v2295_v2  ;;  %v3941_v16 = vpop.f32.mrf.mxu0 }
 0xa8c   :  { %v2467_v43 = vsub.f32 %v5029_v22, %v2391_v36  ;;  %v2384_v30 = vmax.f32 %v2382_v21, %v2383_v42  ;;  %v2404_v54 = vrot.slane %v2403_v5, 1  ;;  %v2396_v29 = vmax.f32 %v2394_v31, %v2395_v61 }
 0xa8d   :  { %4131 = vpow2.f32 %v2482_v40  ;;  %v2414_v57 = vrot.slane %v2413_v38, 4  ;;  %v2406_v26 = vsel %vm717_vm2, %v5067_v13, -inf  ;;  %v5075_v58 = vadd.f32 %v4215_v62, %v3938_v33 }
 0xa8e   :  { %v2488_v23 = vmul.f32 1.442695, %v2467_v43  ;;  %v2466_v45 = vsub.f32 %v5036_v47, %v2384_v30  ;;  %v2405_v52 = vmax.f32 %v2403_v5, %v2404_v54  ;;  %v2397_v22 = vrot.slane %v2396_v29, 1 }
 0xa8f   :  { %v2415_v3 = vmax.f32 %v2413_v38, %v2414_v57  ;;  %v2407_v59 = vrot.slane %v2406_v26, 4  ;;  %v2427_v50 = vsel %vm717_vm2, %v5075_v58, -inf  ;;  %v5083_v6 = vadd.f32 %v4216_v8, %v2305_v19 }
 0xa90   :  { %4133 = vpow2.f32 %v2488_v23  ;;  %v2486_v20 = vmul.f32 1.442695, %v2466_v45  ;;  %v2469_v56 = vsub.f32 %v5043_v49, %v2405_v52  ;;  %v2398_v55 = vmax.f32 %v2396_v29, %v2397_v22 }
 0xa91   :  { %v2416_v10 = vrot.slane %v2415_v3, 2  ;;  %v2408_v47 = vmax.f32 %v2406_v26, %v2407_v59  ;;  %v2428_v4 = vrot.slane %v2427_v50, 4  ;;  %v2420_v46 = vsel %vm717_vm2, %v5083_v6, -inf }
 0xa92   :  { %4135 = vpow2.f32 %v2486_v20  ;;  %v2492_v24 = vmul.f32 1.442695, %v2469_v56  ;;  %v2468_v17 = vsub.f32 %v5050_v1, %v2398_v55  ;;  %v2421_v2 = vrot.slane %v2420_v46, 4 }
 0xa93   :  { %v2417_v25 = vmax.f32 %v2415_v3, %v2416_v10  ;;  %v2409_v41 = vrot.slane %v2408_v47, 2  ;;  %v2429_v9 = vmax.f32 %v2427_v50, %v2428_v4  ;;  %v5094_v18 = vadd.f32 %v4217_v7, %v3941_v16 }
 0xa94   :  { %v5089_v27 = vpop.eup %4125  ;;  %4137 = vpow2.f32 %v2492_v24  ;;  %v2490_v49 = vmul.f32 1.442695, %v2468_v17  ;;  %v2422_v14 = vmax.f32 %v2420_v46, %v2421_v2 }
 0xa95   :  { %v2517_v15 = vsel %vm717_vm2, %v5089_v27, 0.0  ;;  %v2418_v21 = vrot.slane %v2417_v25, 1  ;;  %v2410_v1 = vmax.f32 %v2408_v47, %v2409_v41  ;;  %v2430_v12 = vrot.slane %v2429_v9, 2 }
 0xa96   :  { %v5098_v31 = vpop.eup %4127  ;;  %v2518_v33 = vrot.slane %v2517_v15, 4  ;;  %4139 = vpow2.f32 %v2490_v49  ;;  %v2423_v32 = vrot.slane %v2422_v14, 2  ;;  %v2441_v39 = vsel %vm717_vm2, %v5094_v18, -inf }
 0xa97   :  { %v2510_v60 = vsel %vm717_vm2, %v5098_v31, 0.0  ;;  %v2419_v48 = vmax.f32 %v2417_v25, %v2418_v21  ;;  %v2411_v36 = vrot.slane %v2410_v1, 1  ;;  %v2431_v42 = vmax.f32 %v2429_v9, %v2430_v12  ;;  %v4218_v9 = vld [vmem:[%s5408_s1 + $0x60] sm:$0xff] }
 0xa98   :  { %v5102_v5 = vpop.eup %4129  ;;  %v2519_v61 = vadd.f32 %v2518_v33, %v2517_v15  ;;  %v2511_v40 = vrot.slane %v2510_v60, 4  ;;  %v2424_v38 = vmax.f32 %v2422_v14, %v2423_v32  ;;  %v2442_v20 = vrot.slane %v2441_v39, 4 }
 0xa99   :  { %v2531_v43 = vsel %vm717_vm2, %v5102_v5, 0.0  ;;  %v2471_v30 = vsub.f32 %v5060_v11, %v2419_v48  ;;  %v2412_v54 = vmax.f32 %v2410_v1, %v2411_v36  ;;  %v2432_v29 = vrot.slane %v2431_v42, 1  ;;  %v2315_v11 = vpop.f32.mrf.mxu0 }
 0xa9a   :  { %v5109_v19 = vpop.eup %4131  ;;  %v2520_v57 = vrot.slane %v2519_v61, 2  ;;  %v2512_v26 = vadd.f32 %v2511_v40, %v2510_v60  ;;  %v2532_v62 = vrot.slane %v2531_v43, 4  ;;  %v2425_v23 = vrot.slane %v2424_v38, 1 }
 0xa9b   :  { %v2524_v45 = vsel %vm717_vm2, %v5109_v19, 0.0  ;;  %v2496_v52 = vmul.f32 1.442695, %v2471_v30  ;;  %v2470_v22 = vsub.f32 %v5067_v13, %v2412_v54  ;;  %v2433_v3 = vmax.f32 %v2431_v42, %v2432_v29  ;;  %v3944_v49 = vpop.f32.mrf.mxu0 }
 0xa9c   :  { %v2521_v59 = vadd.f32 %v2520_v57, %v2519_v61  ;;  %v2533_v50 = vadd.f32 %v2532_v62, %v2531_v43  ;;  %v2525_v8 = vrot.slane %v2524_v45, 4  ;;  %v2426_v47 = vmax.f32 %v2424_v38, %v2425_v23 }
 0xa9d   :  { %v5114_v56 = vpop.eup %4133  ;;  %4141 = vpow2.f32 %v2496_v52  ;;  %v2494_v55 = vmul.f32 1.442695, %v2470_v22  ;;  %v2473_v10 = vsub.f32 %v5075_v58, %v2433_v3  ;;  %v2513_v46 = vrot.slane %v2512_v26, 2  ;;  %v2325_v43 = vpop.f32.mrf.mxu0 }
 0xa9e   :  { %v2522_v4 = vrot.slane %v2521_v59, 1  ;;  %v2534_v16 = vrot.slane %v2533_v50, 2  ;;  %v2526_v24 = vadd.f32 %v2525_v8, %v2524_v45  ;;  %v2545_v13 = vsel %vm717_vm2, %v5114_v56, 0.0 }
 0xa9f   :  { %v5117_v17 = vpop.eup %4135  ;;  %4143 = vpow2.f32 %v2494_v55  ;;  %v2500_v2 = vmul.f32 1.442695, %v2473_v10  ;;  %v2472_v25 = vsub.f32 %v5083_v6, %v2426_v47  ;;  %v5125_v58 = vadd.f32 %v4218_v9, %v2315_v11 }
 0xaa0   :  { %v2527_v41 = vrot.slane %v2526_v24, 2  ;;  %v2546_v7 = vrot.slane %v2545_v13, 4  ;;  %v2538_v15 = vsel %vm717_vm2, %v5117_v17, 0.0  ;;  %v2523_v1 = vadd.f32 %v2522_v4, %v2521_v59  ;;  %v4220_v59 = vld [vmem:[%s5408_s1 + $0x70] sm:$0xff] }
 0xaa1   :  { %v5127_v14 = vpop.eup %4137  ;;  %4145 = vpow2.f32 %v2500_v2  ;;  %v2498_v21 = vmul.f32 1.442695, %v2472_v25  ;;  %v2514_v12 = vadd.f32 %v2513_v46, %v2512_v26  ;;  %v5131_v33 = vadd.f32 %v2534_v16, %v2533_v50 }
 0xaa2   :  { %v2539_v6 = vrot.slane %v2538_v15, 4  ;;  %v2547_v60 = vadd.f32 %v2546_v7, %v2545_v13  ;;  %v2559_v48 = vsel %vm717_vm2, %v5127_v14, 0.0  ;;  %v2443_v36 = vmax.f32 %v2441_v39, %v2442_v20  ;;  %v4219_v39 = vld [vmem:[%s5408_s1 + $0x78] sm:$0xff] }
 0xaa3   :  { %v5133_v32 = vpop.eup %4139  ;;  %4147 = vpow2.f32 %v2498_v21  ;;  %v5137_v42 = vadd.f32 %v2527_v41, %v2526_v24  ;;  %v2560_v40 = vrot.slane %v2559_v48, 4  ;;  %v2434_v57 = vsel %vm717_vm2, %v5125_v58, -inf }
 0xaa4   :  { %v2540_v61 = vadd.f32 %v2539_v6, %v2538_v15  ;;  %v2552_v38 = vsel %vm717_vm2, %v5133_v32, 0.0  ;;  %v2548_v30 = vrot.slane %v2547_v60, 2  ;;  %v2444_v29 = vrot.slane %v2443_v36, 2 }
 0xaa5   :  { %v2553_v54 = vrot.slane %v2552_v38, 4  ;;  %v2561_v62 = vadd.f32 %v2560_v40, %v2559_v48  ;;  %v2435_v23 = vrot.slane %v2434_v57, 4  ;;  %v5146_v45 = vadd.f32 %v4219_v39, %v3944_v49 }
 0xaa6   :  { %v2541_v26 = vrot.slane %v2540_v61, 2  ;;  %v2515_v52 = vrot.slane %v2514_v12, 1  ;;  %v5148_v22 = vadd.f32 %v2548_v30, %v2547_v60  ;;  %v2445_v3 = vmax.f32 %v2443_v36, %v2444_v29 }
 0xaa7   :  { %v5153_v50 = vadd.f32 %v4220_v59, %v2325_v43  ;;  %4149 = vrcp.f32 %v2523_v1  ;;  %v2554_v8 = vadd.f32 %v2553_v54, %v2552_v38  ;;  %v2436_v20 = vmax.f32 %v2434_v57, %v2435_v23 }
 0xaa8   :  { %v2455_v11 = vsel %vm717_vm2, %v5146_v45, -inf  ;;  %v2536_v55 = vrot.slane %v5131_v33, 1  ;;  %v2562_v10 = vrot.slane %v2561_v62, 2  ;;  %v2446_v47 = vrot.slane %v2445_v3, 1 }
 0xaa9   :  { %v2456_v4 = vrot.slane %v2455_v11, 4  ;;  %v2529_v16 = vrot.slane %v5137_v42, 1  ;;  %v2542_v24 = vadd.f32 %v2541_v26, %v2540_v61  ;;  %v2437_v13 = vrot.slane %v2436_v20, 2 }
 0xaaa   :  { %v5158_v46 = vpop.eup %4141  ;;  %v2448_v2 = vsel %vm717_vm2, %v5153_v50, -inf  ;;  %v2550_v25 = vrot.slane %v5148_v22, 1  ;;  %v2447_v9 = vmax.f32 %v2445_v3, %v2446_v47  ;;  %v2555_v15 = vrot.slane %v2554_v8, 2 }
 0xaab   :  { %v2573_v41 = vsel %vm717_vm2, %v5158_v46, 0.0  ;;  %v2457_v49 = vmax.f32 %v2455_v11, %v2456_v4  ;;  %v2438_v1 = vmax.f32 %v2436_v20, %v2437_v13  ;;  %v2449_v6 = vrot.slane %v2448_v2, 4 }
 0xaac   :  { %v5166_v7 = vpop.eup %4143  ;;  %v2574_v21 = vrot.slane %v2573_v41, 4  ;;  %v2563_v60 = vadd.f32 %v2562_v10, %v2561_v62  ;;  %v2475_v36 = vsub.f32 %v5094_v18, %v2447_v9  ;;  %v2516_v23 = vadd.f32 %v2515_v52, %v2514_v12 }
 0xaad   :  { %v2566_v48 = vsel %vm717_vm2, %v5166_v7, 0.0  ;;  %v2458_v61 = vrot.slane %v2457_v49, 2  ;;  %v2439_v30 = vrot.slane %v2438_v1, 1  ;;  %v2450_v54 = vmax.f32 %v2448_v2, %v2449_v6 }
 0xaae   :  { %v5171_v40 = vpop.eup %4145  ;;  %v2575_v38 = vadd.f32 %v2574_v21, %v2573_v41  ;;  %v2567_v43 = vrot.slane %v2566_v48, 4  ;;  %v2504_v57 = vmul.f32 1.442695, %v2475_v36  ;;  %v2556_v62 = vadd.f32 %v2555_v15, %v2554_v8 }
 0xaaf   :  { %v2587_v29 = vsel %vm717_vm2, %v5171_v40, 0.0  ;;  %v2459_v26 = vmax.f32 %v2457_v49, %v2458_v61  ;;  %v2440_v20 = vmax.f32 %v2438_v1, %v2439_v30  ;;  %v2451_v10 = vrot.slane %v2450_v54, 2 }
 0xab0   :  { %v5175_v39 = vpop.eup %4147  ;;  %v2568_v3 = vadd.f32 %v2567_v43, %v2566_v48  ;;  %v2588_v59 = vrot.slane %v2587_v29, 4  ;;  %4151 = vpow2.f32 %v2504_v57  ;;  %v2576_v47 = vrot.slane %v2575_v38, 2 }
 0xab1   :  { %v2580_v18 = vsel %vm717_vm2, %v5175_v39, 0.0  ;;  %v2460_v11 = vrot.slane %v2459_v26, 1  ;;  %v2474_v41 = vsub.f32 %v5125_v58, %v2440_v20  ;;  %v2452_v12 = vmax.f32 %v2450_v54, %v2451_v10 }
 0xab2   :  { %v2569_v4 = vrot.slane %v2568_v3, 2  ;;  %v2589_v13 = vadd.f32 %v2588_v59, %v2587_v29  ;;  %v2581_v2 = vrot.slane %v2580_v18, 4  ;;  %4153 = vrcp.f32 %v2516_v23 }
 0xab3   :  { %v2461_v9 = vmax.f32 %v2459_v26, %v2460_v11  ;;  %v2543_v52 = vrot.slane %v2542_v24, 1  ;;  %v2564_v8 = vrot.slane %v2563_v60, 1  ;;  %v2557_v1 = vrot.slane %v2556_v62, 1 }
 0xab4   :  { %v2570_v49 = vadd.f32 %v2569_v4, %v2568_v3  ;;  %v2582_v15 = vadd.f32 %v2581_v2, %v2580_v18  ;;  %v4150_v21 = vpop.eup %4149  ;;  %v2502_v6 = vmul.f32 1.442695, %v2474_v41  ;;  %v2453_v36 = vrot.slane %v2452_v12, 1 }
 0xab5   :  { %v2477_v48 = vsub.f32 %v5146_v45, %v2461_v9  ;;  %v2577_v61 = vadd.f32 %v2576_v47, %v2575_v38  ;;  %v2590_v43 = vrot.slane %v2589_v13, 2  ;;  %v2530_v29 = vadd.f32 %v2529_v16, %v5137_v42 }
 0xab6   :  { %v2583_v30 = vrot.slane %v2582_v15, 2  ;;  %4155 = vpow2.f32 %v2502_v6  ;;  %v2454_v57 = vmax.f32 %v2452_v12, %v2453_v36  ;;  %v2537_v54 = vadd.f32 %v2536_v55, %v5131_v33 }
 0xab7   :  { %v2508_v58 = vmul.f32 1.442695, %v2477_v48  ;;  %v2571_v26 = vrot.slane %v2570_v49, 1  ;;  %4157 = vrcp.f32 %v2530_v29  ;;  %v2544_v3 = vadd.f32 %v2543_v52, %v2542_v24 }
 0xab8   :  { %v2584_v23 = vadd.f32 %v2583_v30, %v2582_v15  ;;  %v2476_v45 = vsub.f32 %v5153_v50, %v2454_v57  ;;  %v2551_v38 = vadd.f32 %v2550_v25, %v5148_v22  ;;  %v2558_v59 = vadd.f32 %v2557_v1, %v2556_v62 }
 0xab9   :  { %4159 = vpow2.f32 %v2508_v58  ;;  %v2565_v16 = vadd.f32 %v2564_v8, %v2563_v60  ;;  %v2578_v18 = vrot.slane %v2577_v61, 1  ;;  %v2591_v11 = vadd.f32 %v2590_v43, %v2589_v13 }
 0xaba   :  { %4161 = vrcp.f32 %v2537_v54  ;;  %v2585_v20 = vrot.slane %v2584_v23, 1  ;;  %v2506_v42 = vmul.f32 1.442695, %v2476_v45  ;;  %v2572_v10 = vadd.f32 %v2571_v26, %v2570_v49 }
 0xabb   :  { %4163 = vrcp.f32 %v2544_v3  ;;  %v2592_v24 = vrot.slane %v2591_v11, 1  ;;  %v2579_v62 = vadd.f32 %v2578_v18, %v2577_v61  ;;  %v2639_v4 = vmul.f32 %v4150_v21, %v5089_v27 }
 0xabc   :  { %4165 = vrcp.f32 %v2551_v38  ;;  %v2586_v50 = vadd.f32 %v2585_v20, %v2584_v23 }
 0xabd   :  { %4167 = vpow2.f32 %v2506_v42  ;;  %v5187_v33 = vpop.eup %4151  ;;  %v2593_v41 = vadd.f32 %v2592_v24, %v2591_v11 }
 0xabe   :  { %4169 = vrcp.f32 %v2558_v59  ;;  %v2601_v55 = vsel %vm717_vm2, %v5187_v33, 0.0 }
 0xabf   :  { %4171 = vrcp.f32 %v2565_v16  ;;  %v4154_v22 = vpop.eup %4153  ;;  %v2602_v25 = vrot.slane %v2601_v55, 4 }
 0xac0   :  { %4173 = vrcp.f32 %v2572_v10  ;;  %v2638_v60 = vmul.f32 %v4154_v22, %v5098_v31 }
 0xac1   :  { %v2603_v47 = vadd.f32 %v2602_v25, %v2601_v55  ;;  %4175 = vrcp.f32 %v2586_v50 }
 0xac2   :  { %3947 = vmatprep.mubr.msk.f32.mxu1 %vm717_vm2, %v2638_v60  ;;  %4177 = vrcp.f32 %v2579_v62 }
 0xac3   :  { %v5194_v13 = vpop.eup %4155  ;;  %v2604_v2 = vrot.slane %v2603_v47, 2  ;;  %3948 = vmatmul.mubr.msk.f32.vlgmr.msra.gmra.mxu1 %vm717_vm2, %v2639_v4  ;;  %4179 = vrcp.f32 %v2593_v41 }
 0xac4   :  { %v4158_v9 = vpop.eup %4157  ;;  %v2594_v12 = vsel %vm717_vm2, %v5194_v13, 0.0 }
 0xac5   :  { %v2605_v31 = vadd.f32 %v2604_v2, %v2603_v47  ;;  %v2595_v8 = vrot.slane %v2594_v12, 4  ;;  %v2640_v27 = vmul.f32 %v4158_v9, %v5109_v19 }
 0xac6   :  { %v5199_v52 = vpop.eup %4159 }
 0xac7   :  { %v4162_v49 = vpop.eup %4161  ;;  %v2615_v15 = vsel %vm717_vm2, %v5199_v52, 0.0  ;;  %v2596_v1 = vadd.f32 %v2595_v8, %v2594_v12  ;;  %3950 = vmatprep.mubr.msk.f32.mxu1 %vm717_vm2, %v2640_v27  ;;  %v2606_v61 = vrot.slane %v2605_v31, 1 }
 0xac8   :  { %v4164_v21 = vpop.eup %4163  ;;  %v2616_v6 = vrot.slane %v2615_v15, 4  ;;  %v2641_v48 = vmul.f32 %v4162_v49, %v5102_v5 }
 0xac9   :  { %v4166_v36 = vpop.eup %4165  ;;  %v2642_v43 = vmul.f32 %v4164_v21, %v5117_v17  ;;  %v2597_v29 = vrot.slane %v2596_v1, 2  ;;  %v2607_v17 = vadd.f32 %v2606_v61, %v2605_v31  ;;  %v1783_v31 = vrot.slane %v4947_v53, %v4710_v44 }
 0xaca   :  { %v4168_v30 = vpop.eup %4167  ;;  %v2617_v58 = vadd.f32 %v2616_v6, %v2615_v15  ;;  %3951 = vmatmul.mubr.msk.f32.gmra.mxu1 %vm717_vm2, %v2641_v48  ;;  %v2643_v54 = vmul.f32 %v4166_v36, %v5114_v56 }
 0xacb   :  { %v4170_v19 = vpop.eup %4169  ;;  %v2608_v57 = vsel %vm717_vm2, %v4168_v30, 0.0  ;;  %3953 = vmatprep.mubr.msk.f32.mxu1 %vm717_vm2, %v2642_v43  ;;  %v2598_v23 = vadd.f32 %v2597_v29, %v2596_v1  ;;  %4181 = vrcp.f32 %v2607_v17  ;;  %v1937_v8 = vadd.f32 %v4999_v28, %v1783_v31 }
 0xacc   :  { %v4172_v26 = vpop.eup %4171  ;;  %v2618_v5 = vrot.slane %v2617_v58, 2  ;;  %v2609_v3 = vrot.slane %v2608_v57, 4  ;;  %v2644_v45 = vmul.f32 %v4170_v19, %v5133_v32 }
 0xacd   :  { %v4174_v38 = vpop.eup %4173  ;;  %v2599_v59 = vrot.slane %v2598_v23, 1  ;;  %v2645_v10 = vmul.f32 %v4172_v26, %v5127_v14 }
 0xace   :  { %v2619_v20 = vadd.f32 %v2618_v5, %v2617_v58  ;;  %v2610_v42 = vadd.f32 %v2609_v3, %v2608_v57  ;;  %3954 = vmatmul.mubr.msk.f32.gmra.mxu1 %vm717_vm2, %v2643_v54  ;;  %v2646_v16 = vmul.f32 %v4174_v38, %v5166_v7  ;;  %v4176_v18 = vpop.eup %4175 }
 0xacf   :  { %3956 = vmatprep.mubr.msk.f32.mxu1 %vm717_vm2, %v2644_v45  ;;  %v2600_v55 = vadd.f32 %v2599_v59, %v2598_v23  ;;  %v4178_v50 = vpop.eup %4177  ;;  %v2648_v22 = vmul.f32 %v4176_v18, %v5175_v39 }
 0xad0   :  { %v2620_v11 = vrot.slane %v2619_v20, 1  ;;  %v2611_v56 = vrot.slane %v2610_v42, 2  ;;  %v2647_v7 = vmul.f32 %v4178_v50, %v5158_v46  ;;  %v4180_v62 = vpop.eup %4179  ;;  %v5253_v50 = vadd.f32 %v4997_v51, %v1783_v31 }
 0xad1   :  { %4183 = vrcp.f32 %v2600_v55  ;;  %v2649_v14 = vmul.f32 %v4180_v62, %v5171_v40  ;;  %v3591_v40 = vld [vmem:[%s5410_s3 + $0x130] sm:$0xff] }
 0xad2   :  { %v2612_v32 = vadd.f32 %v2611_v56, %v2610_v42  ;;  %3957 = vmatmul.mubr.msk.f32.gmra.mxu1 %vm717_vm2, %v2645_v10  ;;  %v2621_v24 = vadd.f32 %v2620_v11, %v2619_v20  ;;  %3971 = vmatprep.subr.mxu0 %v3591_v40 }
 0xad3   :  { %3959 = vmatprep.mubr.msk.f32.mxu1 %vm717_vm2, %v2646_v16  ;;  %3972 = vmatpush3.msra.mxu0 %v3591_v40 }
 0xad4   :  { %v2613_v25 = vrot.slane %v2612_v32, 1  ;;  %4185 = vrcp.f32 %v2621_v24 }
 0xad6   :  { %3960 = vmatmul.mubr.msk.f32.gmra.mxu1 %vm717_vm2, %v2647_v7  ;;  %v2614_v60 = vadd.f32 %v2613_v25, %v2612_v32 }
 0xad7   :  { %3962 = vmatprep.mubr.msk.f32.mxu1 %vm717_vm2, %v2648_v22 }
 0xad8   :  { %4187 = vrcp.f32 %v2614_v60  ;;  %v4182_v47 = vpop.eup %4181 }
 0xad9   :  { %v2651_v2 = vmul.f32 %v4182_v47, %v5187_v33  ;;  %v3590_v33 = vld [vmem:[%s5410_s3 + $0x108] sm:$0xff] }
 0xada   :  { %3963 = vmatmul.mubr.msk.f32.gmra.mxu1 %vm717_vm2, %v2649_v14  ;;  %3973 = vmatprep.subr.mxu0 %v3590_v33 }
 0xadb   :  { %3974 = vmatpush3.msra.mxu0 %v3590_v33 }
 0xade   :  { %v4184_v4 = vpop.eup %4183 }
 0xadf   :  { %v2650_v39 = vmul.f32 %v4184_v4, %v5194_v13  ;;  %v3589_v13 = vld [vmem:[%s5410_s3 + $0xe0] sm:$0xff] }
 0xae0   :  { %3975 = vmatprep.subr.mxu0 %v3589_v13 }
 0xae1   :  { %3965 = vmatprep.mubr.msk.f32.mxu1 %vm717_vm2, %v2650_v39  ;;  %v4186_v46 = vpop.eup %4185  ;;  %3976 = vmatpush3.msra.mxu0 %v3589_v13 }
 0xae2   :  { %3966 = vmatmul.mubr.msk.f32.gmra.mxu1 %vm717_vm2, %v2651_v2  ;;  %v2653_v12 = vmul.f32 %v4186_v46, %v5199_v52  ;;  %v3588_v52 = vld [vmem:[%s5410_s3 + $0xb8] sm:$0xff] }
 0xae3   :  { %3977 = vmatprep.subr.mxu0 %v3588_v52 }
 0xae4   :  { %3978 = vmatpush3.msra.mxu0 %v3588_v52 }
 0xae5   :  { %v4188_v41 = vpop.eup %4187 }
 0xae6   :  { %v2652_v9 = vmul.f32 %v4188_v41, %v4168_v30 }
 0xae8   :  { %3968 = vmatprep.mubr.msk.f32.mxu1 %vm717_vm2, %v2652_v9 }
 0xae9   :  { %3969 = vmatmul.mubr.msk.f32.gmra.mxu1 %vm717_vm2, %v2653_v12 }
 0xb83   :  { %v3949_v27 = vpop.f32.mrf.mxu1 }
 0xb84   :  { %v2848_v49 = vmul.f32 %v3949_v27, %v1937_v8 }
 0xb85   :  { %v2768_v15 = vpop.f32.mrf.mxu1 }
 0xb86   :  { %v2870_v21 = vsel %vm85_vm0, %v2848_v49, 0.0  ;;  %v2847_v1 = vmul.f32 %v2768_v15, %v1937_v8 }
 0xb87   :  { %v2871_v6 = vrot.slane %v2870_v21, 4 }
 0xb88   :  { %v2863_v48 = vsel %vm85_vm0, %v2847_v1, 0.0 }
 0xb89   :  { %v2872_v36 = vadd.f32 %v2871_v6, %v2870_v21  ;;  %v2864_v61 = vrot.slane %v2863_v48, 4 }
 0xb8a   :  { %v3952_v43 = vpop.f32.mrf.mxu1 }
 0xb8b   :  { %v2850_v30 = vmul.f32 %v3952_v43, %v1937_v8  ;;  %v2873_v29 = vrot.slane %v2872_v36, 2  ;;  %v2865_v58 = vadd.f32 %v2864_v61, %v2863_v48 }
 0xb8c   :  { %v2778_v19 = vpop.f32.mrf.mxu1 }
 0xb8d   :  { %v2884_v44 = vsel %vm85_vm0, %v2850_v30, 0.0  ;;  %v2849_v53 = vmul.f32 %v2778_v19, %v1937_v8  ;;  %v2874_v28 = vadd.f32 %v2873_v29, %v2872_v36  ;;  %v2866_v57 = vrot.slane %v2865_v58, 2 }
 0xb8e   :  { %v2885_v54 = vrot.slane %v2884_v44, 4  ;;  %v3955_v26 = vpop.f32.mrf.mxu1 }
 0xb8f   :  { %v2877_v23 = vsel %vm85_vm0, %v2849_v53, 0.0  ;;  %v2852_v5 = vmul.f32 %v3955_v26, %v1937_v8  ;;  %v2867_v3 = vadd.f32 %v2866_v57, %v2865_v58  ;;  %v2875_v42 = vrot.slane %v2874_v28, 1 }
 0xb90   :  { %v2886_v45 = vadd.f32 %v2885_v54, %v2884_v44  ;;  %v2878_v38 = vrot.slane %v2877_v23, 4  ;;  %v2788_v17 = vpop.f32.mrf.mxu1 }
 0xb91   :  { %v2898_v59 = vsel %vm85_vm0, %v2852_v5, 0.0  ;;  %v2851_v20 = vmul.f32 %v2788_v17, %v1937_v8  ;;  %v2868_v32 = vrot.slane %v2867_v3, 1  ;;  %v2876_v47 = vadd.f32 %v2875_v42, %v2874_v28 }
 0xb92   :  { %v2887_v16 = vrot.slane %v2886_v45, 2  ;;  %v2879_v18 = vadd.f32 %v2878_v38, %v2877_v23  ;;  %v3958_v11 = vpop.f32.mrf.mxu1  ;;  %v2899_v56 = vrot.slane %v2898_v59, 4 }
 0xb93   :  { %v2891_v10 = vsel %vm85_vm0, %v2851_v20, 0.0  ;;  %v2854_v55 = vmul.f32 %v3958_v11, %v1937_v8  ;;  %v2869_v12 = vadd.f32 %v2868_v32, %v2867_v3 }
 0xb94   :  { %v2880_v22 = vrot.slane %v2879_v18, 2  ;;  %v2892_v24 = vrot.slane %v2891_v10, 4  ;;  %v2798_v25 = vpop.f32.mrf.mxu1  ;;  %v2888_v7 = vadd.f32 %v2887_v16, %v2886_v45  ;;  %v2900_v62 = vadd.f32 %v2899_v56, %v2898_v59 }
 0xb95   :  { %v2912_v60 = vsel %vm85_vm0, %v2854_v55, 0.0  ;;  %v2853_v14 = vmul.f32 %v2798_v25, %v1937_v8  ;;  %v3000_v30 = vsel %vm1372_vm4, %v2876_v47, %v2869_v12 }
 0xb96   :  { %v2881_v4 = vadd.f32 %v2880_v22, %v2879_v18  ;;  %v2893_v39 = vadd.f32 %v2892_v24, %v2891_v10  ;;  %v3961_v2 = vpop.f32.mrf.mxu1  ;;  %v2901_v46 = vrot.slane %v2900_v62, 2  ;;  %v2913_v41 = vrot.slane %v2912_v60, 4 }
 0xb97   :  { %v2905_v9 = vsel %vm85_vm0, %v2853_v14, 0.0  ;;  %v2856_v51 = vmul.f32 %v3961_v2, %v5253_v50  ;;  %v2889_v31 = vrot.slane %v2888_v7, 1 }
 0xb98   :  { %v2882_v40 = vrot.slane %v2881_v4, 1  ;;  %v2894_v33 = vrot.slane %v2893_v39, 2  ;;  %v2906_v13 = vrot.slane %v2905_v9, 4  ;;  %v2808_v52 = vpop.f32.mrf.mxu1  ;;  %v2914_v27 = vadd.f32 %v2913_v41, %v2912_v60 }
 0xb99   :  { %v2926_v49 = vsel %vm85_vm0, %v2856_v51, 0.0  ;;  %v2855_v8 = vmul.f32 %v2808_v52, %v5253_v50  ;;  %v2902_v21 = vadd.f32 %v2901_v46, %v2900_v62  ;;  %v2890_v53 = vadd.f32 %v2889_v31, %v2888_v7 }
 0xb9a   :  { %v2883_v15 = vadd.f32 %v2882_v40, %v2881_v4  ;;  %v2895_v1 = vadd.f32 %v2894_v33, %v2893_v39  ;;  %v2907_v6 = vadd.f32 %v2906_v13, %v2905_v9  ;;  %v3964_v48 = vpop.f32.mrf.mxu1  ;;  %v2915_v36 = vrot.slane %v2914_v27, 2 }
 0xb9b   :  { %v2919_v61 = vsel %vm85_vm0, %v2855_v8, 0.0  ;;  %v2858_v43 = vmul.f32 %v3964_v48, %v5253_v50  ;;  %v2927_v19 = vrot.slane %v2926_v49, 4  ;;  %v2903_v26 = vrot.slane %v2902_v21, 1 }
 0xb9c   :  { %v2896_v29 = vrot.slane %v2895_v1, 1  ;;  %v2908_v58 = vrot.slane %v2907_v6, 2  ;;  %v2818_v44 = vpop.f32.mrf.mxu1  ;;  %v3001_v28 = vsel %vm1374_vm5, %v2883_v15, %v3000_v30  ;;  %v2916_v57 = vadd.f32 %v2915_v36, %v2914_v27 }
 0xb9d   :  { %v2920_v54 = vrot.slane %v2919_v61, 4  ;;  %v2940_v3 = vsel %vm85_vm0, %v2858_v43, 0.0  ;;  %v2857_v38 = vmul.f32 %v2818_v44, %v5253_v50  ;;  %v2928_v59 = vadd.f32 %v2927_v19, %v2926_v49 }
 0xb9e   :  { %v2897_v23 = vadd.f32 %v2896_v29, %v2895_v1  ;;  %v2909_v5 = vadd.f32 %v2908_v58, %v2907_v6  ;;  %v3002_v20 = vsel %vm1376_vm7, %v2890_v53, %v3001_v28  ;;  %v2917_v42 = vrot.slane %v2916_v57, 1 }
 0xb9f   :  { %v2921_v45 = vadd.f32 %v2920_v54, %v2919_v61  ;;  %v2941_v16 = vrot.slane %v2940_v3, 4  ;;  %v2933_v18 = vsel %vm85_vm0, %v2857_v38, 0.0  ;;  %v2904_v56 = vadd.f32 %v2903_v26, %v2902_v21 }
 0xba0   :  { %v2910_v17 = vrot.slane %v2909_v5, 1  ;;  %v3003_v11 = vsel %vm1378_vm8, %v2897_v23, %v3002_v20  ;;  %v2934_v55 = vrot.slane %v2933_v18, 4  ;;  %v2929_v24 = vrot.slane %v2928_v59, 2 }
 0xba1   :  { %v2922_v32 = vrot.slane %v2921_v45, 2  ;;  %v3004_v62 = vsel %vm1380_vm10, %v2904_v56, %v3003_v11  ;;  %v2918_v60 = vadd.f32 %v2917_v42, %v2916_v57  ;;  %v2942_v14 = vadd.f32 %v2941_v16, %v2940_v3 }
 0xba2   :  { %v2911_v10 = vadd.f32 %v2910_v17, %v2909_v5  ;;  %v3967_v22 = vpop.f32.mrf.mxu1  ;;  %v2935_v25 = vadd.f32 %v2934_v55, %v2933_v18  ;;  %v2930_v12 = vadd.f32 %v2929_v24, %v2928_v59 }
 0xba3   :  { %v2860_v7 = vmul.f32 %v3967_v22, %v5253_v50  ;;  %v2923_v41 = vadd.f32 %v2922_v32, %v2921_v45  ;;  %v2943_v13 = vrot.slane %v2942_v14, 2 }
 0xba4   :  { %v2828_v47 = vpop.f32.mrf.mxu1  ;;  %v3005_v4 = vsel %vm1382_vm11, %v2911_v10, %v3004_v62  ;;  %v2936_v39 = vrot.slane %v2935_v25, 2  ;;  %v2931_v1 = vrot.slane %v2930_v12, 1 }
 0xba5   :  { %v2954_v2 = vsel %vm85_vm0, %v2860_v7, 0.0  ;;  %v2859_v46 = vmul.f32 %v2828_v47, %v5253_v50  ;;  %v3006_v51 = vsel %vm1384_vm13, %v2918_v60, %v3005_v4  ;;  %v2924_v8 = vrot.slane %v2923_v41, 1  ;;  %v3593_v60 = vld [vmem:[%s5412_s5 + $0x15] ss:$0 sm:$0xff] }
 0xba6   :  { %v2955_v9 = vrot.slane %v2954_v2, 4  ;;  %v2937_v40 = vadd.f32 %v2936_v39, %v2935_v25  ;;  %3979 = vmatprep.mubr.msk.f32.mxu0 %vm85_vm0, %v3006_v51  ;;  %v2944_v61 = vadd.f32 %v2943_v13, %v2942_v14  ;;  %v2932_v28 = vadd.f32 %v2931_v1, %v2930_v12 }
 0xba7   :  { %v2947_v33 = vsel %vm85_vm0, %v2859_v46, 0.0  ;;  %v2925_v19 = vadd.f32 %v2924_v8, %v2923_v41  ;;  %v3598_v8 = vld [vmem:[%s5410_s3 + $0x110] sm:$0xff] }
 0xba8   :  { %v2956_v52 = vadd.f32 %v2955_v9, %v2954_v2  ;;  %v2948_v31 = vrot.slane %v2947_v33, 4  ;;  %v2938_v6 = vrot.slane %v2937_v40, 1  ;;  %v2945_v26 = vrot.slane %v2944_v61, 1 }
 0xba9   :  { %v3970_v27 = vpop.f32.mrf.mxu1  ;;  %v3007_v38 = vsel %vm1372_vm4, %v2932_v28, %v2925_v19 }
 0xbaa   :  { %v2862_v49 = vmul.f32 %v3970_v27, %v5253_v50  ;;  %v2949_v15 = vadd.f32 %v2948_v31, %v2947_v33  ;;  %v2957_v43 = vrot.slane %v2956_v52, 2  ;;  %v2939_v57 = vadd.f32 %v2938_v6, %v2937_v40 }
 0xbab   :  { %v2838_v21 = vpop.f32.mrf.mxu1  ;;  %v2946_v42 = vadd.f32 %v2945_v26, %v2944_v61 }
 0xbac   :  { %v2968_v48 = vsel %vm85_vm0, %v2862_v49, 0.0  ;;  %v2861_v36 = vmul.f32 %v2838_v21, %v5253_v50  ;;  %v2950_v30 = vrot.slane %v2949_v15, 2  ;;  %v2958_v23 = vadd.f32 %v2957_v43, %v2956_v52  ;;  %v3599_v49 = vld [vmem:[%s5410_s3 + $0x138] sm:$0xff]  ;;  %v3596_v21 = vld [vmem:[%s5410_s3 + $0xc0] sm:$0xff] }
 0xbad   :  { %v2969_v29 = vrot.slane %v2968_v48, 4  ;;  %v3008_v17 = vsel %vm1374_vm5, %v2939_v57, %v3007_v38  ;;  %3982 = vmatprep.subr.mxu0 %v3599_v49  ;;  %v3617_v38 = vld [vmem:[%s5411_s4 + $0xe8] sm:$0xff] }
 0xbae   :  { %v2961_v58 = vsel %vm85_vm0, %v2861_v36, 0.0  ;;  %v2951_v44 = vadd.f32 %v2950_v30, %v2949_v15  ;;  %v2959_v16 = vrot.slane %v2958_v23, 1  ;;  %v3009_v11 = vsel %vm1376_vm7, %v2946_v42, %v3008_v17  ;;  %v3597_v15 = vld [vmem:[%s5410_s3 + $0xe8] sm:$0xff]  ;;  %v3615_v17 = vld [vmem:[%s5411_s4 + $0xd8] sm:$0xff]  ;;  %v3612_v42 = vld [vmem:[%s5411_s4 + $0xc0] sm:$0xff] }
 0xbaf   :  { %v2970_v53 = vadd.f32 %v2969_v29, %v2968_v48  ;;  %v2962_v54 = vrot.slane %v2961_v58, 4  ;;  %v3123_v30 = vsub.s32 6, %v4337_v34 }
 0xbb0   :  { %v2952_v5 = vrot.slane %v2951_v44, 1  ;;  %v2960_v32 = vadd.f32 %v2959_v16, %v2958_v23  ;;  %v3611_v16 = vld [vmem:[%s5411_s4 + $0xb8] sm:$0xff] }
 0xbb1   :  { %v2971_v3 = vrot.slane %v2970_v53, 2  ;;  %v2963_v45 = vadd.f32 %v2962_v54, %v2961_v58  ;;  %v4221_v58 = vld [vmem:[%s5409_s2] sm:$0xff] }
 0xbb2   :  { %v2953_v59 = vadd.f32 %v2952_v5, %v2951_v44  ;;  %v3124_v19 = vrot.slane %v4221_v58, %v3123_v30  ;;  %v3129_v44 = vsub.s32 7, %v4337_v34  ;;  %v3618_v34 = vld [vmem:[%s5411_s4 + $0xf0] sm:$0xff] }
 0xbb3   :  { %v2972_v50 = vadd.f32 %v2971_v3, %v2970_v53  ;;  %v2964_v20 = vrot.slane %v2963_v45, 2 }
 0xbb4   :  { %v3010_v10 = vsel %vm1378_vm8, %v2953_v59, %v3009_v11  ;;  %v3130_v26 = vrot.slane %v4221_v58, %v3129_v44  ;;  %v3614_v59 = vld [vmem:[%s5411_s4 + $0xd0] sm:$0xff]  ;;  %v3609_v11 = vld [vmem:[%s5411_s4 + $0xa8] sm:$0xff] }
 0xbb5   :  { %v2965_v18 = vadd.f32 %v2964_v20, %v2963_v45  ;;  %v2973_v56 = vrot.slane %v2972_v50, 1  ;;  %v3011_v25 = vsel %vm1380_vm10, %v2960_v32, %v3010_v10  ;;  %v3619_v45 = vld [vmem:[%s5411_s4 + $0xf8] sm:$0xff]  ;;  %v3613_v20 = vld [vmem:[%s5411_s4 + $0xc8] sm:$0xff] }
 0xbb6   :  { %3993 = vmatprep.subr.mxu1 %v3619_v45  ;;  %v3607_v10 = vld [vmem:[%s5411_s4 + $0x98] sm:$0xff]  ;;  %v3605_v32 = vld [vmem:[%s5411_s4 + $0x88] sm:$0xff] }
 0xbb7   :  { %v2966_v55 = vrot.slane %v2965_v18, 1  ;;  %v2974_v24 = vadd.f32 %v2973_v56, %v2972_v50  ;;  %3994 = vmatpush3.msra.mxu1 %v3619_v45  ;;  %v3616_v50 = vld [vmem:[%s5411_s4 + $0xe0] sm:$0xff] }
 0xbb8   :  { %3995 = vmatprep.subr.mxu1 %v3618_v34  ;;  %v3608_v56 = vld [vmem:[%s5411_s4 + $0xa0] sm:$0xff] }
 0xbb9   :  { %v2967_v22 = vadd.f32 %v2966_v55, %v2965_v18  ;;  %3996 = vmatpush3.msra.mxu1 %v3618_v34  ;;  %v3610_v18 = vld [vmem:[%s5411_s4 + $0xb0] sm:$0xff] }
 0xbba   :  { %3997 = vmatprep.subr.mxu1 %v3617_v38  ;;  %v3606_v55 = vld [vmem:[%s5411_s4 + $0x90] sm:$0xff] }
 0xbbb   :  { %v3012_v7 = vsel %vm1382_vm11, %v2967_v22, %v3011_v25  ;;  %3998 = vmatpush3.msra.mxu1 %v3617_v38  ;;  %v3604_v22 = vld [vmem:[%s5411_s4 + $0x80] sm:$0xff] }
 0xbbc   :  { %v3013_v62 = vsel %vm1384_vm13, %v2974_v24, %v3012_v7  ;;  %3999 = vmatprep.subr.mxu1 %v3616_v50  ;;  %v3601_v24 = vld [vmem:[%s5412_s5 + $0x16] ss:$0 sm:$0xff] }
 0xbbd   :  { %3980 = vmatmul.mubr.msk.f32.vlgmr.msra.gmra.mxu0 %vm85_vm0, %v3013_v62  ;;  %4000 = vmatpush3.msra.mxu1 %v3616_v50 }
 0xbbe   :  { %3983 = vmatpush3.msra.mxu0 %v3599_v49  ;;  %4001 = vmatprep.subr.mxu1 %v3615_v17 }
 0xbbf   :  { %3984 = vmatprep.subr.mxu0 %v3598_v8  ;;  %4002 = vmatpush3.msra.mxu1 %v3615_v17 }
 0xbc0   :  { %3985 = vmatpush3.msra.mxu0 %v3598_v8  ;;  %4003 = vmatprep.subr.mxu1 %v3614_v59 }
 0xbc1   :  { %3986 = vmatprep.subr.mxu0 %v3597_v15  ;;  %4004 = vmatpush3.msra.mxu1 %v3614_v59 }
 0xbc2   :  { %3987 = vmatpush3.msra.mxu0 %v3597_v15  ;;  %4005 = vmatprep.subr.mxu1 %v3613_v20  ;;  %v3621_v15 = vld [vmem:[%s5412_s5 + $0x17] ss:$0 sm:$0xff] }
 0xbc3   :  { %3988 = vmatprep.subr.mxu0 %v3596_v21  ;;  %4006 = vmatpush3.msra.mxu1 %v3613_v20  ;;  %v46_v20 = vld [vmem:[%s5409_s2 + $0x8] sm:$0x3] }
 0xbc4   :  { %3989 = vmatpush3.msra.mxu0 %v3596_v21  ;;  %4007 = vmatprep.subr.mxu1 %v3612_v42 }
 0xbc5   :  { %4008 = vmatpush3.msra.mxu1 %v3612_v42 }
 0xbc6   :  { %4009 = vmatprep.subr.mxu1 %v3611_v16 }
 0xbc7   :  { %4010 = vmatpush3.msra.mxu1 %v3611_v16  ;;  %v3369_v16 = vrot.slane %v46_v20, %v4340_v35 }
 0xbc8   :  { %4011 = vmatprep.subr.mxu1 %v3610_v18 }
 0xbc9   :  { %4012 = vmatpush3.msra.mxu1 %v3610_v18 }
 0xbca   :  { %4013 = vmatprep.subr.mxu1 %v3609_v11 }
 0xbcb   :  { %4014 = vmatpush3.msra.mxu1 %v3609_v11 }
 0xbcc   :  { %4015 = vmatprep.subr.mxu1 %v3608_v56 }
 0xbcd   :  { %4016 = vmatpush3.msra.mxu1 %v3608_v56 }
 0xbce   :  { %4017 = vmatprep.subr.mxu1 %v3607_v10 }
 0xbcf   :  { %4018 = vmatpush3.msra.mxu1 %v3607_v10 }
 0xbd0   :  { %4019 = vmatprep.subr.mxu1 %v3606_v55 }
 0xbd1   :  { %4020 = vmatpush3.msra.mxu1 %v3606_v55  ;;  %v3375_v55 = vrot.slane %v46_v20, %v4346_v37 }
 0xbd2   :  { %4021 = vmatprep.subr.mxu1 %v3605_v32 }
 0xbd3   :  { %4022 = vmatpush3.msra.mxu1 %v3605_v32 }
 0xbd4   :  { %4023 = vmatprep.subr.mxu1 %v3604_v22 }
 0xbd5   :  { %4024 = vmatpush3.msra.mxu1 %v3604_v22 }
 0xc7d   :  { %v3981_v14 = vpop.f32.mrf.mxu0 }
 0xc7e   :  { %v3090_v47 = vadd.f32 %v3981_v14, %v3593_v60 }
 0xc7f   :  { %v3084_v4 = vpop.f32.mrf.mxu0 }
 0xc80   :  { %v5293_v39 = vadd.f32 %v3090_v47, %v4862_v0  ;;  %v3085_v2 = vadd.f32 %v3593_v60, %v3084_v4 }
 0xc82   :  { %v5296_v46 = vadd.f32 %v3085_v2, %v4865_v63  ;;  %v3098_v41 = vsel %vm85_vm0, %v5293_v39, 0.0 }
 0xc83   :  { %3099 = vadd.xlane.f32.xlu1 %v3098_v41 }
 0xc84   :  { %v3095_v9 = vsel %vm85_vm0, %v5296_v46, 0.0 }
 0xc85   :  { %3096 = vadd.xlane.f32.xlu0 %v3095_v9 }
 0xd0c   :  { %v3100_v51 = vpop.xlane.xlu1 %3099 }
 0xd0d   :  { %v3102_v12 = vmul.f32 0.03125, %v3100_v51 }
 0xd0e   :  { %v3097_v40 = vpop.xlane.xlu0 %3096 }
 0xd0f   :  { %v3104_v33 = vsub.f32 %v5293_v39, %v3102_v12  ;;  %v3101_v13 = vmul.f32 0.03125, %v3097_v40 }
 0xd11   :  { %v3103_v0 = vsub.f32 %v5296_v46, %v3101_v13  ;;  %v3106_v52 = vmul.f32 %v3104_v33, %v3104_v33 }
 0xd13   :  { %v3110_v63 = vsel %vm85_vm0, %v3106_v52, 0.0  ;;  %v3105_v31 = vmul.f32 %v3103_v0, %v3103_v0 }
 0xd14   :  { %3111 = vadd.xlane.f32.xlu1 %v3110_v63 }
 0xd15   :  { %v3107_v27 = vsel %vm85_vm0, %v3105_v31, 0.0 }
 0xd16   :  { %3108 = vadd.xlane.f32.xlu0 %v3107_v27 }
 0xd9d   :  { %v3112_v1 = vpop.xlane.xlu1 %3111 }
 0xd9e   :  { %v3114_v6 = vmul.f32 0.03125, %v3112_v1 }
 0xd9f   :  { %v3109_v48 = vpop.xlane.xlu0 %3108 }
 0xda0   :  { %v3116_v36 = vadd.f32 1e-05, %v3114_v6  ;;  %v3113_v61 = vmul.f32 0.03125, %v3109_v48 }
 0xda2   :  { %4189 = vrsqrt.f32 %v3116_v36  ;;  %v3115_v43 = vadd.f32 1e-05, %v3113_v61 }
 0xda4   :  { %4191 = vrsqrt.f32 %v3115_v43 }
 0xdaf   :  { %v4190_v29 = vpop.eup %4189 }
 0xdb0   :  { %v3120_v53 = vmul.f32 %v4190_v29, %v3104_v33 }
 0xdb1   :  { %v4192_v28 = vpop.eup %4191 }
 0xdb2   :  { %v3119_v57 = vmul.f32 %v4192_v28, %v3103_v0  ;;  %v3126_v54 = vmul.f32 %v3124_v19, %v3120_v53 }
 0xdb4   :  { %v3125_v23 = vmul.f32 %v3124_v19, %v3119_v57  ;;  %v3132_v3 = vadd.f32 %v3130_v26, %v3126_v54 }
 0xdb6   :  { %v3131_v5 = vadd.f32 %v3130_v26, %v3125_v23  ;;  %v3380_v23 = vld [vmem:[%s5413_s6 + $0x10] sm:$0xff] }
 0xdb8   :  { %3990 = vmatprep.mubr.msk.f32.mxu0 %vm85_vm0, %v3131_v5  ;;  %v3379_v5 = vld [vmem:[%s5413_s6 + $0x8] sm:$0xff] }
 0xdb9   :  { %3991 = vmatmul.mubr.msk.f32.vlgmr.msra.gmra.mxu0 %vm85_vm0, %v3132_v3  ;;  %v3378_v3 = vld [vmem:[%s5413_s6] sm:$0xff] }
 0xe79   :  { %v3992_v25 = vpop.f32.mrf.mxu0 }
 0xe7a   :  { %v3220_v7 = vadd.f32 %v3992_v25, %v3601_v24 }
 0xe7b   :  { %v3214_v62 = vpop.f32.mrf.mxu0 }
 0xe7c   :  { %v3226_v60 = vmul.f32 0.044715, %v3220_v7  ;;  %v3215_v14 = vadd.f32 %v3601_v24, %v3214_v62  ;;  %v3224_v27 = vmul.f32 0.5, %v3220_v7 }
 0xe7e   :  { %v3228_v47 = vmul.f32 %v3226_v60, %v3220_v7  ;;  %v3225_v4 = vmul.f32 0.044715, %v3215_v14  ;;  %v3223_v63 = vmul.f32 0.5, %v3215_v14 }
 0xe80   :  { %v3230_v2 = vmul.f32 %v3228_v47, %v3220_v7  ;;  %v3227_v41 = vmul.f32 %v3225_v4, %v3215_v14 }
 0xe82   :  { %v3232_v9 = vadd.f32 %v3230_v2, %v3220_v7  ;;  %v3229_v51 = vmul.f32 %v3227_v41, %v3215_v14 }
 0xe84   :  { %v3234_v12 = vmul.f32 0.7978846, %v3232_v9  ;;  %v3231_v40 = vadd.f32 %v3229_v51, %v3215_v14 }
 0xe86   :  { %4193 = vtanh.f32 %v3234_v12  ;;  %v3233_v33 = vmul.f32 0.7978846, %v3231_v40 }
 0xe88   :  { %4195 = vtanh.f32 %v3233_v33 }
 0xe93   :  { %v4194_v13 = vpop.eup %4193 }
 0xe94   :  { %v3238_v52 = vadd.f32 1.0, %v4194_v13 }
 0xe95   :  { %v4196_v0 = vpop.eup %4195 }
 0xe96   :  { %v3237_v31 = vadd.f32 1.0, %v4196_v0  ;;  %v3240_v8 = vmul.f32 %v3238_v52, %v3224_v27 }
 0xe98   :  { %v3239_v49 = vmul.f32 %v3237_v31, %v3223_v63 }
 0xe9a   :  { %4025 = vmatprep.mubr.f32.mxu1 %v3239_v49 }
 0xe9b   :  { %4026 = vmatmul.mubr.f32.vlgmr.msra.gmra.mxu1 %v3240_v8 }
 0xf5b   :  { %v4027_v21 = vpop.f32.mrf.mxu1 }
 0xf5c   :  { %v3335_v1 = vadd.f32 %v4027_v21, %v3621_v15 }
 0xf5d   :  { %v3329_v6 = vpop.f32.mrf.mxu1 }
 0xf5e   :  { %v3330_v48 = vadd.f32 %v3621_v15, %v3329_v6  ;;  %v3339_v36 = vadd.f32 %v3335_v1, %v5293_v39 }
 0xf60   :  { %v3343_v61 = vsel %vm85_vm0, %v3339_v36, 0.0  ;;  %v3338_v43 = vadd.f32 %v3330_v48, %v5296_v46  ;;  %v3381_v46 = vld [vmem:[%s5413_s6 + $0x18] sm:$0xff]  ;;  %s4247_s6 = smov [#allocation2]  }
 0xf61   :  { %3344 = vadd.xlane.f32.xlu1 %v3343_v61  ;;  %4028 = vmatprep.subr.mxu0 %v3381_v46  ;;  %s3470_s30 = sshll.u32 %s4247_s6, 4  ;;  %s3471_s30 = int_to_ptr.vmem [resolvable:$true] %s3470_s30 }
 0xf62   :  { %v3340_v30 = vsel %vm85_vm0, %v3338_v43, 0.0  ;;  %4029 = vmatpush3.msra.mxu0 %v3381_v46  ;;  %s4222_s2 = scalar_lea.vmem %s3471_s30, 256  ;;  %p4227_p1 = scmp.lt.s32.totalorder %s3471_s30, %s3471_s30 }
 0xf63   :  { %3341 = vadd.xlane.f32.xlu0 %v3340_v30  ;;  %4030 = vmatprep.subr.mxu0 %v3380_v23  ;;  %p4223_p0 = scmp.ne.s32.totalorder %s3471_s30, %s4222_s2  ;;  %p4228_p2 = scmp.lt.s32.totalorder %s4222_s2, %s4222_s2 }
 0xf64   :  { %4031 = vmatpush3.msra.mxu0 %v3380_v23 }
 0xf65   :  { %4032 = vmatprep.subr.mxu0 %v3379_v5  ;;  %p4229_p3 = por %p4228_p2, %p4227_p1 }
 0xf66   :  { %4033 = vmatpush3.msra.mxu0 %v3379_v5 }
 0xf67   :  { %4034 = vmatprep.subr.mxu0 %v3378_v3  ;;  %p4230_p4 = pnand %p4229_p3, %p4223_p0 }
 0xf68   :  { %4035 = vmatpush3.msra.mxu0 %v3378_v3 }
 0xfea   :  { %v3345_v29 = vpop.xlane.xlu1 %3344 }
 0xfeb   :  { %v3347_v58 = vmul.f32 0.03125, %v3345_v29 }
 0xfec   :  { %v3342_v19 = vpop.xlane.xlu0 %3341 }
 0xfed   :  { %v3349_v44 = vsub.f32 %v3339_v36, %v3347_v58  ;;  %v3346_v53 = vmul.f32 0.03125, %v3342_v19 }
 0xfef   :  { %v3348_v28 = vsub.f32 %v3338_v43, %v3346_v53  ;;  %v3351_v57 = vmul.f32 %v3349_v44, %v3349_v44 }
 0xff1   :  { %v3355_v54 = vsel %vm85_vm0, %v3351_v57, 0.0  ;;  %v3350_v26 = vmul.f32 %v3348_v28, %v3348_v28 }
 0xff2   :  { %3356 = vadd.xlane.f32.xlu1 %v3355_v54 }
 0xff3   :  { %v3352_v39 = vsel %vm85_vm0, %v3350_v26, 0.0 }
 0xff4   :  { %3353 = vadd.xlane.f32.xlu0 %v3352_v39 }
0x107b   :  { %v3357_v45 = vpop.xlane.xlu1 %3356 }
0x107c   :  { %v3359_v34 = vmul.f32 0.03125, %v3357_v45 }
0x107d   :  { %v3354_v38 = vpop.xlane.xlu0 %3353 }
0x107e   :  { %v3361_v50 = vadd.f32 1e-05, %v3359_v34  ;;  %v3358_v17 = vmul.f32 0.03125, %v3354_v38 }
0x1080   :  { %4197 = vrsqrt.f32 %v3361_v50  ;;  %v3360_v59 = vadd.f32 1e-05, %v3358_v17 }
0x1082   :  { %4199 = vrsqrt.f32 %v3360_v59 }
0x108d   :  { %v4198_v42 = vpop.eup %4197 }
0x108e   :  { %v3365_v18 = vmul.f32 %v4198_v42, %v3349_v44 }
0x108f   :  { %v4200_v11 = vpop.eup %4199 }
0x1090   :  { %v3364_v56 = vmul.f32 %v4200_v11, %v3348_v28  ;;  %v3371_v10 = vmul.f32 %v3369_v16, %v3365_v18 }
0x1092   :  { %v3370_v32 = vmul.f32 %v3369_v16, %v3364_v56  ;;  %v3377_v24 = vadd.f32 %v3375_v55, %v3371_v10 }
0x1094   :  { %v3376_v22 = vadd.f32 %v3375_v55, %v3370_v32 }
0x1096   :  { %4036 = vmatprep.mubr.msk.f32.mxu0 %vm85_vm0, %v3376_v22 }
0x1097   :  { %4037 = vmatmul.mubr.msk.f32.vlgmr.msra.gmra.mxu0 %vm85_vm0, %v3377_v24 }
0x1157   :  { %v4038_v25 = vpop.f32.mrf.mxu0 }
0x1158   :  { %3464 = vst [vmem:[#allocation2 + $0x8] sm:$0xff] %v4038_v25 }
0x1159   :  { %v3454_v7 = vpop.f32.mrf.mxu0 }
0x115a   :  { %3463 = vst [vmem:[#allocation2] sm:$0xff] %v3454_v7 }
0x115b   :  { %4233 = shalt.err (!%p4230_p4)
}
0x115c   :  { %s4248_s8 = smov 128   ;;  %s4249_s9 = smov 8  }
0x115d   :  { %3476 = dma.vmem_to_hbm [thread:$0]  %s3471_s30, 256, %s5414_s7, [#allocation3], %s4248_s8, %s4248_s8, %s4249_s9  }
0x115e   :  { %4242 = dma.done.wait [#allocation3], 256  }
0x115f   :  { %4243 = vsyncadd [#allocation3], 4294967040 }
0x1160   :  { %3480 = vsyncpa [#allocation3], 1 }

</bundles_post_ra>
